<compile_context>
chip_gen: v5e
topology: v5e:2x2
jax: 0.10.0
libtpu: 0.0.40
codegen_flags: <defaults>
</compile_context>

<pallas_src>
import math
import functools

import jax
import jax.numpy as jnp
from jax.experimental import pallas as pl
from jax.experimental.pallas import tpu as pltpu

BN_EPS = 1e-5
BN_SCALE = 1.0 / math.sqrt(1.0 + BN_EPS)


# ---------------------------------------------------------------------------
# Weight preparation (block-Toeplitz matrices, BN / pool scales folded in)
# ---------------------------------------------------------------------------
def prepare_weights(params):
    """Fold BN eval-scale / avg-pool factors into bf16 matmul matrices."""
    f32, bf16 = jnp.float32, jnp.bfloat16

    def conv_mats(w, win, scale):
        # w: (3, 3, cin, cout) -> 3 matrices (win*cin, wout*cout) such that
        # M_d[(j+dj)*cin + ci, j*cout + co] = scale * w[d, dj, ci, co]
        _, _, cin, cout = w.shape
        wout = win - 2
        w = w.astype(f32) * scale
        mats = []
        for d in range(3):
            m = sum(jnp.kron(jnp.eye(win, wout, k=-dj, dtype=f32), w[d, dj])
                    for dj in range(3))
            mats.append(m.astype(bf16))
        return mats

    mats = []
    mats += conv_mats(params["w1"], 28, BN_SCALE)            # 3 x (28, 208)
    mats += conv_mats(params["w2"], 26, BN_SCALE)            # 3 x (208, 384)
    # maxpool column decimation (keep even 16-wide blocks) + 1x1 conv 16 -> 8
    sel = (jnp.arange(23)[:, None] == 2 * jnp.arange(12)[None, :]).astype(f32)
    mats.append(jnp.kron(sel, params["wt"].astype(f32)).astype(bf16))  # (368, 96)
    mats += conv_mats(params["w3"], 12, BN_SCALE)            # 3 x (96, 160)
    mats += conv_mats(params["w4"], 10, BN_SCALE)            # 3 x (160, 128)
    mats += conv_mats(params["w5"], 8, BN_SCALE)             # 3 x (128, 96)
    # avgpool(6x6) column-sum + 1/36 + conv6 + BN scale in one (96, 16) matrix
    mats.append((jnp.tile(params["w6"].astype(f32), (6, 1))
                 * (BN_SCALE / 36.0)).astype(bf16))
    mats.append(params["w7"].astype(bf16))                   # (16, 10)
    return tuple(mats)


# ---------------------------------------------------------------------------
# Fused kernel: conv1..conv7 + maxpool + avgpool + log_softmax
# ---------------------------------------------------------------------------
def _net_kernel(x_ref,
                m1a, m1b, m1c,
                m2a, m2b, m2c,
                mt,
                m3a, m3b, m3c,
                m4a, m4b, m4c,
                m5a, m5b, m5c,
                w6, w7,
                o_ref):
    f32, bf16 = jnp.float32, jnp.bfloat16

    def conv3x3(v, mats, step):
        # Spatial rows of `v` are `step` buffer rows apart (per-image stride
        # is 28 rows).  Valid 3x3 conv = 3 shifted row slices, each matmul'd
        # with a block-Toeplitz matrix holding the 3 horizontal taps.
        rows = v.shape[0] - 2 * step
        acc = jnp.dot(v[:rows].astype(bf16), mats[0][...],
                      preferred_element_type=f32)
        for d in (1, 2):
            acc = acc + jnp.dot(v[d * step:d * step + rows].astype(bf16),
                                mats[d][...], preferred_element_type=f32)
        return jnp.maximum(acc, 0.0)    # ReLU; BN scale already in the mats

    x = x_ref[...].astype(f32)                        # (R,    28)  28 x 1ch
    y1 = conv3x3(x, (m1a, m1b, m1c), 1)               # (R-2, 208)  26 x 8
    y2 = conv3x3(y1, (m2a, m2b, m2c), 1)              # (R-4, 384)  24 x 16

    # MaxPool2d(2, 2) + 1x1 trans conv (16 -> 8); odd column phases are
    # dropped by mt's zero rows.
    rmax = jnp.maximum(y2[:-1], y2[1:])               # vertical max
    cmax = jnp.maximum(rmax[:, :-16], rmax[:, 16:])   # horizontal max
    t = jnp.dot(cmax.astype(bf16), mt[...],
                preferred_element_type=f32)           # (R-5,  96)  12 x 8

    # After pooling, neighbouring spatial rows are 2 buffer rows apart.
    y3 = conv3x3(t, (m3a, m3b, m3c), 2)               # (R-9, 160)  10 x 16
    y4 = conv3x3(y3, (m4a, m4b, m4c), 2)              # (R-13,128)   8 x 16
    y5 = conv3x3(y4, (m5a, m5b, m5c), 2)              # (R-17, 96)   6 x 16

    # AvgPool2d(6) + conv6 (1x1 + ReLU + BN) + conv7 (1x1) + log_softmax.
    rows = y5.shape[0] - 10
    rs = y5[:rows]
    for i in range(1, 6):                             # vertical sum of 6 rows
        rs = rs + y5[2 * i:2 * i + rows]
    h = jnp.maximum(jnp.dot(rs.astype(bf16), w6[...],
                            preferred_element_type=f32), 0.0)   # (R-27, 16)
    logits = jnp.dot(h.astype(bf16), w7[...],
                     preferred_element_type=f32)                # (R-27, 10)

    mx = jnp.max(logits, axis=-1, keepdims=True)
    lse = mx + jnp.log(jnp.sum(jnp.exp(logits - mx), axis=-1, keepdims=True))
    logp = logits - lse

    # Per-image results live at rows n*28; trailing rows are padding.
    o_ref[...] = jnp.zeros(o_ref.shape, o_ref.dtype)
    o_ref[pl.ds(0, logp.shape[0]), :] = logp


# ---------------------------------------------------------------------------
# Wrapper
# ---------------------------------------------------------------------------
@functools.partial(jax.jit, static_argnames=("block_n",))
def net_forward(x_nchw, params, block_n=8):
    """Eval-mode forward of `Net`.  x_nchw: (N, 1, 28, 28) -> (N, 10) log-probs."""
    n = x_nchw.shape[0]
    assert x_nchw.shape[1:] == (1, 28, 28), x_nchw.shape

    mats = prepare_weights(params)

    nb = max(1, min(block_n, n))
    if nb != n and nb % 2 == 1:
        nb += 1                       # keep nb*28 a multiple of 8 when tiled
    n_tiles = -(-n // nb)
    n_pad = n_tiles * nb
    rows = nb * 28

    x = x_nchw.reshape(n, 28, 28).astype(jnp.float32)
    if n_pad != n:
        x = jnp.concatenate(
            [x, jnp.zeros((n_pad - n, 28, 28), jnp.float32)], axis=0)
    x2d = x.reshape(n_pad * 28, 28)   # per-image 2-D slabs, 28-row stride

    in_specs = [pl.BlockSpec((rows, 28), lambda i: (i, 0))]
    in_specs += [pl.BlockSpec(m.shape, lambda i: (0, 0)) for m in mats]

    out = pl.pallas_call(
        _net_kernel,
        out_shape=jax.ShapeDtypeStruct((n_pad * 28, 10), jnp.float32),
        grid=(n_tiles,),
        in_specs=in_specs,
        out_specs=pl.BlockSpec((rows, 10), lambda i: (i, 0)),
        compiler_params=pltpu.CompilerParams(
            dimension_semantics=("parallel",)),
    )(x2d, *mats)

    return out.reshape(n_pad, 28, 10)[:n, 0, :]


# ---------------------------------------------------------------------------
# Pure-JAX (XLA) reference of the same eval-mode network, for verification
# ---------------------------------------------------------------------------
@jax.jit
def reference_forward(x_nchw, params):
    s = BN_SCALE

    def conv(x, w):
        return jax.lax.conv_general_dilated(
            x, w, window_strides=(1, 1), padding="VALID",
            dimension_numbers=("NHWC", "HWIO", "NHWC"))

    x = jnp.transpose(x_nchw, (0, 2, 3, 1)).astype(jnp.float32)  # (N,28,28,1)
    x = jnp.maximum(conv(x, params["w1"]), 0.0) * s              # (N,26,26,8)
    x = jnp.maximum(conv(x, params["w2"]), 0.0) * s              # (N,24,24,16)
    n = x.shape[0]
    x = x.reshape(n, 12, 2, 12, 2, 16).max(axis=(2, 4))          # maxpool 2x2
    x = jnp.einsum("nhwc,cd->nhwd", x, params["wt"])             # (N,12,12,8)
    x = jnp.maximum(conv(x, params["w3"]), 0.0) * s
    x = jnp.maximum(conv(x, params["w4"]), 0.0) * s
    x = jnp.maximum(conv(x, params["w5"]), 0.0) * s              # (N,6,6,16)
    x = jnp.mean(x, axis=(1, 2))                                 # avgpool(6)
    x = jnp.maximum(x @ params["w6"], 0.0) * s                   # conv6 1x1
    logits = x @ params["w7"]                                    # conv7 1x1
    return jax.nn.log_softmax(logits, axis=-1)


# ---------------------------------------------------------------------------
# Parameters
# ---------------------------------------------------------------------------
def init_params(key):
    ks = jax.random.split(key, 8)

    def w(k, shape):
        fan_in = shape[0] * shape[1] * shape[2] if len(shape) == 4 else shape[0]
        return jax.random.normal(k, shape, jnp.float32) * math.sqrt(2.0 / fan_in)

    return {
        "w1": w(ks[0], (3, 3, 1, 8)),     # conv1
        "w2": w(ks[1], (3, 3, 8, 16)),    # conv2
        "wt": w(ks[2], (16, 8)),          # trans1 1x1 conv
        "w3": w(ks[3], (3, 3, 8, 16)),    # conv3
        "w4": w(ks[4], (3, 3, 16, 16)),   # conv4
        "w5": w(ks[5], (3, 3, 16, 16)),   # conv5
        "w6": w(ks[6], (16, 16)),         # conv6 1x1
        "w7": w(ks[7], (16, 10)),         # conv7 1x1
    }


if __name__ == "__main__":
    key = jax.random.PRNGKey(0)
    kx, kp = jax.random.split(key)
    x = jax.random.normal(kx, (2, 1, 28, 28), jnp.float32)   # PyTorch NCHW input
    params = init_params(kp)

    out = net_forward(x, params)
    jax.block_until_ready(out)

    assert out.shape == (2, 10)
    assert bool(jnp.all(jnp.isfinite(out)))
    # log_softmax rows must sum to 1 in probability space
    assert bool(jnp.allclose(jnp.sum(jnp.exp(out), axis=-1), 1.0, atol=1e-4))
    # cross-check against the pure-JAX reference (bf16 MXU operands -> loose tol)
    ref = reference_forward(x, params)
    assert bool(jnp.max(jnp.abs(out - ref)) < 0.2)
    print("KERNEL_OK")
</pallas_src>

<mosaic_0001>
module attributes {stable_mosaic.version = 11 : i64} {
  func.func @_net_kernel(%arg0: i32, %arg1: memref<56x28xf32, #tpu.memory_space<vmem>>, %arg2: memref<28x208xbf16, #tpu.memory_space<vmem>>, %arg3: memref<28x208xbf16, #tpu.memory_space<vmem>>, %arg4: memref<28x208xbf16, #tpu.memory_space<vmem>>, %arg5: memref<208x384xbf16, #tpu.memory_space<vmem>>, %arg6: memref<208x384xbf16, #tpu.memory_space<vmem>>, %arg7: memref<208x384xbf16, #tpu.memory_space<vmem>>, %arg8: memref<368x96xbf16, #tpu.memory_space<vmem>>, %arg9: memref<96x160xbf16, #tpu.memory_space<vmem>>, %arg10: memref<96x160xbf16, #tpu.memory_space<vmem>>, %arg11: memref<96x160xbf16, #tpu.memory_space<vmem>>, %arg12: memref<160x128xbf16, #tpu.memory_space<vmem>>, %arg13: memref<160x128xbf16, #tpu.memory_space<vmem>>, %arg14: memref<160x128xbf16, #tpu.memory_space<vmem>>, %arg15: memref<128x96xbf16, #tpu.memory_space<vmem>>, %arg16: memref<128x96xbf16, #tpu.memory_space<vmem>>, %arg17: memref<128x96xbf16, #tpu.memory_space<vmem>>, %arg18: memref<96x16xbf16, #tpu.memory_space<vmem>>, %arg19: memref<16x10xbf16, #tpu.memory_space<vmem>>, %arg20: memref<56x10xf32, #tpu.memory_space<vmem>>) attributes {dimension_semantics = [#tpu.dimension_semantics<parallel>], iteration_bounds = array<i64: 1>, scalar_prefetch = 0 : i64, scratch_operands = 0 : i64, tpu.core_type = #tpu.core_type<tc>, window_params = [{transform_indices = @transform_0, window_bounds = array<i64: 56, 28>}, {pipeline_mode = #tpu.pipeline_mode<synchronous>, transform_indices = @transform_1, window_bounds = array<i64: 28, 208>}, {pipeline_mode = #tpu.pipeline_mode<synchronous>, transform_indices = @transform_2, window_bounds = array<i64: 28, 208>}, {pipeline_mode = #tpu.pipeline_mode<synchronous>, transform_indices = @transform_3, window_bounds = array<i64: 28, 208>}, {pipeline_mode = #tpu.pipeline_mode<synchronous>, transform_indices = @transform_4, window_bounds = array<i64: 208, 384>}, {pipeline_mode = #tpu.pipeline_mode<synchronous>, transform_indices = @transform_5, window_bounds = array<i64: 208, 384>}, {pipeline_mode = #tpu.pipeline_mode<synchronous>, transform_indices = @transform_6, window_bounds = array<i64: 208, 384>}, {pipeline_mode = #tpu.pipeline_mode<synchronous>, transform_indices = @transform_7, window_bounds = array<i64: 368, 96>}, {pipeline_mode = #tpu.pipeline_mode<synchronous>, transform_indices = @transform_8, window_bounds = array<i64: 96, 160>}, {pipeline_mode = #tpu.pipeline_mode<synchronous>, transform_indices = @transform_9, window_bounds = array<i64: 96, 160>}, {pipeline_mode = #tpu.pipeline_mode<synchronous>, transform_indices = @transform_10, window_bounds = array<i64: 96, 160>}, {pipeline_mode = #tpu.pipeline_mode<synchronous>, transform_indices = @transform_11, window_bounds = array<i64: 160, 128>}, {pipeline_mode = #tpu.pipeline_mode<synchronous>, transform_indices = @transform_12, window_bounds = array<i64: 160, 128>}, {pipeline_mode = #tpu.pipeline_mode<synchronous>, transform_indices = @transform_13, window_bounds = array<i64: 160, 128>}, {pipeline_mode = #tpu.pipeline_mode<synchronous>, transform_indices = @transform_14, window_bounds = array<i64: 128, 96>}, {pipeline_mode = #tpu.pipeline_mode<synchronous>, transform_indices = @transform_15, window_bounds = array<i64: 128, 96>}, {pipeline_mode = #tpu.pipeline_mode<synchronous>, transform_indices = @transform_16, window_bounds = array<i64: 128, 96>}, {pipeline_mode = #tpu.pipeline_mode<synchronous>, transform_indices = @transform_17, window_bounds = array<i64: 96, 16>}, {pipeline_mode = #tpu.pipeline_mode<synchronous>, transform_indices = @transform_18, window_bounds = array<i64: 16, 10>}, {transform_indices = @transform_19, window_bounds = array<i64: 56, 10>}]} {
    %c0 = arith.constant 0 : index
    %c0_0 = arith.constant 0 : index
    %0 = vector.load %arg1[%c0, %c0_0] : memref<56x28xf32, #tpu.memory_space<vmem>>, vector<56x28xf32>
    %1 = vector.extract_strided_slice %0 {offsets = [0, 0], sizes = [54, 28], strides = [1, 1]} : vector<56x28xf32> to vector<54x28xf32>
    %2 = arith.truncf %1 : vector<54x28xf32> to vector<54x28xbf16>
    %c0_1 = arith.constant 0 : index
    %c0_2 = arith.constant 0 : index
    %3 = vector.load %arg2[%c0_1, %c0_2] : memref<28x208xbf16, #tpu.memory_space<vmem>>, vector<28x208xbf16>
    %cst = arith.constant dense<0.000000e+00> : vector<54x208xf32>
    %4 = tpu.matmul %2, %3, %cst {dimension_numbers = #tpu.dot_dimension_numbers<[1], [0], [0], [1], [0, 0, 1, 1], [], []>} : vector<54x28xbf16>, vector<28x208xbf16>, vector<54x208xf32> -> vector<54x208xf32>
    %5 = vector.extract_strided_slice %0 {offsets = [1, 0], sizes = [54, 28], strides = [1, 1]} : vector<56x28xf32> to vector<54x28xf32>
    %6 = arith.truncf %5 : vector<54x28xf32> to vector<54x28xbf16>
    %c0_3 = arith.constant 0 : index
    %c0_4 = arith.constant 0 : index
    %7 = vector.load %arg3[%c0_3, %c0_4] : memref<28x208xbf16, #tpu.memory_space<vmem>>, vector<28x208xbf16>
    %cst_5 = arith.constant dense<0.000000e+00> : vector<54x208xf32>
    %8 = tpu.matmul %6, %7, %cst_5 {dimension_numbers = #tpu.dot_dimension_numbers<[1], [0], [0], [1], [0, 0, 1, 1], [], []>} : vector<54x28xbf16>, vector<28x208xbf16>, vector<54x208xf32> -> vector<54x208xf32>
    %9 = arith.addf %4, %8 : vector<54x208xf32>
    %10 = vector.extract_strided_slice %0 {offsets = [2, 0], sizes = [54, 28], strides = [1, 1]} : vector<56x28xf32> to vector<54x28xf32>
    %11 = arith.truncf %10 : vector<54x28xf32> to vector<54x28xbf16>
    %c0_6 = arith.constant 0 : index
    %c0_7 = arith.constant 0 : index
    %12 = vector.load %arg4[%c0_6, %c0_7] : memref<28x208xbf16, #tpu.memory_space<vmem>>, vector<28x208xbf16>
    %cst_8 = arith.constant dense<0.000000e+00> : vector<54x208xf32>
    %13 = tpu.matmul %11, %12, %cst_8 {dimension_numbers = #tpu.dot_dimension_numbers<[1], [0], [0], [1], [0, 0, 1, 1], [], []>} : vector<54x28xbf16>, vector<28x208xbf16>, vector<54x208xf32> -> vector<54x208xf32>
    %14 = arith.addf %9, %13 : vector<54x208xf32>
    %cst_9 = arith.constant 0.000000e+00 : f32
    %15 = vector.broadcast %cst_9 : f32 to vector<54x208xf32>
    %16 = arith.maximumf %14, %15 : vector<54x208xf32>
    %17 = vector.extract_strided_slice %16 {offsets = [0, 0], sizes = [52, 208], strides = [1, 1]} : vector<54x208xf32> to vector<52x208xf32>
    %18 = arith.truncf %17 : vector<52x208xf32> to vector<52x208xbf16>
    %c0_10 = arith.constant 0 : index
    %c0_11 = arith.constant 0 : index
    %19 = vector.load %arg5[%c0_10, %c0_11] : memref<208x384xbf16, #tpu.memory_space<vmem>>, vector<208x384xbf16>
    %cst_12 = arith.constant dense<0.000000e+00> : vector<52x384xf32>
    %20 = tpu.matmul %18, %19, %cst_12 {dimension_numbers = #tpu.dot_dimension_numbers<[1], [0], [0], [1], [0, 0, 1, 1], [], []>} : vector<52x208xbf16>, vector<208x384xbf16>, vector<52x384xf32> -> vector<52x384xf32>
    %21 = vector.extract_strided_slice %16 {offsets = [1, 0], sizes = [52, 208], strides = [1, 1]} : vector<54x208xf32> to vector<52x208xf32>
    %22 = arith.truncf %21 : vector<52x208xf32> to vector<52x208xbf16>
    %c0_13 = arith.constant 0 : index
    %c0_14 = arith.constant 0 : index
    %23 = vector.load %arg6[%c0_13, %c0_14] : memref<208x384xbf16, #tpu.memory_space<vmem>>, vector<208x384xbf16>
    %cst_15 = arith.constant dense<0.000000e+00> : vector<52x384xf32>
    %24 = tpu.matmul %22, %23, %cst_15 {dimension_numbers = #tpu.dot_dimension_numbers<[1], [0], [0], [1], [0, 0, 1, 1], [], []>} : vector<52x208xbf16>, vector<208x384xbf16>, vector<52x384xf32> -> vector<52x384xf32>
    %25 = arith.addf %20, %24 : vector<52x384xf32>
    %26 = vector.extract_strided_slice %16 {offsets = [2, 0], sizes = [52, 208], strides = [1, 1]} : vector<54x208xf32> to vector<52x208xf32>
    %27 = arith.truncf %26 : vector<52x208xf32> to vector<52x208xbf16>
    %c0_16 = arith.constant 0 : index
    %c0_17 = arith.constant 0 : index
    %28 = vector.load %arg7[%c0_16, %c0_17] : memref<208x384xbf16, #tpu.memory_space<vmem>>, vector<208x384xbf16>
    %cst_18 = arith.constant dense<0.000000e+00> : vector<52x384xf32>
    %29 = tpu.matmul %27, %28, %cst_18 {dimension_numbers = #tpu.dot_dimension_numbers<[1], [0], [0], [1], [0, 0, 1, 1], [], []>} : vector<52x208xbf16>, vector<208x384xbf16>, vector<52x384xf32> -> vector<52x384xf32>
    %30 = arith.addf %25, %29 : vector<52x384xf32>
    %cst_19 = arith.constant 0.000000e+00 : f32
    %31 = vector.broadcast %cst_19 : f32 to vector<52x384xf32>
    %32 = arith.maximumf %30, %31 : vector<52x384xf32>
    %33 = vector.extract_strided_slice %32 {offsets = [0, 0], sizes = [51, 384], strides = [1, 1]} : vector<52x384xf32> to vector<51x384xf32>
    %34 = vector.extract_strided_slice %32 {offsets = [1, 0], sizes = [51, 384], strides = [1, 1]} : vector<52x384xf32> to vector<51x384xf32>
    %35 = arith.maximumf %33, %34 : vector<51x384xf32>
    %36 = vector.extract_strided_slice %35 {offsets = [0, 0], sizes = [51, 368], strides = [1, 1]} : vector<51x384xf32> to vector<51x368xf32>
    %37 = vector.extract_strided_slice %35 {offsets = [0, 16], sizes = [51, 368], strides = [1, 1]} : vector<51x384xf32> to vector<51x368xf32>
    %38 = arith.maximumf %36, %37 : vector<51x368xf32>
    %39 = arith.truncf %38 : vector<51x368xf32> to vector<51x368xbf16>
    %c0_20 = arith.constant 0 : index
    %c0_21 = arith.constant 0 : index
    %40 = vector.load %arg8[%c0_20, %c0_21] : memref<368x96xbf16, #tpu.memory_space<vmem>>, vector<368x96xbf16>
    %cst_22 = arith.constant dense<0.000000e+00> : vector<51x96xf32>
    %41 = tpu.matmul %39, %40, %cst_22 {dimension_numbers = #tpu.dot_dimension_numbers<[1], [0], [0], [1], [0, 0, 1, 1], [], []>} : vector<51x368xbf16>, vector<368x96xbf16>, vector<51x96xf32> -> vector<51x96xf32>
    %42 = vector.extract_strided_slice %41 {offsets = [0, 0], sizes = [47, 96], strides = [1, 1]} : vector<51x96xf32> to vector<47x96xf32>
    %43 = arith.truncf %42 : vector<47x96xf32> to vector<47x96xbf16>
    %c0_23 = arith.constant 0 : index
    %c0_24 = arith.constant 0 : index
    %44 = vector.load %arg9[%c0_23, %c0_24] : memref<96x160xbf16, #tpu.memory_space<vmem>>, vector<96x160xbf16>
    %cst_25 = arith.constant dense<0.000000e+00> : vector<47x160xf32>
    %45 = tpu.matmul %43, %44, %cst_25 {dimension_numbers = #tpu.dot_dimension_numbers<[1], [0], [0], [1], [0, 0, 1, 1], [], []>} : vector<47x96xbf16>, vector<96x160xbf16>, vector<47x160xf32> -> vector<47x160xf32>
    %46 = vector.extract_strided_slice %41 {offsets = [2, 0], sizes = [47, 96], strides = [1, 1]} : vector<51x96xf32> to vector<47x96xf32>
    %47 = arith.truncf %46 : vector<47x96xf32> to vector<47x96xbf16>
    %c0_26 = arith.constant 0 : index
    %c0_27 = arith.constant 0 : index
    %48 = vector.load %arg10[%c0_26, %c0_27] : memref<96x160xbf16, #tpu.memory_space<vmem>>, vector<96x160xbf16>
    %cst_28 = arith.constant dense<0.000000e+00> : vector<47x160xf32>
    %49 = tpu.matmul %47, %48, %cst_28 {dimension_numbers = #tpu.dot_dimension_numbers<[1], [0], [0], [1], [0, 0, 1, 1], [], []>} : vector<47x96xbf16>, vector<96x160xbf16>, vector<47x160xf32> -> vector<47x160xf32>
    %50 = arith.addf %45, %49 : vector<47x160xf32>
    %51 = vector.extract_strided_slice %41 {offsets = [4, 0], sizes = [47, 96], strides = [1, 1]} : vector<51x96xf32> to vector<47x96xf32>
    %52 = arith.truncf %51 : vector<47x96xf32> to vector<47x96xbf16>
    %c0_29 = arith.constant 0 : index
    %c0_30 = arith.constant 0 : index
    %53 = vector.load %arg11[%c0_29, %c0_30] : memref<96x160xbf16, #tpu.memory_space<vmem>>, vector<96x160xbf16>
    %cst_31 = arith.constant dense<0.000000e+00> : vector<47x160xf32>
    %54 = tpu.matmul %52, %53, %cst_31 {dimension_numbers = #tpu.dot_dimension_numbers<[1], [0], [0], [1], [0, 0, 1, 1], [], []>} : vector<47x96xbf16>, vector<96x160xbf16>, vector<47x160xf32> -> vector<47x160xf32>
    %55 = arith.addf %50, %54 : vector<47x160xf32>
    %cst_32 = arith.constant 0.000000e+00 : f32
    %56 = vector.broadcast %cst_32 : f32 to vector<47x160xf32>
    %57 = arith.maximumf %55, %56 : vector<47x160xf32>
    %58 = vector.extract_strided_slice %57 {offsets = [0, 0], sizes = [43, 160], strides = [1, 1]} : vector<47x160xf32> to vector<43x160xf32>
    %59 = arith.truncf %58 : vector<43x160xf32> to vector<43x160xbf16>
    %c0_33 = arith.constant 0 : index
    %c0_34 = arith.constant 0 : index
    %60 = vector.load %arg12[%c0_33, %c0_34] : memref<160x128xbf16, #tpu.memory_space<vmem>>, vector<160x128xbf16>
    %cst_35 = arith.constant dense<0.000000e+00> : vector<43x128xf32>
    %61 = tpu.matmul %59, %60, %cst_35 {dimension_numbers = #tpu.dot_dimension_numbers<[1], [0], [0], [1], [0, 0, 1, 1], [], []>} : vector<43x160xbf16>, vector<160x128xbf16>, vector<43x128xf32> -> vector<43x128xf32>
    %62 = vector.extract_strided_slice %57 {offsets = [2, 0], sizes = [43, 160], strides = [1, 1]} : vector<47x160xf32> to vector<43x160xf32>
    %63 = arith.truncf %62 : vector<43x160xf32> to vector<43x160xbf16>
    %c0_36 = arith.constant 0 : index
    %c0_37 = arith.constant 0 : index
    %64 = vector.load %arg13[%c0_36, %c0_37] : memref<160x128xbf16, #tpu.memory_space<vmem>>, vector<160x128xbf16>
    %cst_38 = arith.constant dense<0.000000e+00> : vector<43x128xf32>
    %65 = tpu.matmul %63, %64, %cst_38 {dimension_numbers = #tpu.dot_dimension_numbers<[1], [0], [0], [1], [0, 0, 1, 1], [], []>} : vector<43x160xbf16>, vector<160x128xbf16>, vector<43x128xf32> -> vector<43x128xf32>
    %66 = arith.addf %61, %65 : vector<43x128xf32>
    %67 = vector.extract_strided_slice %57 {offsets = [4, 0], sizes = [43, 160], strides = [1, 1]} : vector<47x160xf32> to vector<43x160xf32>
    %68 = arith.truncf %67 : vector<43x160xf32> to vector<43x160xbf16>
    %c0_39 = arith.constant 0 : index
    %c0_40 = arith.constant 0 : index
    %69 = vector.load %arg14[%c0_39, %c0_40] : memref<160x128xbf16, #tpu.memory_space<vmem>>, vector<160x128xbf16>
    %cst_41 = arith.constant dense<0.000000e+00> : vector<43x128xf32>
    %70 = tpu.matmul %68, %69, %cst_41 {dimension_numbers = #tpu.dot_dimension_numbers<[1], [0], [0], [1], [0, 0, 1, 1], [], []>} : vector<43x160xbf16>, vector<160x128xbf16>, vector<43x128xf32> -> vector<43x128xf32>
    %71 = arith.addf %66, %70 : vector<43x128xf32>
    %cst_42 = arith.constant 0.000000e+00 : f32
    %72 = vector.broadcast %cst_42 : f32 to vector<43x128xf32>
    %73 = arith.maximumf %71, %72 : vector<43x128xf32>
    %74 = vector.extract_strided_slice %73 {offsets = [0, 0], sizes = [39, 128], strides = [1, 1]} : vector<43x128xf32> to vector<39x128xf32>
    %75 = arith.truncf %74 : vector<39x128xf32> to vector<39x128xbf16>
    %c0_43 = arith.constant 0 : index
    %c0_44 = arith.constant 0 : index
    %76 = vector.load %arg15[%c0_43, %c0_44] : memref<128x96xbf16, #tpu.memory_space<vmem>>, vector<128x96xbf16>
    %cst_45 = arith.constant dense<0.000000e+00> : vector<39x96xf32>
    %77 = tpu.matmul %75, %76, %cst_45 {dimension_numbers = #tpu.dot_dimension_numbers<[1], [0], [0], [1], [0, 0, 1, 1], [], []>} : vector<39x128xbf16>, vector<128x96xbf16>, vector<39x96xf32> -> vector<39x96xf32>
    %78 = vector.extract_strided_slice %73 {offsets = [2, 0], sizes = [39, 128], strides = [1, 1]} : vector<43x128xf32> to vector<39x128xf32>
    %79 = arith.truncf %78 : vector<39x128xf32> to vector<39x128xbf16>
    %c0_46 = arith.constant 0 : index
    %c0_47 = arith.constant 0 : index
    %80 = vector.load %arg16[%c0_46, %c0_47] : memref<128x96xbf16, #tpu.memory_space<vmem>>, vector<128x96xbf16>
    %cst_48 = arith.constant dense<0.000000e+00> : vector<39x96xf32>
    %81 = tpu.matmul %79, %80, %cst_48 {dimension_numbers = #tpu.dot_dimension_numbers<[1], [0], [0], [1], [0, 0, 1, 1], [], []>} : vector<39x128xbf16>, vector<128x96xbf16>, vector<39x96xf32> -> vector<39x96xf32>
    %82 = arith.addf %77, %81 : vector<39x96xf32>
    %83 = vector.extract_strided_slice %73 {offsets = [4, 0], sizes = [39, 128], strides = [1, 1]} : vector<43x128xf32> to vector<39x128xf32>
    %84 = arith.truncf %83 : vector<39x128xf32> to vector<39x128xbf16>
    %c0_49 = arith.constant 0 : index
    %c0_50 = arith.constant 0 : index
    %85 = vector.load %arg17[%c0_49, %c0_50] : memref<128x96xbf16, #tpu.memory_space<vmem>>, vector<128x96xbf16>
    %cst_51 = arith.constant dense<0.000000e+00> : vector<39x96xf32>
    %86 = tpu.matmul %84, %85, %cst_51 {dimension_numbers = #tpu.dot_dimension_numbers<[1], [0], [0], [1], [0, 0, 1, 1], [], []>} : vector<39x128xbf16>, vector<128x96xbf16>, vector<39x96xf32> -> vector<39x96xf32>
    %87 = arith.addf %82, %86 : vector<39x96xf32>
    %cst_52 = arith.constant 0.000000e+00 : f32
    %88 = vector.broadcast %cst_52 : f32 to vector<39x96xf32>
    %89 = arith.maximumf %87, %88 : vector<39x96xf32>
    %90 = vector.extract_strided_slice %89 {offsets = [0, 0], sizes = [29, 96], strides = [1, 1]} : vector<39x96xf32> to vector<29x96xf32>
    %91 = vector.extract_strided_slice %89 {offsets = [2, 0], sizes = [29, 96], strides = [1, 1]} : vector<39x96xf32> to vector<29x96xf32>
    %92 = arith.addf %90, %91 : vector<29x96xf32>
    %93 = vector.extract_strided_slice %89 {offsets = [4, 0], sizes = [29, 96], strides = [1, 1]} : vector<39x96xf32> to vector<29x96xf32>
    %94 = arith.addf %92, %93 : vector<29x96xf32>
    %95 = vector.extract_strided_slice %89 {offsets = [6, 0], sizes = [29, 96], strides = [1, 1]} : vector<39x96xf32> to vector<29x96xf32>
    %96 = arith.addf %94, %95 : vector<29x96xf32>
    %97 = vector.extract_strided_slice %89 {offsets = [8, 0], sizes = [29, 96], strides = [1, 1]} : vector<39x96xf32> to vector<29x96xf32>
    %98 = arith.addf %96, %97 : vector<29x96xf32>
    %99 = vector.extract_strided_slice %89 {offsets = [10, 0], sizes = [29, 96], strides = [1, 1]} : vector<39x96xf32> to vector<29x96xf32>
    %100 = arith.addf %98, %99 : vector<29x96xf32>
    %101 = arith.truncf %100 : vector<29x96xf32> to vector<29x96xbf16>
    %c0_53 = arith.constant 0 : index
    %c0_54 = arith.constant 0 : index
    %102 = vector.load %arg18[%c0_53, %c0_54] : memref<96x16xbf16, #tpu.memory_space<vmem>>, vector<96x16xbf16>
    %cst_55 = arith.constant dense<0.000000e+00> : vector<29x16xf32>
    %103 = tpu.matmul %101, %102, %cst_55 {dimension_numbers = #tpu.dot_dimension_numbers<[1], [0], [0], [1], [0, 0, 1, 1], [], []>} : vector<29x96xbf16>, vector<96x16xbf16>, vector<29x16xf32> -> vector<29x16xf32>
    %cst_56 = arith.constant 0.000000e+00 : f32
    %104 = vector.broadcast %cst_56 : f32 to vector<29x16xf32>
    %105 = arith.maximumf %103, %104 : vector<29x16xf32>
    %106 = arith.truncf %105 : vector<29x16xf32> to vector<29x16xbf16>
    %c0_57 = arith.constant 0 : index
    %c0_58 = arith.constant 0 : index
    %107 = vector.load %arg19[%c0_57, %c0_58] : memref<16x10xbf16, #tpu.memory_space<vmem>>, vector<16x10xbf16>
    %cst_59 = arith.constant dense<0.000000e+00> : vector<29x10xf32>
    %108 = tpu.matmul %106, %107, %cst_59 {dimension_numbers = #tpu.dot_dimension_numbers<[1], [0], [0], [1], [0, 0, 1, 1], [], []>} : vector<29x16xbf16>, vector<16x10xbf16>, vector<29x10xf32> -> vector<29x10xf32>
    %cst_60 = arith.constant dense<0xFF800000> : vector<29xf32>
    %109 = vector.multi_reduction <maximumf>, %108, %cst_60 [1] : vector<29x10xf32> to vector<29xf32>
    %110 = vector.shape_cast %109 : vector<29xf32> to vector<29x1xf32>
    %111 = vector.broadcast %110 : vector<29x1xf32> to vector<29x10xf32>
    %112 = arith.subf %108, %111 : vector<29x10xf32>
    %113 = math.exp %112 : vector<29x10xf32>
    %cst_61 = arith.constant dense<0.000000e+00> : vector<29xf32>
    %114 = vector.multi_reduction <add>, %113, %cst_61 [1] : vector<29x10xf32> to vector<29xf32>
    %115 = vector.shape_cast %114 : vector<29xf32> to vector<29x1xf32>
    %116 = math.log %115 : vector<29x1xf32>
    %117 = arith.addf %110, %116 : vector<29x1xf32>
    %118 = vector.broadcast %117 : vector<29x1xf32> to vector<29x10xf32>
    %119 = arith.subf %108, %118 : vector<29x10xf32>
    %cst_62 = arith.constant 0.000000e+00 : f32
    %120 = vector.broadcast %cst_62 : f32 to vector<56x10xf32>
    %c0_63 = arith.constant 0 : index
    %c0_64 = arith.constant 0 : index
    %121 = vector.load %arg20[%c0_63, %c0_64] : memref<56x10xf32, #tpu.memory_space<vmem>>, vector<56x10xf32>
    tpu.vector_store %arg20[%c0_63, %c0_64], %120 {strides = array<i32>} : memref<56x10xf32, #tpu.memory_space<vmem>>, vector<56x10xf32>,
    %c0_65 = arith.constant 0 : index
    %c0_66 = arith.constant 0 : index
    %122 = vector.load %arg20[%c0_65, %c0_66] : memref<56x10xf32, #tpu.memory_space<vmem>>, vector<29x10xf32>
    tpu.vector_store %arg20[%c0_65, %c0_66], %119 {strides = array<i32>} : memref<56x10xf32, #tpu.memory_space<vmem>>, vector<29x10xf32>,
    return
  }
  func.func @transform_0(%arg0: i32) -> (i32, i32) {
    %c0_i32 = arith.constant 0 : i32
    %c0_i32_0 = arith.constant 0 : i32
    return %arg0, %c0_i32 : i32, i32
  }
  func.func @transform_1(%arg0: i32) -> (i32, i32) {
    %c0_i32 = arith.constant 0 : i32
    %c0_i32_0 = arith.constant 0 : i32
    %c0_i32_1 = arith.constant 0 : i32
    return %c0_i32, %c0_i32_0 : i32, i32
  }
  func.func @transform_2(%arg0: i32) -> (i32, i32) {
    %c0_i32 = arith.constant 0 : i32
    %c0_i32_0 = arith.constant 0 : i32
    %c0_i32_1 = arith.constant 0 : i32
    return %c0_i32, %c0_i32_0 : i32, i32
  }
  func.func @transform_3(%arg0: i32) -> (i32, i32) {
    %c0_i32 = arith.constant 0 : i32
    %c0_i32_0 = arith.constant 0 : i32
    %c0_i32_1 = arith.constant 0 : i32
    return %c0_i32, %c0_i32_0 : i32, i32
  }
  func.func @transform_4(%arg0: i32) -> (i32, i32) {
    %c0_i32 = arith.constant 0 : i32
    %c0_i32_0 = arith.constant 0 : i32
    %c0_i32_1 = arith.constant 0 : i32
    return %c0_i32, %c0_i32_0 : i32, i32
  }
  func.func @transform_5(%arg0: i32) -> (i32, i32) {
    %c0_i32 = arith.constant 0 : i32
    %c0_i32_0 = arith.constant 0 : i32
    %c0_i32_1 = arith.constant 0 : i32
    return %c0_i32, %c0_i32_0 : i32, i32
  }
  func.func @transform_6(%arg0: i32) -> (i32, i32) {
    %c0_i32 = arith.constant 0 : i32
    %c0_i32_0 = arith.constant 0 : i32
    %c0_i32_1 = arith.constant 0 : i32
    return %c0_i32, %c0_i32_0 : i32, i32
  }
  func.func @transform_7(%arg0: i32) -> (i32, i32) {
    %c0_i32 = arith.constant 0 : i32
    %c0_i32_0 = arith.constant 0 : i32
    %c0_i32_1 = arith.constant 0 : i32
    return %c0_i32, %c0_i32_0 : i32, i32
  }
  func.func @transform_8(%arg0: i32) -> (i32, i32) {
    %c0_i32 = arith.constant 0 : i32
    %c0_i32_0 = arith.constant 0 : i32
    %c0_i32_1 = arith.constant 0 : i32
    return %c0_i32, %c0_i32_0 : i32, i32
  }
  func.func @transform_9(%arg0: i32) -> (i32, i32) {
    %c0_i32 = arith.constant 0 : i32
    %c0_i32_0 = arith.constant 0 : i32
    %c0_i32_1 = arith.constant 0 : i32
    return %c0_i32, %c0_i32_0 : i32, i32
  }
  func.func @transform_10(%arg0: i32) -> (i32, i32) {
    %c0_i32 = arith.constant 0 : i32
    %c0_i32_0 = arith.constant 0 : i32
    %c0_i32_1 = arith.constant 0 : i32
    return %c0_i32, %c0_i32_0 : i32, i32
  }
  func.func @transform_11(%arg0: i32) -> (i32, i32) {
    %c0_i32 = arith.constant 0 : i32
    %c0_i32_0 = arith.constant 0 : i32
    %c0_i32_1 = arith.constant 0 : i32
    return %c0_i32, %c0_i32_0 : i32, i32
  }
  func.func @transform_12(%arg0: i32) -> (i32, i32) {
    %c0_i32 = arith.constant 0 : i32
    %c0_i32_0 = arith.constant 0 : i32
    %c0_i32_1 = arith.constant 0 : i32
    return %c0_i32, %c0_i32_0 : i32, i32
  }
  func.func @transform_13(%arg0: i32) -> (i32, i32) {
    %c0_i32 = arith.constant 0 : i32
    %c0_i32_0 = arith.constant 0 : i32
    %c0_i32_1 = arith.constant 0 : i32
    return %c0_i32, %c0_i32_0 : i32, i32
  }
  func.func @transform_14(%arg0: i32) -> (i32, i32) {
    %c0_i32 = arith.constant 0 : i32
    %c0_i32_0 = arith.constant 0 : i32
    %c0_i32_1 = arith.constant 0 : i32
    return %c0_i32, %c0_i32_0 : i32, i32
  }
  func.func @transform_15(%arg0: i32) -> (i32, i32) {
    %c0_i32 = arith.constant 0 : i32
    %c0_i32_0 = arith.constant 0 : i32
    %c0_i32_1 = arith.constant 0 : i32
    return %c0_i32, %c0_i32_0 : i32, i32
  }
  func.func @transform_16(%arg0: i32) -> (i32, i32) {
    %c0_i32 = arith.constant 0 : i32
    %c0_i32_0 = arith.constant 0 : i32
    %c0_i32_1 = arith.constant 0 : i32
    return %c0_i32, %c0_i32_0 : i32, i32
  }
  func.func @transform_17(%arg0: i32) -> (i32, i32) {
    %c0_i32 = arith.constant 0 : i32
    %c0_i32_0 = arith.constant 0 : i32
    %c0_i32_1 = arith.constant 0 : i32
    return %c0_i32, %c0_i32_0 : i32, i32
  }
  func.func @transform_18(%arg0: i32) -> (i32, i32) {
    %c0_i32 = arith.constant 0 : i32
    %c0_i32_0 = arith.constant 0 : i32
    %c0_i32_1 = arith.constant 0 : i32
    return %c0_i32, %c0_i32_0 : i32, i32
  }
  func.func @transform_19(%arg0: i32) -> (i32, i32) {
    %c0_i32 = arith.constant 0 : i32
    %c0_i32_0 = arith.constant 0 : i32
    return %arg0, %c0_i32 : i32, i32
  }
}

</mosaic_0001>

<bundles_post_ra>
// kernel: net_forward.1
= control target key start
LH: loop header
LB: loop body
LE: loop exit
PB: predicated region body
PF: predicated region fallthrough
CT: control target
= control target key end

     0   :  { %vm145_vm0 = vcmask 1045504   ;;  %vm132_vm1 = vcmask 228352   ;;  %vm82_vm2 = vsmask.f32 7424  ;;  %vm304_vm3 = vcmask 1046528   ;;  %s7342_s2 = inlined_call_operand.vmem [shape: bf16[28,208], index: 2, kind: input, shape index: {}]   ;;  %s7343_s1 = inlined_call_operand.vmem [shape: bf16[28,208], index: 1, kind: input, shape index: {}]   ;;  %s7344_s0 = inlined_call_operand.vmem [shape: f32[56,28], index: 0, kind: input, shape index: {}]   ;;  %s7345_s3 = inlined_call_operand.vmem [shape: bf16[28,208], index: 3, kind: input, shape index: {}]   ;;  %s7346_s5 = inlined_call_operand.vmem [shape: bf16[208,384], index: 5, kind: input, shape index: {}]   ;;  %s7347_s4 = inlined_call_operand.vmem [shape: bf16[208,384], index: 4, kind: input, shape index: {}]   ;;  %s7348_s6 = inlined_call_operand.vmem [shape: bf16[208,384], index: 6, kind: input, shape index: {}]   ;;  %s7349_s7 = inlined_call_operand.vmem [shape: bf16[368,96], index: 7, kind: input, shape index: {}]   ;;  %s7350_s9 = inlined_call_operand.vmem [shape: bf16[96,160], index: 9, kind: input, shape index: {}]   ;;  %s7351_s8 = inlined_call_operand.vmem [shape: bf16[96,160], index: 8, kind: input, shape index: {}]   ;;  %s7352_s10 = inlined_call_operand.vmem [shape: bf16[96,160], index: 10, kind: input, shape index: {}]   ;;  %s7353_s11 = inlined_call_operand.vmem [shape: bf16[160,128], index: 11, kind: input, shape index: {}]   ;;  %s7354_s12 = inlined_call_operand.vmem [shape: bf16[160,128], index: 12, kind: input, shape index: {}]   ;;  %s7355_s13 = inlined_call_operand.vmem [shape: bf16[160,128], index: 13, kind: input, shape index: {}]   ;;  %s7356_s14 = inlined_call_operand.vmem [shape: bf16[128,96], index: 14, kind: input, shape index: {}]   ;;  %s7357_s15 = inlined_call_operand.vmem [shape: bf16[128,96], index: 15, kind: input, shape index: {}]   ;;  %s7358_s16 = inlined_call_operand.vmem [shape: bf16[128,96], index: 16, kind: input, shape index: {}]   ;;  %s7359_s17 = inlined_call_operand.vmem [shape: bf16[96,16], index: 17, kind: input, shape index: {}]   ;;  %s7360_s18 = inlined_call_operand.vmem [shape: bf16[16,10], index: 18, kind: input, shape index: {}]   ;;  %s7361_s19 = inlined_call_operand.vmem [shape: f32[56,10], index: 19, kind: output, shape index: {}]  }
   0x1   :  { %7366 = sst [smem:[#allocation2_spill]] %s7342_s2  ;;  %vm818_vm4 = vcmask 654336   ;;  %vm2057_vm5 = vcmask 916480   ;;  %vm2505_vm6 = vcmask 785408   ;;  %vm2966_vm7 = vcmask 261120  }
   0x2   :  { %7367 = sst [smem:[#allocation3_spill]] %s7343_s1  ;;  %vm3617_vm8 = vcmask 1043456   ;;  %vm3635_vm9 = vcmask 1041408   ;;  %vm3754_vm10 = vcmask 130048   ;;  %vm3780_vm11 = vcmask 80896  }
   0x3   :  { %7368 = sst [smem:[#allocation4_spill]] %s7344_s0  ;;  %vm3790_vm12 = vcmask 77824  }
   0x4   :  { %7369 = sst [smem:[#allocation5_spill]] %s7345_s3 }
   0x5   :  { %s7370_s20 = sld [smem:[#allocation2_spill]] }
   0x6   :  { %s7371_s26 = sld [smem:[#allocation3_spill]] }
   0x7   :  { %s7372_s28 = sld [smem:[#allocation4_spill]] }
   0x8   :  { %s7373_s22 = sld [smem:[#allocation5_spill]] }
   0xb   :  { %v3859_v0 = vld [vmem:[%s7370_s20 + $0x10] sm:$0xf]  ;;  %v4947_v1 = vld [vmem:[%s7370_s20 + $0x14] sm:$0x30]  ;;  %v4946_v2 = vld [vmem:[%s7370_s20 + $0x14] sm:$0xf] }
   0xc   :  { %v3860_v3 = vor.u32 %v4947_v1, %v3859_v0  ;;  %v3861_v4 = vld [vmem:[%s7370_s20 + $0x18] sm:$0x30]  ;;  %v3883_v5 = vld [vmem:[%s7371_s26 + $0x10] sm:$0xf]  ;;  %v4943_v6 = vld [vmem:[%s7371_s26 + $0x14] sm:$0x30] }
   0xd   :  { %v3864_v7 = vor.u32 %v4946_v2, %v3861_v4  ;;  %v3884_v8 = vor.u32 %v4943_v6, %v3883_v5  ;;  %v4942_v9 = vld [vmem:[%s7371_s26 + $0x14] sm:$0xf]  ;;  %v3885_v10 = vld [vmem:[%s7371_s26 + $0x18] sm:$0x30]  ;;  %v3851_v11 = vld [vmem:[%s7370_s20] sm:$0xf] }
   0xe   :  { %v147_v12 = vsel %vm145_vm0, %v3860_v3, 0  ;;  %v3888_v13 = vor.u32 %v4942_v9, %v3885_v10  ;;  %v4945_v14 = vld [vmem:[%s7370_s20 + $0x4] sm:$0xf0]  ;;  %v4944_v15 = vld [vmem:[%s7370_s20 + $0x4] sm:$0xf]  ;;  %v65_v29 = vld [vmem:[%s7372_s28 + $0x10] sm:$0xff] }
   0xf   :  { %v63_v16 = vld [vmem:[%s7372_s28] sm:$0xff]  ;;  %158 = vmatpush.bf16.msra.mxu0 %v147_v12  ;;  %v150_v17 = vsel %vm145_vm0, %v3864_v7, 0  ;;  %v235_v18 = vsel %vm145_vm0, %v3884_v8, 0  ;;  %v3852_v19 = vor.u32 %v4945_v14, %v3851_v11  ;;  %v3853_v20 = vld [vmem:[%s7370_s20 + $0x8] sm:$0xf0]  ;;  %v66_v30 = vld [vmem:[%s7372_s28 + $0x18] sm:$0xff] }
  0x10   :  { %v3875_v21 = vld [vmem:[%s7371_s26] sm:$0xf]  ;;  %186 = vmatpush.bf16.msra.mxu1 %v150_v17  ;;  %246 = vmatpush.bf16.msra.mxu2 %v235_v18  ;;  %v238_v22 = vsel %vm145_vm0, %v3888_v13, 0  ;;  %v3856_v23 = vor.u32 %v4944_v15, %v3853_v20  ;;  %v4941_v24 = vld [vmem:[%s7371_s26 + $0x4] sm:$0xf0]  ;;  %v5423_v33 = vpack.c.bf16 %v66_v30, %v65_v29  ;;  %v69_v63 = vld [vmem:[%s7372_s28 + $0x30] sm:$0xff] }
  0x11   :  { %v4940_v25 = vld [vmem:[%s7371_s26 + $0x4] sm:$0xf]  ;;  %v64_v26 = vld [vmem:[%s7372_s28 + $0x8] sm:$0xff]  ;;  %274 = vmatpush.bf16.msra.mxu3 %v238_v22  ;;  %v3876_v27 = vor.u32 %v4941_v24, %v3875_v21  ;;  %v3907_v34 = vld [vmem:[%s7373_s22 + $0x10] sm:$0xf]  ;;  %v73_v2 = vpack.c.bf16 %v69_v63, %v69_v63 }
  0x12   :  { %v3877_v28 = vld [vmem:[%s7371_s26 + $0x8] sm:$0xf0]  ;;  %v70_v31 = vpack.c.bf16 %v64_v26, %v63_v16  ;;  %v4951_v35 = vld [vmem:[%s7373_s22 + $0x14] sm:$0x30]  ;;  %v4950_v36 = vld [vmem:[%s7373_s22 + $0x14] sm:$0xf] }
  0x13   :  { %v3880_v32 = vor.u32 %v4940_v25, %v3877_v28  ;;  %159 = vmatpush.bf16.msra.mxu0 %v3852_v19  ;;  %v3908_v39 = vor.u32 %v4951_v35, %v3907_v34  ;;  %v3909_v40 = vld [vmem:[%s7373_s22 + $0x18] sm:$0x30]  ;;  %v91_v41 = vshll.u32 %v5423_v33, 16  ;;  %v67_v48 = vld [vmem:[%s7372_s28 + $0x20] sm:$0xff]  ;;  %v68_v49 = vld [vmem:[%s7372_s28 + $0x28] sm:$0xff]  ;;  %v95_v58 = vshrl.u32 %v5423_v33, 16 }
  0x14   :  { %v84_v37 = vshrl.u32 %v70_v31, 16  ;;  %v86_v38 = vshll.u32 %v70_v31, 16  ;;  %187 = vmatpush.bf16.msra.mxu1 %v3856_v23  ;;  %247 = vmatpush.bf16.msra.mxu2 %v3876_v27  ;;  %v3912_v42 = vor.u32 %v4950_v36, %v3909_v40  ;;  %v3899_v51 = vld [vmem:[%s7373_s22] sm:$0xf]  ;;  %v4949_v52 = vld [vmem:[%s7373_s22 + $0x4] sm:$0xf0]  ;;  %v72_v54 = vpack.c.bf16 %v68_v49, %v67_v48 }
  0x15   :  { %275 = vmatpush.bf16.msra.mxu3 %v3880_v32  ;;  %v343_v44 = vsel %vm145_vm0, %v3908_v39, 0  ;;  %v93_v45 = vrot.slane %v91_v41, 1  ;;  %v4948_v53 = vld [vmem:[%s7373_s22 + $0x4] sm:$0xf]  ;;  %v3900_v55 = vor.u32 %v4949_v52, %v3899_v51  ;;  %v3901_v56 = vld [vmem:[%s7373_s22 + $0x8] sm:$0xf0] }
  0x16   :  { %v88_v43 = vrot.slane %v86_v38, 1  ;;  %v346_v46 = vsel %vm145_vm0, %v3912_v42, 0  ;;  %v3904_v57 = vor.u32 %v4948_v53, %v3901_v56  ;;  %v99_v59 = vshll.u32 %v72_v54, 16  ;;  %v4007_v17 = vld [vmem:[%s7346_s5 + $0xa8] sm:$0xf] }
  0x17   :  { %354 = vmatpush.bf16.msrb.mxu0 %v343_v44  ;;  %3889 = vmatmul.msk.bf16.vlgmr.msra.gmra.mxu2 %vm132_vm1, %v70_v31  ;;  %v97_v60 = vor.u32 %v95_v58, %v93_v45  ;;  %v305_v0 = vrot.slane %v70_v31, 1  ;;  %v306_v1 = vrot.slane %v5423_v33, 1  ;;  %v103_v4 = vshrl.u32 %v72_v54, 16  ;;  %v5013_v18 = vld [vmem:[%s7346_s5 + $0xb0] sm:$0xf0] }
  0x18   :  { %v89_v47 = vor.u32 %v88_v43, %v84_v37  ;;  %382 = vmatpush.bf16.msrb.mxu1 %v346_v46  ;;  %3893 = vmatmul.msk.bf16.vlgmr.msra.gmra.mxu3 %vm132_vm1, %v70_v31  ;;  %v101_v61 = vrot.slane %v99_v59, 1  ;;  %v107_v5 = vshll.u32 %v73_v2, 16  ;;  %v308_v9 = vrot.slane %v72_v54, 1  ;;  %v4067_v19 = vld [vmem:[%s7346_s5 + $0x120] sm:$0xf] }
  0x19   :  { %v307_v3 = vsel %vm304_vm3, %v305_v0, %v306_v1  ;;  %v111_v11 = vshrl.u32 %v73_v2, 16  ;;  %v310_v13 = vrot.slane %v73_v2, 1  ;;  %v4008_v20 = vor.u32 %v5013_v18, %v4007_v17  ;;  %v5028_v21 = vld [vmem:[%s7346_s5 + $0x128] sm:$0xf0]  ;;  %v3995_v29 = vld [vmem:[%s7346_s5 + $0x90] sm:$0xf] }
  0x1a   :  { %v94_v50 = vsel %vm82_vm2, %v89_v47, %v93_v45  ;;  %v102_v62 = vsel %vm82_vm2, %v97_v60, %v101_v61  ;;  %v105_v6 = vor.u32 %v103_v4, %v101_v61  ;;  %v109_v7 = vrot.slane %v107_v5, 1  ;;  %v5010_v30 = vld [vmem:[%s7346_s5 + $0x98] sm:$0xf0]  ;;  %v4055_v36 = vld [vmem:[%s7346_s5 + $0x108] sm:$0xf] }
  0x1b   :  { %3865 = vmatmul.msk.bf16.vlgmr.msra.gmra.mxu0 %vm132_vm1, %v94_v50  ;;  %3869 = vmatmul.msk.bf16.vlgmr.msra.gmra.mxu1 %vm132_vm1, %v94_v50  ;;  %v309_v10 = vsel %vm304_vm3, %v306_v1, %v308_v9  ;;  %v311_v14 = vsel %vm304_vm3, %v308_v9, %v310_v13  ;;  %v4068_v22 = vor.u32 %v5028_v21, %v4067_v19  ;;  %v5025_v37 = vld [vmem:[%s7346_s5 + $0x110] sm:$0xf0]  ;;  %v3983_v38 = vld [vmem:[%s7346_s5 + $0x78] sm:$0xf]  ;;  %v5007_v40 = vld [vmem:[%s7346_s5 + $0x80] sm:$0xf0] }
  0x1c   :  { %355 = vmatpush.bf16.msrb.mxu0 %v3900_v55  ;;  %383 = vmatpush.bf16.msrb.mxu1 %v3904_v57  ;;  %v110_v8 = vsel %vm82_vm2, %v105_v6, %v109_v7  ;;  %v113_v12 = vor.u32 %v111_v11, %v109_v7  ;;  %v3996_v31 = vor.u32 %v5010_v30, %v3995_v29  ;;  %v3971_v48 = vld [vmem:[%s7346_s5 + $0x60] sm:$0xf]  ;;  %v5004_v49 = vld [vmem:[%s7346_s5 + $0x68] sm:$0xf0]  ;;  %v4043_v50 = vld [vmem:[%s7346_s5 + $0xf0] sm:$0xf] }
  0x1d   :  { %831 = vmatpush.bf16.msrb.mxu2 %v4008_v20  ;;  %862 = vmatpush.bf16.msrb.mxu3 %v4068_v22  ;;  %v4056_v39 = vor.u32 %v5025_v37, %v4055_v36  ;;  %v3984_v41 = vor.u32 %v5007_v40, %v3983_v38  ;;  %v3972_v51 = vor.u32 %v5004_v49, %v3971_v48  ;;  %v5022_v52 = vld [vmem:[%s7346_s5 + $0xf8] sm:$0xf0]  ;;  %v5012_v58 = vld [vmem:[%s7346_s5 + $0xac] sm:$0xf]  ;;  %v4009_v59 = vld [vmem:[%s7346_s5 + $0xb4] sm:$0xf0] }
  0x1e   :  { %v4044_v53 = vor.u32 %v5022_v52, %v4043_v50  ;;  %v3959_v61 = vld [vmem:[%s7346_s5 + $0x48] sm:$0xf]  ;;  %v4012_v63 = vor.u32 %v5012_v58, %v4009_v59  ;;  %v5009_v4 = vld [vmem:[%s7346_s5 + $0x94] sm:$0xf]  ;;  %v3997_v5 = vld [vmem:[%s7346_s5 + $0x9c] sm:$0xf0] }
  0x1f   :  { %v4000_v6 = vor.u32 %v5009_v4, %v3997_v5  ;;  %v5006_v9 = vld [vmem:[%s7346_s5 + $0x7c] sm:$0xf]  ;;  %v5003_v19 = vld [vmem:[%s7346_s5 + $0x64] sm:$0xf]  ;;  %v3973_v20 = vld [vmem:[%s7346_s5 + $0x6c] sm:$0xf0] }
  0x20   :  { %887 = vmatpush.bf16.msra.mxu0 %v4012_v63  ;;  %v4998_v18 = vld [vmem:[%s7346_s5 + $0x38] sm:$0xf0]  ;;  %v3976_v22 = vor.u32 %v5003_v19, %v3973_v20  ;;  %v5024_v36 = vld [vmem:[%s7346_s5 + $0x10c] sm:$0xf]  ;;  %v3935_v38 = vld [vmem:[%s7346_s5 + $0x18] sm:$0xf] }
  0x21   :  { %832 = vmatpush.bf16.msrb.mxu2 %v3996_v31  ;;  %863 = vmatpush.bf16.msrb.mxu3 %v4056_v39  ;;  %v4995_v39 = vld [vmem:[%s7346_s5 + $0x20] sm:$0xf0]  ;;  %v3949_v52 = vld [vmem:[%s7346_s5 + $0x3c] sm:$0xf0]  ;;  %v5018_v63 = vld [vmem:[%s7346_s5 + $0xdc] sm:$0xf] }
  0x22   :  { %v3936_v48 = vor.u32 %v4995_v39, %v3935_v38  ;;  %v5015_v20 = vld [vmem:[%s7346_s5 + $0xc4] sm:$0xf] }
  0x24   :  { %888 = vmatpush.bf16.msra.mxu0 %v4000_v6 }
  0x25   :  { %833 = vmatpush.bf16.msrb.mxu2 %v3984_v41  ;;  %864 = vmatpush.bf16.msrb.mxu3 %v4044_v53  ;;  %v4057_v41 = vld [vmem:[%s7346_s5 + $0x114] sm:$0xf0]  ;;  %v5021_v53 = vld [vmem:[%s7346_s5 + $0xf4] sm:$0xf] }
  0x26   :  { %v4060_v49 = vor.u32 %v5024_v36, %v4057_v41 }
  0x27   :  { %3890 = vmatmul.msk.bf16.gmra.mxu2 %vm132_vm1, %v5423_v33 }
  0x28   :  { %3894 = vmatmul.msk.bf16.gmra.mxu3 %vm132_vm1, %v5423_v33 }
  0x29   :  { %834 = vmatpush.bf16.msrb.mxu2 %v3972_v51  ;;  %v4997_v51 = vld [vmem:[%s7346_s5 + $0x34] sm:$0xf] }
  0x2b   :  { %3866 = vmatmul.msk.bf16.gmra.mxu0 %vm132_vm1, %v102_v62  ;;  %3870 = vmatmul.msk.bf16.gmra.mxu1 %vm132_vm1, %v102_v62  ;;  %v5001_v62 = vld [vmem:[%s7346_s5 + $0x50] sm:$0xf0] }
  0x37   :  { %3891 = vmatmul.msk.bf16.gmra.mxu2 %vm132_vm1, %v72_v54 }
  0x38   :  { %3895 = vmatmul.msk.bf16.gmra.mxu3 %vm132_vm1, %v72_v54 }
  0x3b   :  { %3867 = vmatmul.msk.bf16.gmra.mxu0 %vm132_vm1, %v110_v8  ;;  %3871 = vmatmul.msk.bf16.gmra.mxu1 %vm132_vm1, %v110_v8 }
  0x47   :  { %3892 = vmatmul.msk.bf16.gmra.mxu2 %vm132_vm1, %v73_v2 }
  0x48   :  { %3896 = vmatmul.msk.bf16.gmra.mxu3 %vm132_vm1, %v73_v2  ;;  %v3960_v2 = vor.u32 %v5001_v62, %v3959_v61  ;;  %v4994_v61 = vld [vmem:[%s7346_s5 + $0x1c] sm:$0xf]  ;;  %v3937_v62 = vld [vmem:[%s7346_s5 + $0x24] sm:$0xf0] }
  0x4a   :  { %835 = vmatpush.bf16.msrb.mxu2 %v3960_v2  ;;  %v4033_v2 = vld [vmem:[%s7346_s5 + $0xe4] sm:$0xf0] }
  0x4b   :  { %3868 = vmatmul.msk.bf16.gmra.mxu0 %vm132_vm1, %v113_v12  ;;  %3872 = vmatmul.msk.bf16.gmra.mxu1 %vm132_vm1, %v113_v12  ;;  %v4036_v5 = vor.u32 %v5018_v63, %v4033_v2 }
  0x5b   :  { %3913 = vmatmul.msk.bf16.vlgmr.msrb.gmra.mxu0 %vm132_vm1, %v307_v3  ;;  %3917 = vmatmul.msk.bf16.vlgmr.msrb.gmra.mxu1 %vm132_vm1, %v307_v3 }
  0x6b   :  { %3914 = vmatmul.msk.bf16.gmra.mxu0 %vm132_vm1, %v309_v10  ;;  %3918 = vmatmul.msk.bf16.gmra.mxu1 %vm132_vm1, %v309_v10  ;;  %v3985_v10 = vld [vmem:[%s7346_s5 + $0x84] sm:$0xf0] }
  0x6c   :  { %v3988_v12 = vor.u32 %v5006_v9, %v3985_v10  ;;  %v4019_v9 = vld [vmem:[%s7346_s5 + $0xc0] sm:$0xf]  ;;  %v5016_v10 = vld [vmem:[%s7346_s5 + $0xc8] sm:$0xf0] }
  0x6e   :  { %889 = vmatpush.bf16.msra.mxu0 %v3988_v12  ;;  %v3923_v12 = vld [vmem:[%s7346_s5] sm:$0xf] }
  0x72   :  { %890 = vmatpush.bf16.msra.mxu0 %v3976_v22 }
  0x7b   :  { %3915 = vmatmul.msk.bf16.gmra.mxu0 %vm132_vm1, %v311_v14  ;;  %3919 = vmatmul.msk.bf16.gmra.mxu1 %vm132_vm1, %v311_v14  ;;  %v4031_v14 = vld [vmem:[%s7346_s5 + $0xd8] sm:$0xf] }
  0x8b   :  { %3916 = vmatmul.msk.bf16.gmra.mxu0 %vm132_vm1, %v310_v13  ;;  %3920 = vmatmul.msk.bf16.gmra.mxu1 %vm132_vm1, %v310_v13 }
  0x98   :  { %v161_v15 = vpop.f32.mrf.mxu0  ;;  %v189_v16 = vpop.f32.mrf.mxu1 }
  0x9a   :  { %v249_v23 = vpop.f32.mrf.mxu2 }
  0x9b   :  { %v5507_v24 = vadd.f32 %v249_v23, %v161_v15  ;;  %v277_v25 = vpop.f32.mrf.mxu3  ;;  %v5019_v15 = vld [vmem:[%s7346_s5 + $0xe0] sm:$0xf0] }
  0x9c   :  { %v5509_v26 = vadd.f32 %v277_v25, %v189_v16  ;;  %v3947_v16 = vld [vmem:[%s7346_s5 + $0x30] sm:$0xf]  ;;  %v4032_v17 = vor.u32 %v5019_v15, %v4031_v14  ;;  %v5027_v23 = vld [vmem:[%s7346_s5 + $0x124] sm:$0xf]  ;;  %v4020_v14 = vor.u32 %v5016_v10, %v4019_v9  ;;  %v4992_v15 = vld [vmem:[%s7346_s5 + $0x8] sm:$0xf0] }
  0x9d   :  { %v3948_v21 = vor.u32 %v4998_v18, %v3947_v16  ;;  %v4069_v25 = vld [vmem:[%s7346_s5 + $0x12c] sm:$0xf0]  ;;  %v4991_v16 = vld [vmem:[%s7346_s5 + $0x4] sm:$0xf]  ;;  %v3924_v18 = vor.u32 %v4992_v15, %v3923_v12 }
  0x9e   :  { %865 = vmatpush.bf16.msrb.mxu3 %v4032_v17  ;;  %v4072_v31 = vor.u32 %v5027_v23, %v4069_v25  ;;  %v3925_v17 = vld [vmem:[%s7346_s5 + $0xc] sm:$0xf0] }
  0x9f   :  { %836 = vmatpush.bf16.msrb.mxu2 %v3948_v21  ;;  %v3928_v19 = vor.u32 %v4991_v16, %v3925_v17  ;;  %v4021_v21 = vld [vmem:[%s7346_s5 + $0xcc] sm:$0xf0] }
  0xa0   :  { %v5511_v27 = vpop.f32.mrf.mxu0  ;;  %v5513_v28 = vpop.f32.mrf.mxu1  ;;  %918 = vmatpush.bf16.msra.mxu1 %v4072_v31  ;;  %v4024_v25 = vor.u32 %v5015_v20, %v4021_v21  ;;  %v4075_v31 = vld [vmem:[%s7346_s5 + $0x128] sm:$0xf] }
  0xa2   :  { %v5521_v32 = vpop.f32.mrf.mxu2  ;;  %866 = vmatpush.bf16.msrb.mxu3 %v4020_v14  ;;  %v5023_v14 = vld [vmem:[%s7346_s5 + $0x100] sm:$0xf0] }
  0xa3   :  { %v5523_v33 = vpop.f32.mrf.mxu3  ;;  %837 = vmatpush.bf16.msrb.mxu2 %v3936_v48  ;;  %v252_v39 = vadd.f32 %v5521_v32, %v5511_v27 }
  0xa4   :  { %919 = vmatpush.bf16.msra.mxu1 %v4060_v49  ;;  %v4003_v49 = vld [vmem:[%s7346_s5 + $0x98] sm:$0xf] }
  0xa7   :  { %838 = vmatpush.bf16.msrb.mxu2 %v3924_v18 }
  0xa8   :  { %v166_v34 = vpop.f32.mrf.mxu0  ;;  %v194_v35 = vpop.f32.mrf.mxu1 }
  0xaa   :  { %v254_v42 = vpop.f32.mrf.mxu2 }
  0xab   :  { %v5537_v43 = vadd.f32 %v254_v42, %v166_v34  ;;  %v282_v44 = vpop.f32.mrf.mxu3  ;;  %v5000_v34 = vld [vmem:[%s7346_s5 + $0x4c] sm:$0xf] }
  0xac   :  { %v5539_v45 = vadd.f32 %v282_v44, %v194_v35  ;;  %v3961_v35 = vld [vmem:[%s7346_s5 + $0x54] sm:$0xf0] }
  0xad   :  { %v3964_v40 = vor.u32 %v5000_v34, %v3961_v35  ;;  %v5029_v35 = vld [vmem:[%s7346_s5 + $0x130] sm:$0xf0] }
  0xae   :  { %v4076_v36 = vor.u32 %v5029_v35, %v4075_v31 }
  0xaf   :  { %891 = vmatpush.bf16.msra.mxu0 %v3964_v40  ;;  %v280_v40 = vadd.f32 %v5523_v33, %v5513_v28 }
  0xb0   :  { %v5541_v46 = vpop.f32.mrf.mxu0  ;;  %v5543_v47 = vpop.f32.mrf.mxu1  ;;  %974 = vmatpush.bf16.msra.mxu3 %v4076_v36 }
  0xb2   :  { %v5557_v54 = vpop.f32.mrf.mxu2 }
  0xb3   :  { %v5559_v55 = vpop.f32.mrf.mxu3 }
  0xb8   :  { %v171_v56 = vpop.f32.mrf.mxu0  ;;  %v199_v57 = vpop.f32.mrf.mxu1 }
  0xba   :  { %v259_v60 = vpop.f32.mrf.mxu2 }
  0xbb   :  { %v5573_v0 = vadd.f32 %v259_v60, %v171_v56  ;;  %v287_v1 = vpop.f32.mrf.mxu3  ;;  %v3952_v56 = vor.u32 %v4997_v51, %v3949_v52  ;;  %v5011_v51 = vld [vmem:[%s7346_s5 + $0xa0] sm:$0xf0] }
  0xbc   :  { %v5575_v3 = vadd.f32 %v287_v1, %v199_v57  ;;  %v4045_v57 = vld [vmem:[%s7346_s5 + $0xfc] sm:$0xf0]  ;;  %v3940_v1 = vor.u32 %v4994_v61, %v3937_v62  ;;  %v4004_v52 = vor.u32 %v5011_v51, %v4003_v49  ;;  %v257_v61 = vadd.f32 %v5557_v54, %v5541_v46  ;;  %v3979_v46 = vld [vmem:[%s7346_s5 + $0x68] sm:$0xf]  ;;  %v3967_v51 = vld [vmem:[%s7346_s5 + $0x50] sm:$0xf] }
  0xbd   :  { %v4048_v60 = vor.u32 %v5021_v53, %v4045_v57  ;;  %892 = vmatpush.bf16.msra.mxu0 %v3952_v56  ;;  %v285_v62 = vadd.f32 %v5559_v55, %v5543_v47  ;;  %v5005_v47 = vld [vmem:[%s7346_s5 + $0x70] sm:$0xf0] }
  0xbe   :  { %v3980_v12 = vor.u32 %v5005_v47, %v3979_v46 }
  0xbf   :  { %920 = vmatpush.bf16.msra.mxu1 %v4048_v60  ;;  %v5026_v60 = vld [vmem:[%s7346_s5 + $0x118] sm:$0xf0] }
  0xc0   :  { %v5583_v7 = vpop.f32.mrf.mxu0  ;;  %v5585_v8 = vpop.f32.mrf.mxu1 }
  0xc1   :  { %893 = vmatpush.bf16.msra.mxu0 %v3940_v1  ;;  %v5008_v1 = vld [vmem:[%s7346_s5 + $0x88] sm:$0xf0] }
  0xc2   :  { %v5593_v11 = vpop.f32.mrf.mxu2 }
  0xc3   :  { %v5595_v13 = vpop.f32.mrf.mxu3  ;;  %921 = vmatpush.bf16.msra.mxu1 %v4036_v5 }
  0xc5   :  { %894 = vmatpush.bf16.msra.mxu0 %v3928_v19 }
  0xc7   :  { %922 = vmatpush.bf16.msra.mxu1 %v4024_v25 }
  0xc8   :  { %v176_v29 = vpop.f32.mrf.mxu0  ;;  %v204_v30 = vpop.f32.mrf.mxu1 }
  0xca   :  { %v264_v37 = vpop.f32.mrf.mxu2 }
  0xcb   :  { %v5639_v42 = vadd.f32 %v264_v37, %v176_v29  ;;  %v292_v44 = vpop.f32.mrf.mxu3  ;;  %v4015_v29 = vld [vmem:[%s7346_s5 + $0xb0] sm:$0xf] }
  0xcc   :  { %v5641_v50 = vadd.f32 %v292_v44, %v204_v30  ;;  %v5014_v30 = vld [vmem:[%s7346_s5 + $0xb8] sm:$0xf0] }
  0xcd   :  { %v4016_v34 = vor.u32 %v5014_v30, %v4015_v29 }
  0xcf   :  { %943 = vmatpush.bf16.msra.mxu2 %v4016_v34 }
  0xd0   :  { %v178_v58 = vpop.f32.mrf.mxu0  ;;  %v206_v59 = vpop.f32.mrf.mxu1 }
  0xd1   :  { %v4063_v59 = vld [vmem:[%s7346_s5 + $0x110] sm:$0xf] }
  0xd2   :  { %v266_v4 = vpop.f32.mrf.mxu2  ;;  %v4064_v63 = vor.u32 %v5026_v60, %v4063_v59  ;;  %v262_v59 = vadd.f32 %v5593_v11, %v5583_v7 }
  0xd3   :  { %v294_v6 = vpop.f32.mrf.mxu3  ;;  %944 = vmatpush.bf16.msra.mxu2 %v4004_v52  ;;  %v5002_v52 = vld [vmem:[%s7346_s5 + $0x58] sm:$0xf0] }
  0xd4   :  { %975 = vmatpush.bf16.msra.mxu3 %v4064_v63 }
  0xd8   :  { %v357_v22 = vpop.f32.mrf.mxu0  ;;  %v385_v23 = vpop.f32.mrf.mxu1 }
  0xd9   :  { %v404_v44 = vadd.f32 %v357_v22, %v5507_v24  ;;  %v405_v53 = vadd.f32 %v385_v23, %v5509_v26  ;;  %v3991_v26 = vld [vmem:[%s7346_s5 + $0x80] sm:$0xf] }
  0xda   :  { %v3992_v6 = vor.u32 %v5008_v1, %v3991_v26  ;;  %v3955_v26 = vld [vmem:[%s7346_s5 + $0x38] sm:$0xf] }
  0xdb   :  { %v418_v28 = vmax.f32 %v404_v44, 0.0  ;;  %v419_v57 = vmax.f32 %v405_v53, 0.0  ;;  %v4175_v44 = vld [vmem:[%s7347_s4 + $0xa8] sm:$0xf]  ;;  %v4163_v53 = vld [vmem:[%s7347_s4 + $0x90] sm:$0xf] }
  0xdc   :  { %945 = vmatpush.bf16.msra.mxu2 %v3992_v6 }
  0xe0   :  { %v359_v37 = vpop.f32.mrf.mxu0  ;;  %v387_v38 = vpop.f32.mrf.mxu1  ;;  %946 = vmatpush.bf16.msra.mxu2 %v3980_v12 }
  0xe1   :  { %v406_v41 = vadd.f32 %v359_v37, %v252_v39  ;;  %v407_v48 = vadd.f32 %v387_v38, %v280_v40 }
  0xe3   :  { %v420_v27 = vmax.f32 %v406_v41, 0.0  ;;  %v421_v33 = vmax.f32 %v407_v48, 0.0  ;;  %v4974_v48 = vld [vmem:[%s7347_s4 + $0xb0] sm:$0xf0] }
  0xe4   :  { %v4176_v49 = vor.u32 %v4974_v48, %v4175_v44  ;;  %v4986_v44 = vld [vmem:[%s7347_s4 + $0x110] sm:$0xf0]  ;;  %v3943_v48 = vld [vmem:[%s7346_s5 + $0x20] sm:$0xf] }
  0xe5   :  { %v5715_v24 = vpack.c.bf16 %v420_v27, %v418_v28  ;;  %v5717_v58 = vpack.c.bf16 %v421_v33, %v419_v57  ;;  %v4971_v28 = vld [vmem:[%s7347_s4 + $0x98] sm:$0xf0]  ;;  %v4039_v33 = vld [vmem:[%s7346_s5 + $0xe0] sm:$0xf]  ;;  %v5020_v57 = vld [vmem:[%s7346_s5 + $0xe8] sm:$0xf0] }
  0xe6   :  { %1215 = vmatpush.bf16.msrb.mxu0 %v4176_v49  ;;  %v4040_v60 = vor.u32 %v5020_v57, %v4039_v33  ;;  %v4996_v49 = vld [vmem:[%s7346_s5 + $0x28] sm:$0xf0]  ;;  %v4211_v57 = vld [vmem:[%s7347_s4 + $0xf0] sm:$0xf] }
  0xe7   :  { %v547_v5 = vshll.u32 %v5715_v24, 16  ;;  %v559_v55 = vshll.u32 %v5717_v58, 16  ;;  %v545_v25 = vshrl.u32 %v5715_v24, 16  ;;  %v557_v30 = vshrl.u32 %v5717_v58, 16 }
  0xe8   :  { %v362_v32 = vpop.f32.mrf.mxu0  ;;  %v390_v56 = vpop.f32.mrf.mxu1 }
  0xe9   :  { %v408_v2 = vadd.f32 %v362_v32, %v5537_v43  ;;  %v409_v4 = vadd.f32 %v390_v56, %v5539_v45  ;;  %v4051_v43 = vld [vmem:[%s7346_s5 + $0xf8] sm:$0xf]  ;;  %v549_v22 = vrot.slane %v547_v5, 1  ;;  %v561_v23 = vrot.slane %v559_v55, 1 }
  0xea   :  { %v4052_v15 = vor.u32 %v5023_v14, %v4051_v43  ;;  %v3968_v56 = vor.u32 %v5002_v52, %v3967_v51  ;;  %v4139_v43 = vld [vmem:[%s7347_s4 + $0x60] sm:$0xf]  ;;  %v4027_v52 = vld [vmem:[%s7346_s5 + $0xc8] sm:$0xf] }
  0xeb   :  { %v422_v16 = vmax.f32 %v408_v2, 0.0  ;;  %v423_v17 = vmax.f32 %v409_v4, 0.0  ;;  %v550_v36 = vor.u32 %v549_v22, %v545_v25  ;;  %v562_v38 = vor.u32 %v561_v23, %v557_v30  ;;  %v4235_v2 = vld [vmem:[%s7347_s4 + $0x120] sm:$0xf]  ;;  %v4989_v4 = vld [vmem:[%s7347_s4 + $0x128] sm:$0xf0] }
  0xec   :  { %976 = vmatpush.bf16.msra.mxu3 %v4052_v15  ;;  %947 = vmatpush.bf16.msra.mxu2 %v3968_v56  ;;  %v4959_v56 = vld [vmem:[%s7347_s4 + $0x38] sm:$0xf0] }
  0xf0   :  { %v364_v9 = vpop.f32.mrf.mxu0  ;;  %v392_v10 = vpop.f32.mrf.mxu1  ;;  %977 = vmatpush.bf16.msra.mxu3 %v4040_v60 }
  0xf1   :  { %v410_v54 = vadd.f32 %v364_v9, %v257_v61  ;;  %v411_v45 = vadd.f32 %v392_v10, %v285_v62  ;;  %v4999_v61 = vld [vmem:[%s7346_s5 + $0x40] sm:$0xf0]  ;;  %v4151_v62 = vld [vmem:[%s7347_s4 + $0x78] sm:$0xf]  ;;  %v4236_v10 = vor.u32 %v4989_v4, %v4235_v2 }
  0xf2   :  { %v3956_v7 = vor.u32 %v4999_v61, %v3955_v26  ;;  %v4983_v26 = vld [vmem:[%s7347_s4 + $0xf8] sm:$0xf0]  ;;  %v3931_v61 = vld [vmem:[%s7346_s5 + $0x8] sm:$0xf]  ;;  %v4980_v2 = vld [vmem:[%s7347_s4 + $0xe0] sm:$0xf0] }
  0xf3   :  { %v424_v18 = vmax.f32 %v410_v54, 0.0  ;;  %v425_v19 = vmax.f32 %v411_v45, 0.0  ;;  %v4965_v54 = vld [vmem:[%s7347_s4 + $0x68] sm:$0xf0]  ;;  %1246 = vmatpush.bf16.msrb.mxu1 %v4236_v10 }
  0xf4   :  { %948 = vmatpush.bf16.msra.mxu2 %v3956_v7  ;;  %v4140_v15 = vor.u32 %v4965_v54, %v4139_v43  ;;  %v4103_v7 = vld [vmem:[%s7347_s4 + $0x18] sm:$0xf] }
  0xf5   :  { %v5751_v20 = vpack.c.bf16 %v424_v18, %v422_v16  ;;  %v5753_v21 = vpack.c.bf16 %v425_v19, %v423_v17 }
  0xf7   :  { %v552_v29 = vshll.u32 %v5751_v20, 16  ;;  %v564_v31 = vshll.u32 %v5753_v21, 16  ;;  %v568_v12 = vshrl.u32 %v5751_v20, 16  ;;  %v576_v14 = vshrl.u32 %v5753_v21, 16 }
  0xf8   :  { %v367_v34 = vpop.f32.mrf.mxu0  ;;  %v395_v35 = vpop.f32.mrf.mxu1 }
  0xf9   :  { %v554_v37 = vrot.slane %v552_v29, 1  ;;  %v566_v39 = vrot.slane %v564_v31, 1  ;;  %v412_v27 = vadd.f32 %v367_v34, %v5573_v0  ;;  %v413_v32 = vadd.f32 %v395_v35, %v5575_v3 }
  0xfa   :  { %v290_v0 = vadd.f32 %v5595_v13, %v5585_v8  ;;  %v4164_v3 = vor.u32 %v4971_v28, %v4163_v53  ;;  %v4968_v8 = vld [vmem:[%s7347_s4 + $0x80] sm:$0xf0]  ;;  %v3944_v53 = vor.u32 %v4996_v49, %v3943_v48 }
  0xfb   :  { %v5760_v40 = vsel %vm82_vm2, %v550_v36, %v554_v37  ;;  %v5763_v41 = vsel %vm82_vm2, %v562_v38, %v566_v39  ;;  %v426_v5 = vmax.f32 %v412_v27, 0.0  ;;  %v427_v6 = vmax.f32 %v413_v32, 0.0  ;;  %v5017_v27 = vld [vmem:[%s7346_s5 + $0xd0] sm:$0xf0]  ;;  %v4115_v32 = vld [vmem:[%s7347_s4 + $0x30] sm:$0xf] }
  0xfc   :  { %839 = vmatmul.bf16.vlgmr.msrb.gmra.mxu2 %v5760_v40  ;;  %4077 = vmatmul.msk.bf16.vlgmr.msrb.gmra.mxu3 %vm818_vm4, %v5763_v41  ;;  %v4152_v9 = vor.u32 %v4968_v8, %v4151_v62  ;;  %v570_v22 = vor.u32 %v568_v12, %v554_v37  ;;  %v578_v23 = vor.u32 %v576_v14, %v566_v39  ;;  %v4223_v39 = vld [vmem:[%s7347_s4 + $0x108] sm:$0xf]  ;;  %v4993_v62 = vld [vmem:[%s7346_s5 + $0x10] sm:$0xf0]  ;;  %v4956_v8 = vld [vmem:[%s7347_s4 + $0x20] sm:$0xf0] }
  0xfd   :  { %895 = vmatmul.bf16.vlgmr.msra.gmra.mxu0 %v5760_v40  ;;  %4081 = vmatmul.msk.bf16.vlgmr.msra.gmra.mxu1 %vm818_vm4, %v5763_v41  ;;  %v4224_v51 = vor.u32 %v4986_v44, %v4223_v39  ;;  %v4116_v60 = vor.u32 %v4959_v56, %v4115_v32  ;;  %v4964_v32 = vld [vmem:[%s7347_s4 + $0x64] sm:$0xf] }
  0xfe   :  { %1216 = vmatpush.bf16.msrb.mxu0 %v4164_v3  ;;  %949 = vmatpush.bf16.msra.mxu2 %v3944_v53  ;;  %v4028_v3 = vor.u32 %v5017_v27, %v4027_v52  ;;  %v4967_v53 = vld [vmem:[%s7347_s4 + $0x7c] sm:$0xf]  ;;  %v4153_v27 = vld [vmem:[%s7347_s4 + $0x84] sm:$0xf0] }
  0xff   :  { %1247 = vmatpush.bf16.msrb.mxu1 %v4224_v51  ;;  %v4156_v56 = vor.u32 %v4967_v53, %v4153_v27  ;;  %v4093_v53 = vld [vmem:[%s7347_s4 + $0xc] sm:$0xf0]  ;;  %v4111_v27 = vld [vmem:[%s7347_s4 + $0x20] sm:$0xf] }
 0x100   :  { %v369_v63 = vpop.f32.mrf.mxu0  ;;  %v397_v1 = vpop.f32.mrf.mxu1  ;;  %978 = vmatpush.bf16.msra.mxu3 %v4028_v3 }
 0x101   :  { %v414_v11 = vadd.f32 %v369_v63, %v262_v59  ;;  %v415_v13 = vadd.f32 %v397_v1, %v290_v0  ;;  %v4212_v63 = vor.u32 %v4983_v26, %v4211_v57  ;;  %v3932_v1 = vor.u32 %v4993_v62, %v3931_v61  ;;  %v4141_v57 = vld [vmem:[%s7347_s4 + $0x6c] sm:$0xf0]  ;;  %v4975_v61 = vld [vmem:[%s7347_s4 + $0xb8] sm:$0xf0] }
 0x102   :  { %1217 = vmatpush.bf16.msrb.mxu0 %v4152_v9  ;;  %v4953_v9 = vld [vmem:[%s7347_s4 + $0x8] sm:$0xf0]  ;;  %v4183_v26 = vld [vmem:[%s7347_s4 + $0xb0] sm:$0xf] }
 0x103   :  { %v428_v46 = vmax.f32 %v414_v11, 0.0  ;;  %v429_v47 = vmax.f32 %v415_v13, 0.0  ;;  %v4104_v11 = vor.u32 %v4956_v8, %v4103_v7  ;;  %v4199_v13 = vld [vmem:[%s7347_s4 + $0xd8] sm:$0xf]  ;;  %1248 = vmatpush.bf16.msrb.mxu1 %v4212_v63  ;;  %950 = vmatpush.bf16.msra.mxu2 %v3932_v1  ;;  %v4184_v62 = vor.u32 %v4975_v61, %v4183_v26  ;;  %v4961_v63 = vld [vmem:[%s7347_s4 + $0x4c] sm:$0xf] }
 0x104   :  { %v4200_v10 = vor.u32 %v4980_v2, %v4199_v13  ;;  %v4129_v1 = vld [vmem:[%s7347_s4 + $0x54] sm:$0xf0]  ;;  %v4979_v8 = vld [vmem:[%s7347_s4 + $0xdc] sm:$0xf]  ;;  %v4954_v26 = vld [vmem:[%s7347_s4 + $0x10] sm:$0xf0] }
 0x105   :  { %v5825_v45 = vpack.c.bf16 %v428_v46, %v426_v5  ;;  %v5827_v55 = vpack.c.bf16 %v429_v47, %v427_v6  ;;  %v4091_v6 = vld [vmem:[%s7347_s4] sm:$0xf]  ;;  %v4977_v47 = vld [vmem:[%s7347_s4 + $0xc8] sm:$0xf0]  ;;  %v4132_v7 = vor.u32 %v4961_v63, %v4129_v1  ;;  %v4195_v61 = vld [vmem:[%s7347_s4 + $0xc8] sm:$0xf] }
 0x106   :  { %1218 = vmatpush.bf16.msrb.mxu0 %v4140_v15  ;;  %v4187_v46 = vld [vmem:[%s7347_s4 + $0xc0] sm:$0xf]  ;;  %v4092_v54 = vor.u32 %v4953_v9, %v4091_v6  ;;  %v4978_v63 = vld [vmem:[%s7347_s4 + $0xd0] sm:$0xf0] }
 0x107   :  { %v572_v16 = vshll.u32 %v5825_v45, 16  ;;  %v580_v17 = vshll.u32 %v5827_v55, 16  ;;  %v584_v43 = vshrl.u32 %v5825_v45, 16  ;;  %v592_v14 = vshrl.u32 %v5827_v55, 16  ;;  %1249 = vmatpush.bf16.msrb.mxu1 %v4200_v10  ;;  %v4159_v6 = vld [vmem:[%s7347_s4 + $0x80] sm:$0xf] }
 0x108   :  { %v372_v18 = vpop.f32.mrf.mxu0  ;;  %v400_v19 = vpop.f32.mrf.mxu1  ;;  %v4969_v10 = vld [vmem:[%s7347_s4 + $0x88] sm:$0xf0]  ;;  %v4196_v1 = vor.u32 %v4978_v63, %v4195_v61  ;;  %v5066_v61 = vld [vmem:[%s7348_s6 + $0x124] sm:$0xf] }
 0x109   :  { %v416_v25 = vadd.f32 %v372_v18, %v5639_v42  ;;  %v417_v29 = vadd.f32 %v400_v19, %v5641_v50  ;;  %v5835_v30 = vrot.slane %v572_v16, 1  ;;  %v5837_v31 = vrot.slane %v580_v17, 1  ;;  %v4127_v42 = vld [vmem:[%s7347_s4 + $0x48] sm:$0xf]  ;;  %v4962_v50 = vld [vmem:[%s7347_s4 + $0x50] sm:$0xf0] }
 0x10a   :  { %v4128_v37 = vor.u32 %v4962_v50, %v4127_v42  ;;  %v4188_v16 = vor.u32 %v4977_v47, %v4187_v46  ;;  %v4985_v50 = vld [vmem:[%s7347_s4 + $0x10c] sm:$0xf]  ;;  %v4243_v46 = vld [vmem:[%s7347_s4 + $0x128] sm:$0xf]  ;;  %v4990_v47 = vld [vmem:[%s7347_s4 + $0x130] sm:$0xf0] }
 0x10b   :  { %v430_v34 = vmax.f32 %v416_v25, 0.0  ;;  %v431_v35 = vmax.f32 %v417_v29, 0.0  ;;  %v5841_v36 = vsel %vm82_vm2, %v570_v22, %v5835_v30  ;;  %v5845_v38 = vsel %vm82_vm2, %v578_v23, %v5837_v31  ;;  %v4973_v23 = vld [vmem:[%s7347_s4 + $0xac] sm:$0xf]  ;;  %v4177_v25 = vld [vmem:[%s7347_s4 + $0xb4] sm:$0xf0] }
 0x10c   :  { %844 = vmatmul.bf16.gmra.mxu2 %v5841_v36  ;;  %4078 = vmatmul.msk.bf16.gmra.mxu3 %vm818_vm4, %v5845_v38  ;;  %v586_v17 = vor.u32 %v584_v43, %v5835_v30  ;;  %v594_v18 = vor.u32 %v592_v14, %v5837_v31  ;;  %v4988_v29 = vld [vmem:[%s7347_s4 + $0x124] sm:$0xf]  ;;  %v4180_v30 = vor.u32 %v4973_v23, %v4177_v25  ;;  %v4237_v31 = vld [vmem:[%s7347_s4 + $0x12c] sm:$0xf0]  ;;  %v4966_v14 = vld [vmem:[%s7347_s4 + $0x70] sm:$0xf0] }
 0x10d   :  { %900 = vmatmul.bf16.gmra.mxu0 %v5841_v36  ;;  %4082 = vmatmul.msk.bf16.gmra.mxu1 %vm818_vm4, %v5845_v38  ;;  %v5883_v28 = vpack.c.bf16 %v430_v34, %v430_v34  ;;  %v5885_v33 = vpack.c.bf16 %v431_v35, %v431_v35  ;;  %v4970_v34 = vld [vmem:[%s7347_s4 + $0x94] sm:$0xf]  ;;  %v4165_v35 = vld [vmem:[%s7347_s4 + $0x9c] sm:$0xf0]  ;;  %v4240_v42 = vor.u32 %v4988_v29, %v4237_v31  ;;  %v4987_v25 = vld [vmem:[%s7347_s4 + $0x118] sm:$0xf0] }
 0x10e   :  { %1219 = vmatpush.bf16.msrb.mxu0 %v4128_v37  ;;  %1250 = vmatpush.bf16.msrb.mxu1 %v4188_v16  ;;  %v4225_v37 = vld [vmem:[%s7347_s4 + $0x114] sm:$0xf0]  ;;  %v4168_v39 = vor.u32 %v4970_v34, %v4165_v35  ;;  %v4160_v43 = vor.u32 %v4969_v10, %v4159_v6  ;;  %v4135_v16 = vld [vmem:[%s7347_s4 + $0x50] sm:$0xf]  ;;  %v4955_v29 = vld [vmem:[%s7347_s4 + $0x1c] sm:$0xf] }
 0x10f   :  { %v588_v4 = vshll.u32 %v5883_v28, 16  ;;  %v596_v5 = vshll.u32 %v5885_v33, 16  ;;  %1271 = vmatpush.bf16.msrb.mxu2 %v4180_v30  ;;  %1302 = vmatpush.bf16.msrb.mxu3 %v4240_v42  ;;  %v4228_v44 = vor.u32 %v4985_v50, %v4225_v37  ;;  %v600_v48 = vshrl.u32 %v5883_v28, 16  ;;  %v4189_v34 = vld [vmem:[%s7347_s4 + $0xcc] sm:$0xf0] }
 0x110   :  { %v374_v59 = vpop.f32.mrf.mxu0  ;;  %v402_v0 = vpop.f32.mrf.mxu1  ;;  %v603_v49 = vshrl.u32 %v5885_v33, 16  ;;  %v4123_v35 = vld [vmem:[%s7347_s4 + $0x38] sm:$0xf]  ;;  %v4960_v42 = vld [vmem:[%s7347_s4 + $0x40] sm:$0xf0] }
 0x111   :  { %v590_v12 = vrot.slane %v588_v4, 1  ;;  %v598_v15 = vrot.slane %v596_v5, 1  ;;  %v4982_v59 = vld [vmem:[%s7347_s4 + $0xf4] sm:$0xf]  ;;  %v4213_v0 = vld [vmem:[%s7347_s4 + $0xfc] sm:$0xf0]  ;;  %v4124_v37 = vor.u32 %v4960_v42, %v4123_v35 }
 0x112   :  { %1220 = vmatpush.bf16.msrb.mxu0 %v4116_v60  ;;  %v4216_v3 = vor.u32 %v4982_v59, %v4213_v0  ;;  %v4144_v60 = vor.u32 %v4964_v32, %v4141_v57  ;;  %v4958_v4 = vld [vmem:[%s7347_s4 + $0x34] sm:$0xf]  ;;  %v4117_v5 = vld [vmem:[%s7347_s4 + $0x3c] sm:$0xf0]  ;;  %v4957_v32 = vld [vmem:[%s7347_s4 + $0x28] sm:$0xf0] }
 0x113   :  { %v5930_v19 = vsel %vm82_vm2, %v586_v17, %v590_v12  ;;  %v5933_v22 = vsel %vm82_vm2, %v594_v18, %v598_v15  ;;  %1272 = vmatpush.bf16.msrb.mxu2 %v4168_v39  ;;  %1303 = vmatpush.bf16.msrb.mxu3 %v4228_v44  ;;  %v5967_v51 = vor.u32 %v600_v48, %v590_v12  ;;  %v4147_v12 = vld [vmem:[%s7347_s4 + $0x68] sm:$0xf]  ;;  %v4963_v17 = vld [vmem:[%s7347_s4 + $0x58] sm:$0xf0]  ;;  %v4231_v18 = vld [vmem:[%s7347_s4 + $0x110] sm:$0xf] }
 0x114   :  { %v5969_v52 = vor.u32 %v603_v49, %v598_v15  ;;  %v4120_v9 = vor.u32 %v4958_v4, %v4117_v5  ;;  %v4148_v15 = vor.u32 %v4966_v14, %v4147_v12  ;;  %v4136_v23 = vor.u32 %v4963_v17, %v4135_v16  ;;  %v4219_v39 = vld [vmem:[%s7347_s4 + $0xf8] sm:$0xf]  ;;  %v4984_v44 = vld [vmem:[%s7347_s4 + $0x100] sm:$0xf0]  ;;  %v4207_v57 = vld [vmem:[%s7347_s4 + $0xe0] sm:$0xf] }
 0x115   :  { %v4232_v30 = vor.u32 %v4987_v25, %v4231_v18  ;;  %v4952_v48 = vld [vmem:[%s7347_s4 + $0x4] sm:$0xf]  ;;  %v4220_v49 = vor.u32 %v4984_v44, %v4219_v39  ;;  %v4981_v59 = vld [vmem:[%s7347_s4 + $0xe8] sm:$0xf0]  ;;  %v4112_v0 = vor.u32 %v4957_v32, %v4111_v27  ;;  %v4391_v4 = vld [vmem:[%s7348_s6 + $0x108] sm:$0xf] }
 0x116   :  { %1221 = vmatpush.bf16.msrb.mxu0 %v4104_v11  ;;  %v4201_v11 = vld [vmem:[%s7347_s4 + $0xe4] sm:$0xf0]  ;;  %v5064_v5 = vld [vmem:[%s7348_s6 + $0x110] sm:$0xf0]  ;;  %v5046_v10 = vld [vmem:[%s7348_s6 + $0x80] sm:$0xf0] }
 0x117   :  { %1273 = vmatpush.bf16.msrb.mxu2 %v4156_v56  ;;  %1304 = vmatpush.bf16.msrb.mxu3 %v4216_v3  ;;  %v4204_v2 = vor.u32 %v4979_v8, %v4201_v11  ;;  %v4096_v56 = vor.u32 %v4952_v48, %v4093_v53  ;;  %v4208_v3 = vor.u32 %v4981_v59, %v4207_v57  ;;  %v4331_v11 = vld [vmem:[%s7348_s6 + $0x90] sm:$0xf]  ;;  %v5051_v17 = vld [vmem:[%s7348_s6 + $0xac] sm:$0xf]  ;;  %v4345_v18 = vld [vmem:[%s7348_s6 + $0xb4] sm:$0xf0] }
 0x118   :  { %v4392_v6 = vor.u32 %v5064_v5, %v4391_v4  ;;  %v4295_v25 = vld [vmem:[%s7348_s6 + $0x48] sm:$0xf]  ;;  %v4367_v44 = vld [vmem:[%s7348_s6 + $0xd8] sm:$0xf]  ;;  %v5058_v48 = vld [vmem:[%s7348_s6 + $0xe0] sm:$0xf0] }
 0x119   :  { %v4368_v53 = vor.u32 %v5058_v48, %v4367_v44  ;;  %v5037_v27 = vld [vmem:[%s7348_s6 + $0x38] sm:$0xf0]  ;;  %v4271_v4 = vld [vmem:[%s7348_s6 + $0x18] sm:$0xf]  ;;  %v5034_v5 = vld [vmem:[%s7348_s6 + $0x20] sm:$0xf0] }
 0x11a   :  { %1222 = vmatpush.bf16.msrb.mxu0 %v4092_v54  ;;  %v4244_v54 = vor.u32 %v4990_v47, %v4243_v46  ;;  %v4379_v47 = vld [vmem:[%s7348_s6 + $0xf0] sm:$0xf]  ;;  %v5045_v32 = vld [vmem:[%s7348_s6 + $0x7c] sm:$0xf] }
 0x11b   :  { %1274 = vmatpush.bf16.msrb.mxu2 %v4144_v60  ;;  %1305 = vmatpush.bf16.msrb.mxu3 %v4204_v2  ;;  %v4099_v60 = vld [vmem:[%s7347_s4 + $0x8] sm:$0xf] }
 0x11c   :  { %849 = vmatmul.bf16.gmra.mxu2 %v5930_v19  ;;  %4079 = vmatmul.msk.bf16.gmra.mxu3 %vm818_vm4, %v5933_v22 }
 0x11d   :  { %905 = vmatmul.bf16.gmra.mxu0 %v5930_v19  ;;  %4083 = vmatmul.msk.bf16.gmra.mxu1 %vm818_vm4, %v5933_v22 }
 0x11e   :  { %1327 = vmatpush.bf16.msra.mxu0 %v4184_v62  ;;  %1358 = vmatpush.bf16.msra.mxu1 %v4244_v54  ;;  %v4100_v62 = vor.u32 %v4954_v26, %v4099_v60  ;;  %v5061_v54 = vld [vmem:[%s7348_s6 + $0xf8] sm:$0xf0]  ;;  %v5042_v60 = vld [vmem:[%s7348_s6 + $0x64] sm:$0xf]  ;;  %v4309_v26 = vld [vmem:[%s7348_s6 + $0x6c] sm:$0xf0] }
 0x11f   :  { %1275 = vmatpush.bf16.msrb.mxu2 %v4132_v7  ;;  %v5052_v7 = vld [vmem:[%s7348_s6 + $0xb0] sm:$0xf0]  ;;  %v4380_v12 = vor.u32 %v5061_v54, %v4379_v47  ;;  %v4312_v63 = vor.u32 %v5042_v60, %v4309_v26  ;;  %v4355_v54 = vld [vmem:[%s7348_s6 + $0xc0] sm:$0xf] }
 0x120   :  { %v5060_v47 = vld [vmem:[%s7348_s6 + $0xf4] sm:$0xf] }
 0x122   :  { %1359 = vmatpush.bf16.msra.mxu1 %v4232_v30 }
 0x123   :  { %1276 = vmatpush.bf16.msrb.mxu2 %v4120_v9  ;;  %v4319_v9 = vld [vmem:[%s7348_s6 + $0x78] sm:$0xf] }
 0x124   :  { %v4320_v46 = vor.u32 %v5046_v10, %v4319_v9  ;;  %v4272_v9 = vor.u32 %v5034_v5, %v4271_v4  ;;  %v4339_v5 = vld [vmem:[%s7348_s6 + $0x98] sm:$0xf] }
 0x126   :  { %1360 = vmatpush.bf16.msra.mxu1 %v4220_v49  ;;  %v4283_v49 = vld [vmem:[%s7348_s6 + $0x30] sm:$0xf] }
 0x127   :  { %v4284_v57 = vor.u32 %v5037_v27, %v4283_v49  ;;  %v4261_v27 = vld [vmem:[%s7348_s6 + $0xc] sm:$0xf0] }
 0x12a   :  { %1361 = vmatpush.bf16.msra.mxu1 %v4208_v3 }
 0x12c   :  { %854 = vmatmul.bf16.gmra.mxu2 %v5967_v51  ;;  %4080 = vmatmul.msk.bf16.gmra.mxu3 %vm818_vm4, %v5969_v52 }
 0x12d   :  { %910 = vmatmul.bf16.gmra.mxu0 %v5967_v51  ;;  %4084 = vmatmul.msk.bf16.gmra.mxu1 %vm818_vm4, %v5969_v52 }
 0x12e   :  { %1362 = vmatpush.bf16.msra.mxu1 %v4196_v1  ;;  %v4405_v1 = vld [vmem:[%s7348_s6 + $0x12c] sm:$0xf0] }
 0x13c   :  { %951 = vmatmul.bf16.vlgmr.msra.gmra.mxu2 %v5760_v40  ;;  %4085 = vmatmul.msk.bf16.vlgmr.msra.gmra.mxu3 %vm818_vm4, %v5763_v41  ;;  %v4171_v40 = vld [vmem:[%s7347_s4 + $0x98] sm:$0xf]  ;;  %v4972_v41 = vld [vmem:[%s7347_s4 + $0xa0] sm:$0xf0] }
 0x13d   :  { %1223 = vmatmul.bf16.vlgmr.msrb.gmra.mxu0 %v5715_v24  ;;  %4245 = vmatmul.msk.bf16.vlgmr.msrb.gmra.mxu1 %vm818_vm4, %v5717_v58  ;;  %v4172_v13 = vor.u32 %v4972_v41, %v4171_v40  ;;  %v4343_v40 = vld [vmem:[%s7348_s6 + $0xa8] sm:$0xf] }
 0x13e   :  { %v4344_v41 = vor.u32 %v5052_v7, %v4343_v40  ;;  %v4408_v40 = vor.u32 %v5066_v61, %v4405_v1  ;;  %v4351_v61 = vld [vmem:[%s7348_s6 + $0xb0] sm:$0xf]  ;;  %v4411_v1 = vld [vmem:[%s7348_s6 + $0x128] sm:$0xf] }
 0x13f   :  { %1328 = vmatpush.bf16.msra.mxu0 %v4172_v13  ;;  %v5049_v13 = vld [vmem:[%s7348_s6 + $0x98] sm:$0xf0] }
 0x140   :  { %v4332_v2 = vor.u32 %v5049_v13, %v4331_v11  ;;  %1768 = vmatpush.bf16.msrb.mxu1 %v4408_v40  ;;  %v5063_v11 = vld [vmem:[%s7348_s6 + $0x10c] sm:$0xf] }
 0x143   :  { %1329 = vmatpush.bf16.msra.mxu0 %v4160_v43 }
 0x147   :  { %1330 = vmatpush.bf16.msra.mxu0 %v4148_v15 }
 0x14b   :  { %1331 = vmatpush.bf16.msra.mxu0 %v4136_v23  ;;  %v4348_v23 = vor.u32 %v5051_v17, %v4345_v18 }
 0x14c   :  { %956 = vmatmul.bf16.gmra.mxu2 %v5841_v36  ;;  %4086 = vmatmul.msk.bf16.gmra.mxu3 %vm818_vm4, %v5845_v38  ;;  %v4105_v36 = vld [vmem:[%s7347_s4 + $0x24] sm:$0xf0]  ;;  %v4976_v38 = vld [vmem:[%s7347_s4 + $0xc4] sm:$0xf] }
 0x14d   :  { %1228 = vmatmul.bf16.gmra.mxu0 %v5751_v20  ;;  %4246 = vmatmul.msk.bf16.gmra.mxu1 %vm818_vm4, %v5753_v21  ;;  %v4108_v31 = vor.u32 %v4955_v29, %v4105_v36  ;;  %v4192_v50 = vor.u32 %v4976_v38, %v4189_v34  ;;  %v5040_v29 = vld [vmem:[%s7348_s6 + $0x50] sm:$0xf0]  ;;  %v4333_v34 = vld [vmem:[%s7348_s6 + $0x9c] sm:$0xf0] }
 0x14e   :  { %v4296_v36 = vor.u32 %v5040_v29, %v4295_v25  ;;  %v4259_v29 = vld [vmem:[%s7348_s6] sm:$0xf] }
 0x14f   :  { %1277 = vmatpush.bf16.msrb.mxu2 %v4108_v31  ;;  %1306 = vmatpush.bf16.msrb.mxu3 %v4192_v50  ;;  %v5048_v31 = vld [vmem:[%s7348_s6 + $0x94] sm:$0xf] }
 0x150   :  { %1332 = vmatpush.bf16.msra.mxu0 %v4124_v37  ;;  %v4336_v42 = vor.u32 %v5048_v31, %v4333_v34  ;;  %v4273_v34 = vld [vmem:[%s7348_s6 + $0x24] sm:$0xf0] }
 0x153   :  { %1278 = vmatpush.bf16.msrb.mxu2 %v4096_v56  ;;  %v4321_v56 = vld [vmem:[%s7348_s6 + $0x84] sm:$0xf0] }
 0x154   :  { %1333 = vmatpush.bf16.msra.mxu0 %v4112_v0  ;;  %v4324_v59 = vor.u32 %v5045_v32, %v4321_v56  ;;  %v5054_v32 = vld [vmem:[%s7348_s6 + $0xc4] sm:$0xf] }
 0x157   :  { %1681 = vmatpush.bf16.msra.mxu2 %v4344_v41 }
 0x158   :  { %1334 = vmatpush.bf16.msra.mxu0 %v4100_v62 }
 0x15b   :  { %1682 = vmatpush.bf16.msra.mxu2 %v4332_v2  ;;  %v4393_v2 = vld [vmem:[%s7348_s6 + $0x114] sm:$0xf0] }
 0x15c   :  { %961 = vmatmul.bf16.gmra.mxu2 %v5930_v19  ;;  %4087 = vmatmul.msk.bf16.gmra.mxu3 %vm818_vm4, %v5933_v22  ;;  %v4403_v19 = vld [vmem:[%s7348_s6 + $0x120] sm:$0xf]  ;;  %v5067_v22 = vld [vmem:[%s7348_s6 + $0x128] sm:$0xf0] }
 0x15d   :  { %1233 = vmatmul.bf16.gmra.mxu0 %v5825_v45  ;;  %4247 = vmatmul.msk.bf16.gmra.mxu1 %vm818_vm4, %v5827_v55  ;;  %v4404_v8 = vor.u32 %v5067_v22, %v4403_v19  ;;  %v5039_v22 = vld [vmem:[%s7348_s6 + $0x4c] sm:$0xf] }
 0x15e   :  { %1737 = vmatpush.bf16.msrb.mxu0 %v4348_v23 }
 0x15f   :  { %1712 = vmatpush.bf16.msra.mxu3 %v4404_v8  ;;  %1683 = vmatpush.bf16.msra.mxu2 %v4320_v46  ;;  %v4297_v8 = vld [vmem:[%s7348_s6 + $0x54] sm:$0xf0] }
 0x160   :  { %v4300_v13 = vor.u32 %v5039_v22, %v4297_v8 }
 0x162   :  { %1738 = vmatpush.bf16.msrb.mxu0 %v4336_v42  ;;  %v5057_v42 = vld [vmem:[%s7348_s6 + $0xdc] sm:$0xf] }
 0x163   :  { %1713 = vmatpush.bf16.msra.mxu3 %v4392_v6  ;;  %v4396_v6 = vor.u32 %v5063_v11, %v4393_v2 }
 0x165   :  { %1769 = vmatpush.bf16.msrb.mxu1 %v4396_v6  ;;  %v5050_v6 = vld [vmem:[%s7348_s6 + $0xa0] sm:$0xf0] }
 0x166   :  { %1739 = vmatpush.bf16.msrb.mxu0 %v4324_v59  ;;  %v4357_v59 = vld [vmem:[%s7348_s6 + $0xcc] sm:$0xf0] }
 0x167   :  { %1714 = vmatpush.bf16.msra.mxu3 %v4380_v12  ;;  %v5055_v12 = vld [vmem:[%s7348_s6 + $0xc8] sm:$0xf0]  ;;  %v4360_v60 = vor.u32 %v5054_v32, %v4357_v59  ;;  %v1446_v59 = vrot.slane %v5717_v58, 1 }
 0x168   :  { %v4356_v17 = vor.u32 %v5055_v12, %v4355_v54  ;;  %v4399_v12 = vld [vmem:[%s7348_s6 + $0x110] sm:$0xf] }
 0x16a   :  { %1740 = vmatpush.bf16.msrb.mxu0 %v4312_v63  ;;  %v5053_v63 = vld [vmem:[%s7348_s6 + $0xb8] sm:$0xf0] }
 0x16b   :  { %1715 = vmatpush.bf16.msra.mxu3 %v4368_v53  ;;  %v5030_v53 = vld [vmem:[%s7348_s6 + $0x4] sm:$0xf]  ;;  %v4352_v40 = vor.u32 %v5053_v63, %v4351_v61 }
 0x16c   :  { %966 = vmatmul.bf16.gmra.mxu2 %v5967_v51  ;;  %4088 = vmatmul.msk.bf16.gmra.mxu3 %vm818_vm4, %v5969_v52  ;;  %v4307_v51 = vld [vmem:[%s7348_s6 + $0x60] sm:$0xf]  ;;  %v5043_v52 = vld [vmem:[%s7348_s6 + $0x68] sm:$0xf0] }
 0x16d   :  { %1238 = vmatmul.bf16.gmra.mxu0 %v5883_v28  ;;  %4248 = vmatmul.msk.bf16.gmra.mxu1 %vm818_vm4, %v5885_v33  ;;  %v4308_v43 = vor.u32 %v5043_v52, %v4307_v51  ;;  %v5036_v51 = vld [vmem:[%s7348_s6 + $0x34] sm:$0xf]  ;;  %v4285_v52 = vld [vmem:[%s7348_s6 + $0x3c] sm:$0xf0] }
 0x16e   :  { %1741 = vmatpush.bf16.msrb.mxu0 %v4300_v13 }
 0x16f   :  { %1684 = vmatpush.bf16.msra.mxu2 %v4308_v43  ;;  %1716 = vmatpush.bf16.msra.mxu3 %v4356_v17 }
 0x173   :  { %1685 = vmatpush.bf16.msra.mxu2 %v4296_v36  ;;  %v5031_v36 = vld [vmem:[%s7348_s6 + $0x8] sm:$0xf0] }
 0x174   :  { %v4260_v31 = vor.u32 %v5031_v36, %v4259_v29 }
 0x177   :  { %1686 = vmatpush.bf16.msra.mxu2 %v4284_v57  ;;  %v4264_v57 = vor.u32 %v5030_v53, %v4261_v27  ;;  %v1444_v53 = vrot.slane %v5751_v20, 1  ;;  %v1447_v27 = vrot.slane %v5753_v21, 1 }
 0x179   :  { %v6392_v63 = vsel %vm304_vm3, %v1446_v59, %v1447_v27 }
 0x17a   :  { %v896_v14 = vpop.f32.mrf.mxu0  ;;  %v924_v15 = vpop.f32.mrf.mxu1 }
 0x17b   :  { %v6175_v16 = vadd.f32 %v924_v15, %v896_v14  ;;  %1687 = vmatpush.bf16.msra.mxu2 %v4272_v9  ;;  %v4288_v14 = vor.u32 %v5036_v51, %v4285_v52  ;;  %v4381_v15 = vld [vmem:[%s7348_s6 + $0xfc] sm:$0xf0]  ;;  %v4340_v9 = vor.u32 %v5050_v6, %v4339_v5  ;;  %v5038_v5 = vld [vmem:[%s7348_s6 + $0x40] sm:$0xf0] }
 0x17c   :  { %1279 = vmatmul.bf16.vlgmr.msrb.gmra.mxu2 %v5715_v24  ;;  %4249 = vmatmul.msk.bf16.vlgmr.msrb.gmra.mxu3 %vm818_vm4, %v5717_v58  ;;  %v4384_v18 = vor.u32 %v5060_v47, %v4381_v15  ;;  %v4327_v15 = vld [vmem:[%s7348_s6 + $0x80] sm:$0xf] }
 0x17d   :  { %1335 = vmatmul.bf16.vlgmr.msra.gmra.mxu0 %v5715_v24  ;;  %4253 = vmatmul.msk.bf16.vlgmr.msra.gmra.mxu1 %vm818_vm4, %v5717_v58  ;;  %v5041_v58 = vld [vmem:[%s7348_s6 + $0x58] sm:$0xf0] }
 0x17e   :  { %1742 = vmatpush.bf16.msrb.mxu0 %v4288_v14  ;;  %1770 = vmatpush.bf16.msrb.mxu1 %v4384_v18  ;;  %v5065_v14 = vld [vmem:[%s7348_s6 + $0x118] sm:$0xf0]  ;;  %v5047_v18 = vld [vmem:[%s7348_s6 + $0x88] sm:$0xf0] }
 0x17f   :  { %v840_v30 = vpop.f32.mrf.mxu2  ;;  %v868_v38 = vpop.f32.mrf.mxu3  ;;  %1688 = vmatpush.bf16.msra.mxu2 %v4260_v31  ;;  %v4400_v17 = vor.u32 %v5065_v14, %v4399_v12  ;;  %v4328_v29 = vor.u32 %v5047_v18, %v4327_v15 }
 0x180   :  { %v6201_v35 = vadd.f32 %v868_v38, %v840_v30  ;;  %v5033_v30 = vld [vmem:[%s7348_s6 + $0x1c] sm:$0xf] }
 0x182   :  { %v898_v50 = vpop.f32.mrf.mxu0  ;;  %v926_v37 = vpop.f32.mrf.mxu1 }
 0x183   :  { %v6203_v39 = vadd.f32 %v926_v37, %v898_v50  ;;  %v4369_v50 = vld [vmem:[%s7348_s6 + $0xe4] sm:$0xf0]  ;;  %v4276_v37 = vor.u32 %v5033_v30, %v4273_v34  ;;  %1793 = vmatpush.bf16.msrb.mxu2 %v4352_v40 }
 0x184   :  { %v4372_v44 = vor.u32 %v5057_v42, %v4369_v50  ;;  %v4315_v34 = vld [vmem:[%s7348_s6 + $0x68] sm:$0xf]  ;;  %v5044_v42 = vld [vmem:[%s7348_s6 + $0x70] sm:$0xf0]  ;;  %v4387_v50 = vld [vmem:[%s7348_s6 + $0xf8] sm:$0xf] }
 0x185   :  { %1743 = vmatpush.bf16.msrb.mxu0 %v4276_v37  ;;  %v4316_v37 = vor.u32 %v5044_v42, %v4315_v34  ;;  %v5056_v34 = vld [vmem:[%s7348_s6 + $0xd0] sm:$0xf0] }
 0x186   :  { %1771 = vmatpush.bf16.msrb.mxu1 %v4372_v44  ;;  %v5062_v44 = vld [vmem:[%s7348_s6 + $0x100] sm:$0xf0] }
 0x187   :  { %v842_v0 = vpop.f32.mrf.mxu2  ;;  %v870_v3 = vpop.f32.mrf.mxu3  ;;  %1794 = vmatpush.bf16.msrb.mxu2 %v4340_v9  ;;  %v4388_v32 = vor.u32 %v5062_v44, %v4387_v50  ;;  %v4267_v44 = vld [vmem:[%s7348_s6 + $0x8] sm:$0xf] }
 0x188   :  { %v6232_v62 = vadd.f32 %v870_v3, %v842_v0 }
 0x189   :  { %1744 = vmatpush.bf16.msrb.mxu0 %v4264_v57  ;;  %v1443_v57 = vrot.slane %v5715_v24, 1  ;;  %v4303_v24 = vld [vmem:[%s7348_s6 + $0x50] sm:$0xf] }
 0x18a   :  { %v901_v7 = vpop.f32.mrf.mxu0  ;;  %v929_v19 = vpop.f32.mrf.mxu1  ;;  %1772 = vmatpush.bf16.msrb.mxu1 %v4360_v60 }
 0x18b   :  { %v6237_v41 = vadd.f32 %v929_v19, %v901_v7  ;;  %v5068_v7 = vld [vmem:[%s7348_s6 + $0x130] sm:$0xf0]  ;;  %1795 = vmatpush.bf16.msrb.mxu2 %v4328_v29  ;;  %v6389_v61 = vsel %vm304_vm3, %v1443_v57, %v1444_v53  ;;  %v6473_v57 = vrot.slane %v5885_v33, 1 }
 0x18c   :  { %1284 = vmatmul.bf16.gmra.mxu2 %v5751_v20  ;;  %4250 = vmatmul.msk.bf16.gmra.mxu3 %vm818_vm4, %v5753_v21  ;;  %v4412_v8 = vor.u32 %v5068_v7, %v4411_v1 }
 0x18d   :  { %1340 = vmatmul.bf16.gmra.mxu0 %v5751_v20  ;;  %4254 = vmatmul.msk.bf16.gmra.mxu1 %vm818_vm4, %v5753_v21  ;;  %v4304_v21 = vor.u32 %v5041_v58, %v4303_v24 }
 0x18e   :  { %1824 = vmatpush.bf16.msrb.mxu3 %v4412_v8  ;;  %v5059_v8 = vld [vmem:[%s7348_s6 + $0xe8] sm:$0xf0] }
 0x18f   :  { %v845_v10 = vpop.f32.mrf.mxu2  ;;  %v873_v46 = vpop.f32.mrf.mxu3  ;;  %1796 = vmatpush.bf16.msrb.mxu2 %v4316_v37 }
 0x190   :  { %v6272_v43 = vadd.f32 %v873_v46, %v845_v10 }
 0x192   :  { %v903_v23 = vpop.f32.mrf.mxu0  ;;  %v931_v25 = vpop.f32.mrf.mxu1  ;;  %1825 = vmatpush.bf16.msrb.mxu3 %v4400_v17 }
 0x193   :  { %v6292_v38 = vadd.f32 %v931_v25, %v903_v23  ;;  %1797 = vmatpush.bf16.msrb.mxu2 %v4304_v21 }
 0x196   :  { %1826 = vmatpush.bf16.msrb.mxu3 %v4388_v32  ;;  %v6470_v32 = vrot.slane %v5883_v28, 1 }
 0x197   :  { %v847_v48 = vpop.f32.mrf.mxu2  ;;  %v875_v49 = vpop.f32.mrf.mxu3 }
 0x198   :  { %v6312_v56 = vadd.f32 %v875_v49, %v847_v48 }
 0x19a   :  { %v906_v0 = vpop.f32.mrf.mxu0  ;;  %v934_v3 = vpop.f32.mrf.mxu1 }
 0x19b   :  { %v6317_v26 = vadd.f32 %v934_v3, %v906_v0 }
 0x19c   :  { %1289 = vmatmul.bf16.gmra.mxu2 %v5825_v45  ;;  %4251 = vmatmul.msk.bf16.gmra.mxu3 %vm818_vm4, %v5827_v55 }
 0x19d   :  { %1345 = vmatmul.bf16.gmra.mxu0 %v5825_v45  ;;  %4255 = vmatmul.msk.bf16.gmra.mxu1 %vm818_vm4, %v5827_v55 }
 0x19f   :  { %v850_v19 = vpop.f32.mrf.mxu2  ;;  %v878_v22 = vpop.f32.mrf.mxu3 }
 0x1a0   :  { %v6337_v11 = vadd.f32 %v878_v22, %v850_v19  ;;  %v4375_v22 = vld [vmem:[%s7348_s6 + $0xe0] sm:$0xf] }
 0x1a2   :  { %v908_v13 = vpop.f32.mrf.mxu0  ;;  %v936_v2 = vpop.f32.mrf.mxu1 }
 0x1a3   :  { %v6339_v4 = vadd.f32 %v936_v2, %v908_v13  ;;  %v4291_v13 = vld [vmem:[%s7348_s6 + $0x38] sm:$0xf]  ;;  %v4376_v2 = vor.u32 %v5059_v8, %v4375_v22 }
 0x1a5   :  { %1827 = vmatpush.bf16.msrb.mxu3 %v4376_v2 }
 0x1a7   :  { %v852_v10 = vpop.f32.mrf.mxu2  ;;  %v880_v46 = vpop.f32.mrf.mxu3 }
 0x1a8   :  { %v6347_v51 = vadd.f32 %v880_v46, %v852_v10  ;;  %v1449_v10 = vrot.slane %v5825_v45, 1  ;;  %v1451_v46 = vrot.slane %v5827_v55, 1  ;;  %v4279_v55 = vld [vmem:[%s7348_s6 + $0x20] sm:$0xf] }
 0x1aa   :  { %v911_v52 = vpop.f32.mrf.mxu0  ;;  %v939_v47 = vpop.f32.mrf.mxu1  ;;  %v6432_v17 = vsel %vm304_vm3, %v1444_v53, %v1449_v10  ;;  %v6435_v18 = vsel %vm304_vm3, %v1447_v27, %v1451_v46  ;;  %v1454_v24 = vsel %vm304_vm3, %v1449_v10, %v6470_v32  ;;  %v1456_v58 = vsel %vm304_vm3, %v1451_v46, %v6473_v57 }
 0x1ab   :  { %v6349_v54 = vadd.f32 %v939_v47, %v911_v52  ;;  %v4292_v52 = vor.u32 %v5038_v5, %v4291_v13 }
 0x1ac   :  { %1294 = vmatmul.bf16.gmra.mxu2 %v5883_v28  ;;  %4252 = vmatmul.msk.bf16.gmra.mxu3 %vm818_vm4, %v5885_v33 }
 0x1ad   :  { %1350 = vmatmul.bf16.gmra.mxu0 %v5883_v28  ;;  %4256 = vmatmul.msk.bf16.gmra.mxu1 %vm818_vm4, %v5885_v33 }
 0x1ae   :  { %1798 = vmatpush.bf16.msrb.mxu2 %v4292_v52 }
 0x1af   :  { %v855_v23 = vpop.f32.mrf.mxu2  ;;  %v883_v25 = vpop.f32.mrf.mxu3 }
 0x1b0   :  { %v6369_v36 = vadd.f32 %v883_v25, %v855_v23 }
 0x1b2   :  { %v913_v30 = vpop.f32.mrf.mxu0  ;;  %v941_v31 = vpop.f32.mrf.mxu1 }
 0x1b3   :  { %v4363_v31 = vld [vmem:[%s7348_s6 + $0xc8] sm:$0xf] }
 0x1b4   :  { %v4364_v42 = vor.u32 %v5056_v34, %v4363_v31 }
 0x1b6   :  { %1828 = vmatpush.bf16.msrb.mxu3 %v4364_v42 }
 0x1b7   :  { %v857_v48 = vpop.f32.mrf.mxu2  ;;  %v885_v49 = vpop.f32.mrf.mxu3 }
 0x1b8   :  { %v5032_v48 = vld [vmem:[%s7348_s6 + $0x10] sm:$0xf0] }
 0x1b9   :  { %v4268_v49 = vor.u32 %v5032_v48, %v4267_v44 }
 0x1ba   :  { %v1224_v0 = vpop.f32.mrf.mxu0  ;;  %v1252_v3 = vpop.f32.mrf.mxu1 }
 0x1bb   :  { %v1225_v60 = vadd.f32 %v1224_v0, %v6201_v35 }
 0x1bc   :  { %1689 = vmatmul.bf16.vlgmr.msra.gmra.mxu2 %v6389_v61  ;;  %4413 = vmatmul.msk.bf16.vlgmr.msra.gmra.mxu3 %vm818_vm4, %v6392_v63 }
 0x1bd   :  { %v6397_v20 = vadd.f32 %v1252_v3, %v1225_v60  ;;  %1745 = vmatmul.bf16.vlgmr.msrb.gmra.mxu0 %v6389_v61  ;;  %4417 = vmatmul.msk.bf16.vlgmr.msrb.gmra.mxu1 %vm818_vm4, %v6392_v63 }
 0x1bf   :  { %v952_v35 = vpop.f32.mrf.mxu2  ;;  %v980_v1 = vpop.f32.mrf.mxu3 }
 0x1c0   :  { %v6408_v40 = vadd.f32 %v980_v1, %v952_v35 }
 0x1c2   :  { %v6410_v7 = vpop.f32.mrf.mxu0  ;;  %v6412_v19 = vpop.f32.mrf.mxu1 }
 0x1c7   :  { %v954_v6 = vpop.f32.mrf.mxu2  ;;  %v982_v9 = vpop.f32.mrf.mxu3 }
 0x1c8   :  { %v6428_v47 = vadd.f32 %v982_v9, %v954_v6 }
 0x1ca   :  { %v1229_v12 = vpop.f32.mrf.mxu0  ;;  %v1257_v14 = vpop.f32.mrf.mxu1 }
 0x1cb   :  { %v1230_v15 = vadd.f32 %v1229_v12, %v6272_v43  ;;  %v5035_v43 = vld [vmem:[%s7348_s6 + $0x28] sm:$0xf0]  ;;  %s5257_s6 = smov 112  }
 0x1cc   :  { %1694 = vmatmul.bf16.gmra.mxu2 %v6432_v17  ;;  %4414 = vmatmul.msk.bf16.gmra.mxu3 %vm818_vm4, %v6435_v18  ;;  %v4280_v23 = vor.u32 %v5035_v43, %v4279_v55 }
 0x1cd   :  { %v6440_v45 = vadd.f32 %v1257_v14, %v1230_v15  ;;  %1750 = vmatmul.bf16.gmra.mxu0 %v6432_v17  ;;  %4418 = vmatmul.msk.bf16.gmra.mxu1 %vm818_vm4, %v6435_v18 }
 0x1ce   :  { %1799 = vmatpush.bf16.msrb.mxu2 %v4280_v23 }
 0x1cf   :  { %v957_v25 = vpop.f32.mrf.mxu2  ;;  %v985_v29 = vpop.f32.mrf.mxu3 }
 0x1d0   :  { %v6451_v30 = vadd.f32 %v985_v29, %v957_v25 }
 0x1d2   :  { %v6459_v50 = vpop.f32.mrf.mxu0  ;;  %v6461_v37 = vpop.f32.mrf.mxu1  ;;  %1800 = vmatpush.bf16.msrb.mxu2 %v4268_v49 }
 0x1d7   :  { %v959_v53 = vpop.f32.mrf.mxu2  ;;  %v987_v27 = vpop.f32.mrf.mxu3 }
 0x1d8   :  { %v6475_v59 = vadd.f32 %v987_v27, %v959_v53 }
 0x1da   :  { %v1234_v0 = vpop.f32.mrf.mxu0  ;;  %v1262_v3 = vpop.f32.mrf.mxu1 }
 0x1db   :  { %v1235_v60 = vadd.f32 %v1234_v0, %v6337_v11 }
 0x1dc   :  { %1699 = vmatmul.bf16.gmra.mxu2 %v1454_v24  ;;  %4415 = vmatmul.msk.bf16.gmra.mxu3 %vm818_vm4, %v1456_v58 }
 0x1dd   :  { %v6483_v28 = vadd.f32 %v1262_v3, %v1235_v60  ;;  %1755 = vmatmul.bf16.gmra.mxu0 %v1454_v24  ;;  %4419 = vmatmul.msk.bf16.gmra.mxu1 %vm818_vm4, %v1456_v58 }
 0x1df   :  { %v962_v33 = vpop.f32.mrf.mxu2  ;;  %v990_v21 = vpop.f32.mrf.mxu3 }
 0x1e0   :  { %v991_v35 = vadd.f32 %v990_v21, %v962_v33 }
 0x1e2   :  { %v6486_v1 = vpop.f32.mrf.mxu0  ;;  %v6488_v11 = vpop.f32.mrf.mxu1 }
 0x1e7   :  { %v964_v22 = vpop.f32.mrf.mxu2  ;;  %v992_v8 = vpop.f32.mrf.mxu3 }
 0x1e8   :  { %v6490_v13 = vadd.f32 %v992_v8, %v964_v22 }
 0x1ea   :  { %v1239_v2 = vpop.f32.mrf.mxu0  ;;  %v1267_v5 = vpop.f32.mrf.mxu1 }
 0x1eb   :  { %v1240_v6 = vadd.f32 %v1239_v2, %v6369_v36 }
 0x1ec   :  { %1704 = vmatmul.bf16.gmra.mxu2 %v6470_v32  ;;  %4416 = vmatmul.msk.bf16.gmra.mxu3 %vm818_vm4, %v6473_v57 }
 0x1ed   :  { %v6496_v9 = vadd.f32 %v1267_v5, %v1240_v6  ;;  %1760 = vmatmul.bf16.gmra.mxu0 %v6470_v32  ;;  %4420 = vmatmul.msk.bf16.gmra.mxu1 %vm818_vm4, %v6473_v57 }
 0x1ef   :  { %v967_v10 = vpop.f32.mrf.mxu2  ;;  %v995_v46 = vpop.f32.mrf.mxu3 }
 0x1f0   :  { %v996_v52 = vadd.f32 %v995_v46, %v967_v10 }
 0x1f2   :  { %v1241_v12 = vpop.f32.mrf.mxu0  ;;  %v1269_v14 = vpop.f32.mrf.mxu1 }
 0x1f7   :  { %v969_v15 = vpop.f32.mrf.mxu2  ;;  %v997_v55 = vpop.f32.mrf.mxu3 }
 0x1fa   :  { %v1336_v36 = vpop.f32.mrf.mxu0  ;;  %v1364_v43 = vpop.f32.mrf.mxu1 }
 0x1fb   :  { %v1337_v23 = vadd.f32 %v1336_v36, %v6408_v40 }
 0x1fc   :  { %1801 = vmatmul.bf16.vlgmr.msrb.gmra.mxu2 %v6389_v61  ;;  %4421 = vmatmul.msk.bf16.vlgmr.msrb.gmra.mxu3 %vm818_vm4, %v6392_v63 }
 0x1fd   :  { %v6505_v25 = vadd.f32 %v1364_v43, %v1337_v23 }
 0x1ff   :  { %v1280_v29 = vpop.f32.mrf.mxu2  ;;  %v1308_v31 = vpop.f32.mrf.mxu3 }
 0x200   :  { %v1281_v34 = vadd.f32 %v1280_v29, %v6175_v16 }
 0x202   :  { %v1309_v42 = vadd.f32 %v1308_v31, %v1281_v34  ;;  %v6508_v44 = vpop.f32.mrf.mxu0  ;;  %v6510_v48 = vpop.f32.mrf.mxu1 }
 0x207   :  { %v1282_v49 = vpop.f32.mrf.mxu2  ;;  %v1310_v53 = vpop.f32.mrf.mxu3 }
 0x20a   :  { %v1341_v27 = vpop.f32.mrf.mxu0  ;;  %v1369_v40 = vpop.f32.mrf.mxu1 }
 0x20b   :  { %v1342_v61 = vadd.f32 %v1341_v27, %v6451_v30 }
 0x20c   :  { %1806 = vmatmul.bf16.gmra.mxu2 %v6432_v17  ;;  %4422 = vmatmul.msk.bf16.gmra.mxu3 %vm818_vm4, %v6435_v18 }
 0x20d   :  { %v6516_v63 = vadd.f32 %v1369_v40, %v1342_v61 }
 0x20f   :  { %v1285_v0 = vpop.f32.mrf.mxu2  ;;  %v1313_v16 = vpop.f32.mrf.mxu3 }
 0x210   :  { %v1286_v3 = vadd.f32 %v1285_v0, %v6237_v41 }
 0x212   :  { %v6519_v60 = vadd.f32 %v1313_v16, %v1286_v3  ;;  %v6521_v33 = vpop.f32.mrf.mxu0  ;;  %v6523_v21 = vpop.f32.mrf.mxu1 }
 0x217   :  { %v6525_v22 = vpop.f32.mrf.mxu2  ;;  %v6527_v30 = vpop.f32.mrf.mxu3 }
 0x21a   :  { %v1346_v17 = vpop.f32.mrf.mxu0  ;;  %v1374_v8 = vpop.f32.mrf.mxu1 }
 0x21b   :  { %v1347_v2 = vadd.f32 %v1346_v17, %v991_v35 }
 0x21c   :  { %1811 = vmatmul.bf16.gmra.mxu2 %v1454_v24  ;;  %4423 = vmatmul.msk.bf16.gmra.mxu3 %vm818_vm4, %v1456_v58 }
 0x21d   :  { %v6530_v18 = vadd.f32 %v1374_v8, %v1347_v2 }
 0x21f   :  { %v1290_v5 = vpop.f32.mrf.mxu2  ;;  %v1318_v41 = vpop.f32.mrf.mxu3 }
 0x220   :  { %v1291_v6 = vadd.f32 %v1290_v5, %v6317_v26 }
 0x222   :  { %v6533_v10 = vadd.f32 %v1318_v41, %v1291_v6  ;;  %v6535_v46 = vpop.f32.mrf.mxu0  ;;  %v6537_v12 = vpop.f32.mrf.mxu1  ;;  %v1227_v41 = vadd.f32 %v6410_v7, %v6232_v62 }
 0x227   :  { %v6539_v14 = vpop.f32.mrf.mxu2  ;;  %v6541_v15 = vpop.f32.mrf.mxu3 }
 0x22a   :  { %v1351_v35 = vpop.f32.mrf.mxu0  ;;  %v1379_v24 = vpop.f32.mrf.mxu1 }
 0x22b   :  { %v1352_v55 = vadd.f32 %v1351_v35, %v996_v52 }
 0x22c   :  { %1816 = vmatmul.bf16.gmra.mxu2 %v6470_v32  ;;  %4424 = vmatmul.msk.bf16.gmra.mxu3 %vm818_vm4, %v6473_v57  ;;  %v1283_v32 = vadd.f32 %v1282_v49, %v6203_v39 }
 0x22d   :  { %v6546_v58 = vadd.f32 %v1379_v24, %v1352_v55 }
 0x22f   :  { %v1295_v26 = vpop.f32.mrf.mxu2  ;;  %v1323_v36 = vpop.f32.mrf.mxu3 }
 0x230   :  { %v1296_v43 = vadd.f32 %v1295_v26, %v6349_v54  ;;  %v1311_v54 = vadd.f32 %v1310_v53, %v1283_v32 }
 0x232   :  { %v6549_v23 = vadd.f32 %v1323_v36, %v1296_v43  ;;  %v1353_v29 = vpop.f32.mrf.mxu0  ;;  %v1381_v31 = vpop.f32.mrf.mxu1 }
 0x237   :  { %v1297_v34 = vpop.f32.mrf.mxu2  ;;  %v1325_v27 = vpop.f32.mrf.mxu3 }
 0x23a   :  { %v1746_v40 = vpop.f32.mrf.mxu0  ;;  %v1774_v61 = vpop.f32.mrf.mxu1 }
 0x23b   :  { %v1775_v52 = vadd.f32 %v1774_v61, %v1746_v40 }
 0x23d   :  { %v1850_v0 = vadd.f32 %v1775_v52, %v1309_v42  ;;  %v1255_v42 = vadd.f32 %v6412_v19, %v1227_v41  ;;  %v1288_v19 = vadd.f32 %v6525_v22, %v6292_v38  ;;  %v1232_v38 = vadd.f32 %v6459_v50, %v6312_v56 }
 0x23f   :  { %v1690_v16 = vpop.f32.mrf.mxu2  ;;  %v1718_v57 = vpop.f32.mrf.mxu3  ;;  %v1871_v6 = vmax.f32 %v1850_v0, 0.0 }
 0x240   :  { %v1719_v3 = vadd.f32 %v1718_v57, %v1690_v16 }
 0x241   :  { %v1916_v49 = vrot.slane %v1871_v6, 1 }
 0x242   :  { %v1849_v17 = vadd.f32 %v1719_v3, %v6397_v20  ;;  %v1748_v8 = vpop.f32.mrf.mxu0  ;;  %v1776_v2 = vpop.f32.mrf.mxu1 }
 0x243   :  { %v1777_v5 = vadd.f32 %v1776_v2, %v1748_v8 }
 0x244   :  { %v1870_v43 = vmax.f32 %v1849_v17, 0.0 }
 0x245   :  { %v1853_v35 = vadd.f32 %v1777_v5, %v1311_v54 }
 0x246   :  { %v1913_v7 = vrot.slane %v1870_v43, 1 }
 0x247   :  { %v1874_v24 = vmax.f32 %v1853_v35, 0.0  ;;  %v1692_v55 = vpop.f32.mrf.mxu2  ;;  %v1720_v26 = vpop.f32.mrf.mxu3 }
 0x248   :  { %v1721_v39 = vadd.f32 %v1720_v26, %v1692_v55 }
 0x249   :  { %v1917_v36 = vrot.slane %v1874_v24, 1 }
 0x24a   :  { %v1852_v29 = vadd.f32 %v1721_v39, %v1255_v42  ;;  %v1751_v20 = vpop.f32.mrf.mxu0  ;;  %v1779_v31 = vpop.f32.mrf.mxu1 }
 0x24b   :  { %v1780_v34 = vadd.f32 %v1779_v31, %v1751_v20  ;;  %v1918_v53 = vsel %vm304_vm3, %v1916_v49, %v1917_v36 }
 0x24c   :  { %v1873_v27 = vmax.f32 %v1852_v29, 0.0  ;;  %v6557_v40 = vmax.f32 %v1871_v6, %v1918_v53 }
 0x24d   :  { %v1856_v62 = vadd.f32 %v1780_v34, %v6519_v60  ;;  %v1316_v60 = vadd.f32 %v6527_v30, %v1288_v19 }
 0x24e   :  { %v1914_v61 = vrot.slane %v1873_v27, 1 }
 0x24f   :  { %v1877_v52 = vmax.f32 %v1856_v62, 0.0  ;;  %v1695_v0 = vpop.f32.mrf.mxu2  ;;  %v1723_v32 = vpop.f32.mrf.mxu3 }
 0x250   :  { %v1724_v16 = vadd.f32 %v1723_v32, %v1695_v0  ;;  %v1915_v57 = vsel %vm304_vm3, %v1913_v7, %v1914_v61 }
 0x251   :  { %v1924_v3 = vrot.slane %v1877_v52, 1  ;;  %v6563_v17 = vmax.f32 %v1870_v43, %v1915_v57 }
 0x252   :  { %v1855_v8 = vadd.f32 %v1724_v16, %v6440_v45  ;;  %v1753_v2 = vpop.f32.mrf.mxu0  ;;  %v1781_v54 = vpop.f32.mrf.mxu1  ;;  %v1260_v45 = vadd.f32 %v6461_v37, %v1232_v38 }
 0x253   :  { %v1782_v5 = vadd.f32 %v1781_v54, %v1753_v2  ;;  %v1925_v41 = vsel %vm304_vm3, %v1917_v36, %v1924_v3 }
 0x254   :  { %v1876_v22 = vmax.f32 %v1855_v8, 0.0  ;;  %v6570_v6 = vmax.f32 %v1874_v24, %v1925_v41 }
 0x255   :  { %v1859_v35 = vadd.f32 %v1782_v5, %v1316_v60 }
 0x256   :  { %v1922_v55 = vrot.slane %v1876_v22, 1 }
 0x257   :  { %v1880_v26 = vmax.f32 %v1859_v35, 0.0  ;;  %v1697_v42 = vpop.f32.mrf.mxu2  ;;  %v1725_v39 = vpop.f32.mrf.mxu3 }
 0x258   :  { %v1726_v49 = vadd.f32 %v1725_v39, %v1697_v42  ;;  %v1923_v43 = vsel %vm304_vm3, %v1914_v61, %v1922_v55 }
 0x259   :  { %v1930_v30 = vrot.slane %v1880_v26, 1  ;;  %v6574_v29 = vmax.f32 %v1873_v27, %v1923_v43  ;;  %v1293_v27 = vadd.f32 %v6539_v14, %v6339_v4  ;;  %v1237_v14 = vadd.f32 %v6486_v1, %v6347_v51 }
 0x25a   :  { %v1858_v36 = vadd.f32 %v1726_v49, %v1260_v45  ;;  %v1756_v20 = vpop.f32.mrf.mxu0  ;;  %v1784_v31 = vpop.f32.mrf.mxu1 }
 0x25b   :  { %v1785_v56 = vadd.f32 %v1784_v31, %v1756_v20  ;;  %v5201_v50 = vpack.i.bf16 %v6570_v6, %v6574_v29  ;;  %v1931_v24 = vsel %vm304_vm3, %v1924_v3, %v1930_v30  ;;  %v1321_v8 = vadd.f32 %v6541_v15, %v1293_v27 }
 0x25c   :  { %v1879_v34 = vmax.f32 %v1858_v36, 0.0  ;;  %v6579_v53 = vmax.f32 %v1877_v52, %v1931_v24  ;;  %v1265_v15 = vadd.f32 %v6488_v11, %v1237_v14 }
 0x25d   :  { %v1862_v37 = vadd.f32 %v1785_v56, %v6533_v10  ;;  %5202 = vrot.lane.b32.xlu1 %v5201_v50, %s5257_s6 }
 0x25e   :  { %v1928_v62 = vrot.slane %v1879_v34, 1 }
 0x25f   :  { %v1883_v7 = vmax.f32 %v1862_v37, 0.0  ;;  %v1700_v61 = vpop.f32.mrf.mxu2  ;;  %v1728_v19 = vpop.f32.mrf.mxu3 }
 0x260   :  { %v1729_v0 = vadd.f32 %v1728_v19, %v1700_v61  ;;  %v1929_v32 = vsel %vm304_vm3, %v1922_v55, %v1928_v62 }
 0x261   :  { %v1936_v16 = vrot.slane %v1883_v7, 1  ;;  %v6586_v57 = vmax.f32 %v1876_v22, %v1929_v32 }
 0x262   :  { %v1861_v52 = vadd.f32 %v1729_v0, %v6483_v28  ;;  %v1758_v3 = vpop.f32.mrf.mxu0  ;;  %v1786_v10 = vpop.f32.mrf.mxu1 }
 0x263   :  { %v1787_v2 = vadd.f32 %v1786_v10, %v1758_v3  ;;  %v5211_v54 = vpack.i.bf16 %v6579_v53, %v6586_v57  ;;  %v1937_v4 = vsel %vm304_vm3, %v1930_v30, %v1936_v16 }
 0x264   :  { %v1882_v60 = vmax.f32 %v1861_v52, 0.0  ;;  %v6595_v5 = vmax.f32 %v1880_v26, %v1937_v4 }
 0x265   :  { %v1865_v41 = vadd.f32 %v1787_v2, %v1321_v8  ;;  %5212 = vrot.lane.b32.xlu2 %v5211_v54, %s5257_s6 }
 0x266   :  { %v1934_v28 = vrot.slane %v1882_v60, 1 }
 0x267   :  { %v1886_v38 = vmax.f32 %v1865_v41, 0.0  ;;  %v1702_v22 = vpop.f32.mrf.mxu2  ;;  %v1730_v35 = vpop.f32.mrf.mxu3  ;;  %v1339_v41 = vadd.f32 %v6508_v44, %v6428_v47 }
 0x268   :  { %v1731_v55 = vadd.f32 %v1730_v35, %v1702_v22  ;;  %v1935_v42 = vsel %vm304_vm3, %v1928_v62, %v1934_v28 }
 0x269   :  { %v1942_v39 = vrot.slane %v1886_v38, 1  ;;  %v6600_v45 = vmax.f32 %v1879_v34, %v1935_v42  ;;  %v1367_v35 = vadd.f32 %v6510_v48, %v1339_v41 }
 0x26a   :  { %v1864_v49 = vadd.f32 %v1731_v55, %v1265_v15  ;;  %v1761_v51 = vpop.f32.mrf.mxu0  ;;  %v1789_v1 = vpop.f32.mrf.mxu1 }
 0x26b   :  { %v1790_v26 = vadd.f32 %v1789_v1, %v1761_v51  ;;  %v5216_v43 = vpack.i.bf16 %v6595_v5, %v6600_v45  ;;  %v1943_v30 = vsel %vm304_vm3, %v1936_v16, %v1942_v39 }
 0x26c   :  { %v1885_v36 = vmax.f32 %v1864_v49, 0.0  ;;  %v6605_v20 = vmax.f32 %v1883_v7, %v1943_v30 }
 0x26d   :  { %v1868_v11 = vadd.f32 %v1790_v26, %v6549_v23  ;;  %5217 = vrot.lane.b32.xlu2 %v5216_v43, %s5257_s6 }
 0x26e   :  { %v1940_v31 = vrot.slane %v1885_v36, 1 }
 0x26f   :  { %v1889_v56 = vmax.f32 %v1868_v11, 0.0  ;;  %v1705_v50 = vpop.f32.mrf.mxu2  ;;  %v1733_v24 = vpop.f32.mrf.mxu3 }
 0x270   :  { %v1734_v34 = vadd.f32 %v1733_v24, %v1705_v50  ;;  %v1941_v37 = vsel %vm304_vm3, %v1934_v28, %v1940_v31 }
 0x271   :  { %v1948_v62 = vrot.slane %v1889_v56, 1  ;;  %v6610_v27 = vmax.f32 %v1882_v60, %v1941_v37 }
 0x272   :  { %v1867_v61 = vadd.f32 %v1734_v34, %v6496_v9  ;;  %v1763_v19 = vpop.f32.mrf.mxu0  ;;  %v1791_v0 = vpop.f32.mrf.mxu1 }
 0x273   :  { %v1949_v7 = vsel %vm304_vm3, %v1942_v39, %v1948_v62  ;;  %v6614_v32 = vmax.f32 %v1889_v56, %v1948_v62 }
 0x274   :  { %v1888_v23 = vmax.f32 %v1867_v61, 0.0  ;;  %v6616_v16 = vmax.f32 %v1886_v38, %v1949_v7 }
 0x276   :  { %v1946_v52 = vrot.slane %v1888_v23, 1 }
 0x277   :  { %v1707_v3 = vpop.f32.mrf.mxu2  ;;  %v1735_v10 = vpop.f32.mrf.mxu3 }
 0x278   :  { %v6618_v8 = vmax.f32 %v1888_v23, %v1946_v52  ;;  %v1947_v2 = vsel %vm304_vm3, %v1940_v31, %v1946_v52  ;;  %v5196_v23 = vpack.i.bf16 %v6557_v40, %v6563_v17  ;;  %v1349_v52 = vadd.f32 %v6535_v46, %v6490_v13 }
 0x279   :  { %v6621_v54 = vmax.f32 %v1885_v36, %v1947_v2 }
 0x27b   :  { %v5231_v9 = vpack.i.bf16 %v6616_v16, %v6621_v54 }
 0x27d   :  { %5232 = vrot.lane.b32.xlu2 %v5231_v9, %s5257_s6 }
 0x27f   :  { %v1802_v4 = vpop.f32.mrf.mxu2  ;;  %v1830_v14 = vpop.f32.mrf.mxu3 }
 0x280   :  { %v1831_v60 = vadd.f32 %v1830_v14, %v1802_v4  ;;  %v1377_v4 = vadd.f32 %v6537_v12, %v1349_v52  ;;  %v5070_v52 = vld [vmem:[%s7349_s7 + $0x8] sm:$0xff] }
 0x282   :  { %v1851_v28 = vadd.f32 %v1831_v60, %v6505_v25  ;;  %v1344_v25 = vadd.f32 %v6521_v33, %v6475_v59 }
 0x284   :  { %v1872_v55 = vmax.f32 %v1851_v28, 0.0  ;;  %v1372_v56 = vadd.f32 %v6523_v21, %v1344_v25 }
 0x286   :  { %v1919_v49 = vrot.slane %v1872_v55, 1 }
 0x287   :  { %v1804_v38 = vpop.f32.mrf.mxu2  ;;  %v1832_v22 = vpop.f32.mrf.mxu3 }
 0x288   :  { %v1833_v15 = vadd.f32 %v1832_v22, %v1804_v38 }
 0x28a   :  { %v1854_v42 = vadd.f32 %v1833_v15, %v1367_v35 }
 0x28c   :  { %v1875_v39 = vmax.f32 %v1854_v42, 0.0  ;;  %v5226_v42 = vpack.i.bf16 %v6605_v20, %v6610_v27 }
 0x28e   :  { %v1920_v51 = vrot.slane %v1875_v39, 1 }
 0x28f   :  { %v1807_v1 = vpop.f32.mrf.mxu2  ;;  %v1835_v26 = vpop.f32.mrf.mxu3 }
 0x290   :  { %v1836_v43 = vadd.f32 %v1835_v26, %v1807_v1  ;;  %v1921_v30 = vsel %vm304_vm3, %v1919_v49, %v1920_v51 }
 0x291   :  { %v6631_v36 = vmax.f32 %v1872_v55, %v1921_v30  ;;  %v5091_v30 = vld [vmem:[%s7349_s7 + $0xb0] sm:$0xff] }
 0x292   :  { %v1857_v47 = vadd.f32 %v1836_v43, %v6516_v63  ;;  %2379 = vmatpush.bf16.msra.mxu2 %v5091_v30 }
 0x294   :  { %v1878_v44 = vmax.f32 %v1857_v47, 0.0  ;;  %v5084_v47 = vld [vmem:[%s7349_s7 + $0x78] sm:$0xff] }
 0x295   :  { %2350 = vmatpush.bf16.msra.mxu1 %v5084_v47 }
 0x296   :  { %v1926_v48 = vrot.slane %v1878_v44, 1 }
 0x297   :  { %v1809_v11 = vpop.f32.mrf.mxu2  ;;  %v1837_v31 = vpop.f32.mrf.mxu3 }
 0x298   :  { %v1838_v50 = vadd.f32 %v1837_v31, %v1809_v11  ;;  %v1927_v24 = vsel %vm304_vm3, %v1920_v51, %v1926_v48  ;;  %v5083_v11 = vld [vmem:[%s7349_s7 + $0x70] sm:$0xff] }
 0x299   :  { %v6638_v34 = vmax.f32 %v1875_v39, %v1927_v24  ;;  %2351 = vmatpush.bf16.msra.mxu1 %v5083_v11  ;;  %v5082_v24 = vld [vmem:[%s7349_s7 + $0x68] sm:$0xff] }
 0x29a   :  { %v1860_v37 = vadd.f32 %v1838_v50, %v1372_v56  ;;  %v5089_v56 = vld [vmem:[%s7349_s7 + $0xa0] sm:$0xff]  ;;  %v5074_v50 = vld [vmem:[%s7349_s7 + $0x28] sm:$0xff] }
 0x29b   :  { %v5191_v62 = vpack.i.bf16 %v6638_v34, %v6631_v36 }
 0x29c   :  { %v1881_v61 = vmax.f32 %v1860_v37, 0.0 }
 0x29d   :  { %5192 = vrot.lane.b32.xlu0 %v5191_v62, %s5257_s6  ;;  %v5073_v62 = vld [vmem:[%s7349_s7 + $0x20] sm:$0xff]  ;;  %2352 = vmatpush.bf16.msra.mxu1 %v5082_v24 }
 0x29e   :  { %v1932_v63 = vrot.slane %v1881_v61, 1 }
 0x29f   :  { %v1812_v59 = vpop.f32.mrf.mxu2  ;;  %v1840_v33 = vpop.f32.mrf.mxu3 }
 0x2a0   :  { %v1841_v19 = vadd.f32 %v1840_v33, %v1812_v59  ;;  %v1933_v0 = vsel %vm304_vm3, %v1926_v48, %v1932_v63  ;;  %v5075_v48 = vld [vmem:[%s7349_s7 + $0x30] sm:$0xff]  ;;  %v5072_v59 = vld [vmem:[%s7349_s7 + $0x18] sm:$0xff] }
 0x2a1   :  { %v6644_v7 = vmax.f32 %v1878_v44, %v1933_v0  ;;  %v5090_v44 = vld [vmem:[%s7349_s7 + $0xa8] sm:$0xff]  ;;  %v5087_v33 = vld [vmem:[%s7349_s7 + $0x90] sm:$0xff] }
 0x2a2   :  { %v1863_v21 = vadd.f32 %v1841_v19, %v6530_v18  ;;  %2380 = vmatpush.bf16.msra.mxu2 %v5090_v44  ;;  %v5080_v19 = vld [vmem:[%s7349_s7 + $0x58] sm:$0xff]  ;;  %v5071_v0 = vld [vmem:[%s7349_s7 + $0x10] sm:$0xff] }
 0x2a4   :  { %v1884_v3 = vmax.f32 %v1863_v21, 0.0  ;;  %v5086_v21 = vld [vmem:[%s7349_s7 + $0x88] sm:$0xff] }
 0x2a5   :  { %5197 = vrot.lane.b32.xlu0 %v5196_v23, %s5257_s6  ;;  %v5079_v23 = vld [vmem:[%s7349_s7 + $0x50] sm:$0xff] }
 0x2a6   :  { %v1938_v10 = vrot.slane %v1884_v3, 1  ;;  %2381 = vmatpush.bf16.msra.mxu2 %v5089_v56 }
 0x2a7   :  { %v1814_v2 = vpop.f32.mrf.mxu2  ;;  %v1842_v9 = vpop.f32.mrf.mxu3 }
 0x2a8   :  { %v1843_v14 = vadd.f32 %v1842_v9, %v1814_v2  ;;  %v1939_v60 = vsel %vm304_vm3, %v1932_v63, %v1938_v10  ;;  %v5081_v63 = vld [vmem:[%s7349_s7 + $0x60] sm:$0xff] }
 0x2a9   :  { %v6654_v41 = vmax.f32 %v1881_v61, %v1939_v60  ;;  %v5088_v61 = vld [vmem:[%s7349_s7 + $0x98] sm:$0xff]  ;;  %2353 = vmatpush.bf16.msra.mxu1 %v5081_v63  ;;  %v5069_v2 = vld [vmem:[%s7349_s7] sm:$0xff] }
 0x2aa   :  { %v1866_v18 = vadd.f32 %v1843_v14, %v1377_v4  ;;  %2382 = vmatpush.bf16.msra.mxu2 %v5088_v61  ;;  %v5077_v9 = vld [vmem:[%s7349_s7 + $0x40] sm:$0xff] }
 0x2ab   :  { %v5206_v28 = vpack.i.bf16 %v6654_v41, %v6644_v7 }
 0x2ac   :  { %v1887_v38 = vmax.f32 %v1866_v18, 0.0 }
 0x2ad   :  { %5207 = vrot.lane.b32.xlu1 %v5206_v28, %s5257_s6  ;;  %2354 = vmatpush.bf16.msra.mxu1 %v5080_v19 }
 0x2ae   :  { %v1944_v13 = vrot.slane %v1887_v38, 1  ;;  %2383 = vmatpush.bf16.msra.mxu2 %v5087_v33 }
 0x2af   :  { %v1817_v46 = vpop.f32.mrf.mxu2  ;;  %v1845_v22 = vpop.f32.mrf.mxu3 }
 0x2b0   :  { %v1846_v35 = vadd.f32 %v1845_v22, %v1817_v46  ;;  %v1945_v15 = vsel %vm304_vm3, %v1938_v10, %v1944_v13  ;;  %v5085_v10 = vld [vmem:[%s7349_s7 + $0x80] sm:$0xff] }
 0x2b1   :  { %v6660_v55 = vmax.f32 %v1884_v3, %v1945_v15  ;;  %2355 = vmatpush.bf16.msra.mxu1 %v5079_v23  ;;  %v5078_v3 = vld [vmem:[%s7349_s7 + $0x48] sm:$0xff] }
 0x2b2   :  { %v1869_v12 = vadd.f32 %v1846_v35, %v6546_v58  ;;  %v5076_v58 = vld [vmem:[%s7349_s7 + $0x38] sm:$0xff]  ;;  %2384 = vmatpush.bf16.msra.mxu2 %v5086_v21 }
 0x2b3   :  { %2322 = vmatpush.bf16.msra.mxu0 %v5076_v58 }
 0x2b4   :  { %v1890_v39 = vmax.f32 %v1869_v12, 0.0 }
 0x2b5   :  { %5227 = vrot.lane.b32.xlu1 %v5226_v42, %s5257_s6  ;;  %2356 = vmatpush.bf16.msra.mxu1 %v5078_v3 }
 0x2b6   :  { %v1950_v49 = vrot.slane %v1890_v39, 1  ;;  %2385 = vmatpush.bf16.msra.mxu2 %v5085_v10  ;;  %v5113_v10 = vld [vmem:[%s7350_s9 + $0x44] sm:$0xf0] }
 0x2b7   :  { %v1819_v51 = vpop.f32.mrf.mxu2  ;;  %v1847_v1 = vpop.f32.mrf.mxu3  ;;  %2323 = vmatpush.bf16.msra.mxu0 %v5075_v48 }
 0x2b8   :  { %v1951_v26 = vsel %vm304_vm3, %v1944_v13, %v1950_v49  ;;  %v6692_v31 = vmax.f32 %v1890_v39, %v1950_v49 }
 0x2b9   :  { %v6667_v43 = vmax.f32 %v1887_v38, %v1951_v26  ;;  %2357 = vmatpush.bf16.msra.mxu1 %v5077_v9 }
 0x2ba   :  { %v5236_v37 = vpack.i.bf16 %v6618_v8, %v6692_v31 }
 0x2bb   :  { %v5221_v25 = vpack.i.bf16 %v6667_v43, %v6660_v55  ;;  %2324 = vmatpush.bf16.msra.mxu0 %v5074_v50 }
 0x2bd   :  { %2053 = vrot.lane.b32.xlu1 %v6614_v32, %s5257_s6  ;;  %5222 = vrot.lane.b32.xlu0 %v5221_v25, %s5257_s6 }
 0x2bf   :  { %2325 = vmatpush.bf16.msra.mxu0 %v5073_v62  ;;  %v5213_v35 = vpop.permute.xlu2 %5212 }
 0x2c3   :  { %2326 = vmatpush.bf16.msra.mxu0 %v5072_v59 }
 0x2c5   :  { %5237 = vrot.lane.b32.xlu0 %v5236_v37, %s5257_s6  ;;  %v5215_v37 = vunpack.i.h.bf16 %v5213_v35 }
 0x2c7   :  { %2327 = vmatpush.bf16.msra.mxu0 %v5071_v0  ;;  %v5218_v25 = vpop.permute.xlu2 %5217 }
 0x2c8   :  { %v5220_v56 = vunpack.i.h.bf16 %v5218_v25  ;;  %v5219_v50 = vunpack.i.l.bf16 %v5218_v25 }
 0x2cb   :  { %2328 = vmatpush.bf16.msra.mxu0 %v5070_v52  ;;  %v4563_v52 = vld [vmem:[%s7350_s9 + $0x50] sm:$0xf] }
 0x2cf   :  { %2329 = vmatpush.bf16.msra.mxu0 %v5069_v2  ;;  %v5203_v18 = vpop.permute.xlu1 %5202 }
 0x2d0   :  { %v5205_v13 = vunpack.i.h.bf16 %v5203_v18  ;;  %v5204_v46 = vunpack.i.l.bf16 %v5203_v18  ;;  %v5103_v18 = vld [vmem:[%s7351_s8 + $0x54] sm:$0xf0] }
 0x2d2   :  { %v2060_v12 = vsel %vm2057_vm5, %v5204_v46, %v5205_v13 }
 0x2d7   :  { %v5233_v2 = vpop.permute.xlu2 %5232 }
 0x30f   :  { %v5193_v4 = vpop.permute.xlu0 %5192 }
 0x310   :  { %v5195_v14 = vunpack.i.h.bf16 %v5193_v4  ;;  %v5194_v60 = vunpack.i.l.bf16 %v5193_v4 }
 0x312   :  { %v2098_v28 = vmax.f32 %v6638_v34, %v5195_v14  ;;  %v2095_v38 = vmax.f32 %v6631_v36, %v5194_v60  ;;  %v2061_v42 = vsel %vm2057_vm5, %v5205_v13, %v5195_v14  ;;  %v2096_v36 = vmax.f32 %v6574_v29, %v2060_v12  ;;  %v4547_v14 = vld [vmem:[%s7350_s9 + $0x30] sm:$0xf] }
 0x313   :  { %v2097_v1 = vmax.f32 %v6570_v6, %v2061_v42  ;;  %v5214_v6 = vunpack.i.l.bf16 %v5213_v35  ;;  %v4609_v35 = vld [vmem:[%s7351_s8 + $0x40] sm:$0xf]  ;;  %v5100_v42 = vld [vmem:[%s7351_s8 + $0x44] sm:$0xf] }
 0x314   :  { %v2116_v22 = vpack.c.bf16 %v2098_v28, %v2095_v38  ;;  %v5102_v28 = vld [vmem:[%s7351_s8 + $0x54] sm:$0xf] }
 0x315   :  { %v2062_v63 = vsel %vm2057_vm5, %v5214_v6, %v5215_v37 }
 0x316   :  { %4517 = vmatmul.msk.bf16.vlgmr.msra.gmra.mxu2 %vm2057_vm5, %v2116_v22  ;;  %v4619_v22 = vld [vmem:[%s7351_s8 + $0x58] sm:$0xf0] }
 0x317   :  { %v5198_v15 = vpop.permute.xlu0 %5197 }
 0x318   :  { %v5200_v39 = vunpack.i.h.bf16 %v5198_v15  ;;  %v5199_v49 = vunpack.i.l.bf16 %v5198_v15  ;;  %v5101_v15 = vld [vmem:[%s7351_s8 + $0x44] sm:$0xf0] }
 0x31a   :  { %v2059_v51 = vsel %vm2057_vm5, %v5200_v39, %v5194_v60  ;;  %v2058_v34 = vsel %vm2057_vm5, %v5199_v49, %v5200_v39  ;;  %v4617_v60 = vld [vmem:[%s7351_s8 + $0x50] sm:$0xf]  ;;  %v4611_v39 = vld [vmem:[%s7351_s8 + $0x48] sm:$0xf0]  ;;  %v5235_v49 = vunpack.i.h.bf16 %v5233_v2 }
 0x31b   :  { %v2094_v26 = vmax.f32 %v6557_v40, %v2059_v51  ;;  %v2093_v30 = vmax.f32 %v6563_v17, %v2058_v34  ;;  %v2064_v40 = vsel %vm2057_vm5, %v5219_v50, %v5220_v56  ;;  %v4618_v12 = vor.u32 %v5103_v18, %v4617_v60  ;;  %v5127_v60 = vld [vmem:[%s7352_s10 + $0x54] sm:$0xf0]  ;;  %v4577_v18 = vld [vmem:[%s7351_s8] sm:$0xf] }
 0x31c   :  { %v2102_v59 = vmax.f32 %v6600_v45, %v2064_v40  ;;  %v5115_v45 = vld [vmem:[%s7350_s9 + $0x54] sm:$0xf0]  ;;  %v5234_v51 = vunpack.i.l.bf16 %v5233_v2 }
 0x31d   :  { %v2115_v58 = vpack.c.bf16 %v2097_v1, %v2094_v26  ;;  %v2114_v47 = vpack.c.bf16 %v2096_v36, %v2093_v30  ;;  %v4564_v3 = vor.u32 %v5115_v45, %v4563_v52  ;;  %2634 = vmatpush.bf16.msrb.mxu0 %v4618_v12  ;;  %v4610_v1 = vor.u32 %v5101_v15, %v4609_v35  ;;  %v5096_v52 = vld [vmem:[%s7351_s8 + $0x24] sm:$0xf]  ;;  %v4531_v15 = vld [vmem:[%s7350_s9 + $0x10] sm:$0xf] }
 0x31e   :  { %v4614_v26 = vor.u32 %v5100_v42, %v4611_v39  ;;  %v2068_v25 = vsel %vm2057_vm5, %v5234_v51, %v5235_v49  ;;  %v5125_v42 = vld [vmem:[%s7352_s10 + $0x44] sm:$0xf0]  ;;  %v5123_v51 = vld [vmem:[%s7352_s10 + $0x34] sm:$0xf0] }
 0x31f   :  { %v5208_v44 = vpop.permute.xlu1 %5207  ;;  %2330 = vmatmul.bf16.vlgmr.msra.gmra.mxu0 %v2114_v47  ;;  %2358 = vmatmul.bf16.vlgmr.msra.gmra.mxu1 %v2115_v58  ;;  %v2108_v50 = vmax.f32 %v6621_v54, %v2068_v25  ;;  %v4639_v25 = vld [vmem:[%s7352_s10 + $0x10] sm:$0xf] }
 0x320   :  { %v5210_v48 = vunpack.i.h.bf16 %v5208_v44  ;;  %v5209_v11 = vunpack.i.l.bf16 %v5208_v44  ;;  %2517 = vmatpush.bf16.msra.mxu3 %v4564_v3  ;;  %v5095_v3 = vld [vmem:[%s7351_s8 + $0x14] sm:$0xf0] }
 0x321   :  { %2635 = vmatpush.bf16.msrb.mxu0 %v4610_v1  ;;  %v5121_v1 = vld [vmem:[%s7352_s10 + $0x24] sm:$0xf0] }
 0x322   :  { %v2104_v24 = vmax.f32 %v6654_v41, %v5210_v48  ;;  %v2101_v29 = vmax.f32 %v6644_v7, %v5209_v11  ;;  %v2065_v17 = vsel %vm2057_vm5, %v5220_v56, %v5210_v48  ;;  %v2063_v61 = vsel %vm2057_vm5, %v5215_v37, %v5209_v11 }
 0x323   :  { %v2100_v33 = vmax.f32 %v6579_v53, %v2063_v61  ;;  %v2103_v41 = vmax.f32 %v6595_v5, %v2065_v17  ;;  %v2099_v7 = vmax.f32 %v6586_v57, %v2062_v63  ;;  %v4555_v53 = vld [vmem:[%s7350_s9 + $0x40] sm:$0xf] }
 0x324   :  { %v2119_v62 = vpack.c.bf16 %v2104_v24, %v2101_v29  ;;  %v4556_v46 = vor.u32 %v5113_v10, %v4555_v53  ;;  %v4595_v53 = vld [vmem:[%s7351_s8 + $0x28] sm:$0xf0]  ;;  %v5094_v10 = vld [vmem:[%s7351_s8 + $0x14] sm:$0xf] }
 0x325   :  { %v2117_v19 = vpack.c.bf16 %v2102_v59, %v2099_v7  ;;  %v2118_v0 = vpack.c.bf16 %v2103_v41, %v2100_v33  ;;  %v5099_v59 = vld [vmem:[%s7351_s8 + $0x34] sm:$0xf0]  ;;  %v5098_v33 = vld [vmem:[%s7351_s8 + $0x34] sm:$0xf]  ;;  %v5109_v7 = vld [vmem:[%s7350_s9 + $0x24] sm:$0xf0] }
 0x326   :  { %4518 = vmatmul.msk.bf16.gmra.mxu2 %vm2057_vm5, %v2119_v62  ;;  %2518 = vmatpush.bf16.msra.mxu3 %v4556_v46  ;;  %v4579_v46 = vld [vmem:[%s7351_s8 + $0x8] sm:$0xf0] }
 0x327   :  { %v5228_v21 = vpop.permute.xlu1 %5227 }
 0x328   :  { %v5230_v9 = vunpack.i.h.bf16 %v5228_v21  ;;  %v5229_v4 = vunpack.i.l.bf16 %v5228_v21  ;;  %v4593_v21 = vld [vmem:[%s7351_s8 + $0x20] sm:$0xf] }
 0x32a   :  { %v2066_v36 = vsel %vm2057_vm5, %v5229_v4, %v5230_v9 }
 0x32b   :  { %v2105_v48 = vmax.f32 %v6610_v27, %v2066_v36  ;;  %v4647_v36 = vld [vmem:[%s7352_s10 + $0x20] sm:$0xf] }
 0x32d   :  { %v2120_v29 = vpack.c.bf16 %v2108_v50, %v2105_v48  ;;  %v5119_v48 = vld [vmem:[%s7352_s10 + $0x14] sm:$0xf0]  ;;  %v5117_v50 = vld [vmem:[%s7352_s10 + $0x4] sm:$0xf0] }
 0x32f   :  { %v5223_v23 = vpop.permute.xlu0 %5222  ;;  %2335 = vmatmul.bf16.gmra.mxu0 %v2117_v19  ;;  %2363 = vmatmul.bf16.gmra.mxu1 %v2118_v0  ;;  %v2054_v17 = vpop.permute.xlu1 %2053 }
 0x330   :  { %v5225_v5 = vunpack.i.h.bf16 %v5223_v23  ;;  %v5224_v57 = vunpack.i.l.bf16 %v5223_v23  ;;  %v5097_v23 = vld [vmem:[%s7351_s8 + $0x24] sm:$0xf0] }
 0x331   :  { %v4594_v45 = vor.u32 %v5097_v23, %v4593_v21  ;;  %v5110_v21 = vld [vmem:[%s7350_s9 + $0x34] sm:$0xf]  ;;  %v4549_v23 = vld [vmem:[%s7350_s9 + $0x38] sm:$0xf0] }
 0x332   :  { %v2110_v38 = vmax.f32 %v6667_v43, %v5225_v5  ;;  %v2107_v13 = vmax.f32 %v6660_v55, %v5224_v57  ;;  %v5111_v43 = vld [vmem:[%s7350_s9 + $0x34] sm:$0xf0]  ;;  %v4622_v55 = vor.u32 %v5102_v28, %v4619_v22  ;;  %v2069_v30 = vsel %vm2057_vm5, %v5235_v49, %v5225_v5  ;;  %v4655_v49 = vld [vmem:[%s7352_s10 + $0x30] sm:$0xf] }
 0x333   :  { %v2067_v58 = vsel %vm2057_vm5, %v5230_v9, %v5224_v57  ;;  %v4548_v47 = vor.u32 %v5111_v43, %v4547_v14  ;;  %v2109_v56 = vmax.f32 %v6616_v16, %v2069_v30  ;;  %v4598_v5 = vor.u32 %v5096_v52, %v4595_v53  ;;  %v4585_v57 = vld [vmem:[%s7351_s8 + $0x10] sm:$0xf]  ;;  %v4587_v9 = vld [vmem:[%s7351_s8 + $0x18] sm:$0xf0]  ;;  %v5107_v43 = vld [vmem:[%s7350_s9 + $0x14] sm:$0xf0] }
 0x334   :  { %v2122_v34 = vpack.c.bf16 %v2110_v38, %v2107_v13  ;;  %2658 = vmatpush.bf16.msrb.mxu1 %v4622_v55  ;;  %v2106_v11 = vmax.f32 %v6605_v20, %v2067_v58  ;;  %v4586_v2 = vor.u32 %v5095_v3, %v4585_v57  ;;  %v4590_v4 = vor.u32 %v5094_v10, %v4587_v9  ;;  %v4671_v14 = vld [vmem:[%s7352_s10 + $0x50] sm:$0xf]  ;;  %v5093_v38 = vld [vmem:[%s7351_s8 + $0x4] sm:$0xf0]  ;;  %v5092_v13 = vld [vmem:[%s7351_s8 + $0x4] sm:$0xf] }
 0x335   :  { %2519 = vmatpush.bf16.msra.mxu3 %v4548_v47  ;;  %v4672_v28 = vor.u32 %v5127_v60, %v4671_v14  ;;  %v4578_v22 = vor.u32 %v5093_v38, %v4577_v18  ;;  %v4582_v35 = vor.u32 %v5092_v13, %v4579_v46  ;;  %v4532_v12 = vor.u32 %v5107_v43, %v4531_v15  ;;  %v4663_v55 = vld [vmem:[%s7352_s10 + $0x40] sm:$0xf]  ;;  %v5105_v47 = vld [vmem:[%s7350_s9 + $0x4] sm:$0xf0]  ;;  %v4541_v57 = vld [vmem:[%s7350_s9 + $0x28] sm:$0xf0] }
 0x336   :  { %4519 = vmatmul.msk.bf16.gmra.mxu2 %vm2057_vm5, %v2122_v34  ;;  %v2121_v37 = vpack.c.bf16 %v2109_v56, %v2106_v11  ;;  %v4664_v39 = vor.u32 %v5125_v42, %v4663_v55  ;;  %v4656_v34 = vor.u32 %v5123_v51, %v4655_v49  ;;  %v4523_v58 = vld [vmem:[%s7350_s9] sm:$0xf]  ;;  %v4640_v11 = vor.u32 %v5119_v48, %v4639_v25  ;;  %v5106_v15 = vld [vmem:[%s7350_s9 + $0x14] sm:$0xf]  ;;  %v4533_v43 = vld [vmem:[%s7350_s9 + $0x18] sm:$0xf0] }
 0x337   :  { %v5238_v44 = vpop.permute.xlu0 %5237  ;;  %2771 = vmatpush.bf16.msrb.mxu2 %v4672_v28  ;;  %v4631_v56 = vld [vmem:[%s7352_s10] sm:$0xf]  ;;  %v4552_v53 = vor.u32 %v5110_v21, %v4549_v23  ;;  %v4536_v55 = vor.u32 %v5106_v15, %v4533_v43  ;;  %v4525_v42 = vld [vmem:[%s7350_s9 + $0x8] sm:$0xf0]  ;;  %v5118_v21 = vld [vmem:[%s7352_s10 + $0x14] sm:$0xf] }
 0x338   :  { %2659 = vmatpush.bf16.msrb.mxu1 %v4614_v26  ;;  %v5239_v24 = vunpack.i.l.bf16 %v5238_v44  ;;  %v5240_v62 = vunpack.i.h.bf16 %v5238_v44  ;;  %v4648_v26 = vor.u32 %v5121_v1, %v4647_v36  ;;  %v4524_v44 = vor.u32 %v5105_v47, %v4523_v58  ;;  %v4641_v23 = vld [vmem:[%s7352_s10 + $0x18] sm:$0xf0] }
 0x33a   :  { %v2113_v6 = vmax.f32 %v6692_v31, %v5239_v24  ;;  %v2070_v20 = vsel %vm2057_vm5, %v5240_v62, %v2054_v17  ;;  %v2071_v27 = vsel %vm2057_vm5, %v2054_v17, %v5239_v24  ;;  %v4601_v31 = vld [vmem:[%s7351_s8 + $0x30] sm:$0xf]  ;;  %v4565_v62 = vld [vmem:[%s7350_s9 + $0x58] sm:$0xf0] }
 0x33b   :  { %v2111_v16 = vmax.f32 %v6618_v8, %v2070_v20  ;;  %v2112_v54 = vmax.f32 %v6614_v32, %v2071_v27  ;;  %v4602_v41 = vor.u32 %v5099_v59, %v4601_v31  ;;  %v4603_v32 = vld [vmem:[%s7351_s8 + $0x38] sm:$0xf0]  ;;  %v4539_v8 = vld [vmem:[%s7350_s9 + $0x20] sm:$0xf]  ;;  %2772 = vmatpush.bf16.msrb.mxu2 %v4664_v39 }
 0x33c   :  { %v2125_v40 = vpack.c.bf16 %v2113_v6, %v2113_v6  ;;  %v4606_v19 = vor.u32 %v5098_v33, %v4603_v32  ;;  %v4540_v0 = vor.u32 %v5109_v7, %v4539_v8  ;;  %v5114_v6 = vld [vmem:[%s7350_s9 + $0x54] sm:$0xf]  ;;  %v5112_v33 = vld [vmem:[%s7350_s9 + $0x44] sm:$0xf] }
 0x33d   :  { %v2123_v61 = vpack.c.bf16 %v2111_v16, %v2111_v16  ;;  %v2124_v63 = vpack.c.bf16 %v2112_v54, %v2112_v54  ;;  %2636 = vmatpush.bf16.msrb.mxu0 %v4602_v41  ;;  %v4557_v41 = vld [vmem:[%s7350_s9 + $0x48] sm:$0xf0] }
 0x33e   :  { %2660 = vmatpush.bf16.msrb.mxu1 %v4606_v19  ;;  %2520 = vmatpush.bf16.msra.mxu3 %v4540_v0  ;;  %v4560_v32 = vor.u32 %v5112_v33, %v4557_v41  ;;  %v5122_v41 = vld [vmem:[%s7352_s10 + $0x34] sm:$0xf] }
 0x33f   :  { %2340 = vmatmul.bf16.gmra.mxu0 %v2120_v29  ;;  %2368 = vmatmul.bf16.gmra.mxu1 %v2121_v37  ;;  %v4632_v37 = vor.u32 %v5117_v50, %v4631_v56 }
 0x340   :  { %2773 = vmatpush.bf16.msrb.mxu2 %v4656_v34 }
 0x341   :  { %2637 = vmatpush.bf16.msrb.mxu0 %v4594_v45 }
 0x342   :  { %2661 = vmatpush.bf16.msrb.mxu1 %v4598_v5  ;;  %2521 = vmatpush.bf16.msra.mxu3 %v4532_v12  ;;  %v5108_v5 = vld [vmem:[%s7350_s9 + $0x24] sm:$0xf] }
 0x343   :  { %v4544_v10 = vor.u32 %v5108_v5, %v4541_v57  ;;  %v5104_v12 = vld [vmem:[%s7350_s9 + $0x4] sm:$0xf]  ;;  %v5135_v57 = vld [vmem:[%s7353_s11 + $0x38] sm:$0xff] }
 0x344   :  { %2774 = vmatpush.bf16.msrb.mxu2 %v4648_v26  ;;  %v4528_v49 = vor.u32 %v5104_v12, %v4525_v42 }
 0x345   :  { %2638 = vmatpush.bf16.msrb.mxu0 %v4586_v2 }
 0x346   :  { %4520 = vmatmul.msk.bf16.gmra.mxu2 %vm2057_vm5, %v2125_v40  ;;  %2662 = vmatpush.bf16.msrb.mxu1 %v4590_v4  ;;  %v4568_v40 = vor.u32 %v5114_v6, %v4565_v62  ;;  %v5124_v6 = vld [vmem:[%s7352_s10 + $0x44] sm:$0xf] }
 0x347   :  { %2522 = vmatpush.bf16.msra.mxu3 %v4524_v44 }
 0x348   :  { %2775 = vmatpush.bf16.msrb.mxu2 %v4640_v11 }
 0x349   :  { %2639 = vmatpush.bf16.msrb.mxu0 %v4578_v22 }
 0x34a   :  { %2663 = vmatpush.bf16.msrb.mxu1 %v4582_v35 }
 0x34b   :  { %2541 = vmatpush.bf16.msrb.mxu3 %v4568_v40  ;;  %v4665_v40 = vld [vmem:[%s7352_s10 + $0x48] sm:$0xf0] }
 0x34c   :  { %2776 = vmatpush.bf16.msrb.mxu2 %v4632_v37  ;;  %v4673_v37 = vld [vmem:[%s7352_s10 + $0x58] sm:$0xf0] }
 0x34f   :  { %2345 = vmatmul.bf16.gmra.mxu0 %v2123_v61  ;;  %2373 = vmatmul.bf16.gmra.mxu1 %v2124_v63 }
 0x350   :  { %2542 = vmatpush.bf16.msrb.mxu3 %v4560_v32  ;;  %v4657_v32 = vld [vmem:[%s7352_s10 + $0x38] sm:$0xf0]  ;;  %3093 = vmatpush.bf16.msra.mxu2 %v5135_v57 }
 0x354   :  { %2543 = vmatpush.bf16.msrb.mxu3 %v4552_v53  ;;  %v4633_v53 = vld [vmem:[%s7352_s10 + $0x8] sm:$0xf0] }
 0x358   :  { %2544 = vmatpush.bf16.msrb.mxu3 %v4544_v10  ;;  %v5133_v10 = vld [vmem:[%s7353_s11 + $0x28] sm:$0xff] }
 0x35c   :  { %2545 = vmatpush.bf16.msrb.mxu3 %v4536_v55  ;;  %v5139_v55 = vld [vmem:[%s7354_s12 + $0x8] sm:$0xff] }
 0x360   :  { %2546 = vmatpush.bf16.msrb.mxu3 %v4528_v49 }
 0x399   :  { %v2387_v30 = vpop.f32.mrf.mxu2 }
 0x39c   :  { %v2331_v24 = vpop.f32.mrf.mxu0  ;;  %v2359_v29 = vpop.f32.mrf.mxu1 }
 0x39d   :  { %v2360_v20 = vadd.f32 %v2359_v29, %v2331_v24  ;;  %v5126_v29 = vld [vmem:[%s7352_s10 + $0x54] sm:$0xf] }
 0x39e   :  { %v4676_v62 = vor.u32 %v5126_v29, %v4673_v37 }
 0x39f   :  { %v2388_v61 = vadd.f32 %v2387_v30, %v2360_v20 }
 0x3a1   :  { %v2389_v17 = vpop.f32.mrf.mxu2 }
 0x3a4   :  { %v2333_v27 = vpop.f32.mrf.mxu0  ;;  %v2361_v16 = vpop.f32.mrf.mxu1 }
 0x3a5   :  { %v2362_v54 = vadd.f32 %v2361_v16, %v2333_v27  ;;  %v4668_v27 = vor.u32 %v5124_v6, %v4665_v40  ;;  %v5154_v6 = vld [vmem:[%s7355_s13 + $0x30] sm:$0xff]  ;;  %v5153_v40 = vld [vmem:[%s7355_s13 + $0x28] sm:$0xff] }
 0x3a7   :  { %v2390_v63 = vadd.f32 %v2389_v17, %v2362_v54 }
 0x3a9   :  { %v2406_v31 = vpack.c.bf16 %v2390_v63, %v2388_v61  ;;  %v2392_v59 = vpop.f32.mrf.mxu2 }
 0x3ab   :  { %4623 = vmatmul.msk.bf16.vlgmr.msrb.gmra.mxu0 %vm2505_vm6, %v2406_v31  ;;  %4626 = vmatmul.msk.bf16.vlgmr.msrb.gmra.mxu1 %vm2505_vm6, %v2406_v31  ;;  %v2438_v60 = vrot.slane %v2406_v31, 1  ;;  %v2693_v28 = vrot.slane %v2406_v31, 2 }
 0x3ac   :  { %v2336_v8 = vpop.f32.mrf.mxu0  ;;  %v2364_v7 = vpop.f32.mrf.mxu1 }
 0x3ad   :  { %v2365_v0 = vadd.f32 %v2364_v7, %v2336_v8  ;;  %v5120_v8 = vld [vmem:[%s7352_s10 + $0x24] sm:$0xf]  ;;  %v4660_v7 = vor.u32 %v5122_v41, %v4657_v32  ;;  %v5151_v41 = vld [vmem:[%s7355_s13 + $0x18] sm:$0xff] }
 0x3af   :  { %v2393_v2 = vadd.f32 %v2392_v59, %v2365_v0 }
 0x3b1   :  { %v2394_v19 = vpop.f32.mrf.mxu2 }
 0x3b4   :  { %v2338_v52 = vpop.f32.mrf.mxu0  ;;  %v2366_v45 = vpop.f32.mrf.mxu1 }
 0x3b5   :  { %v2367_v3 = vadd.f32 %v2366_v45, %v2338_v52  ;;  %v5116_v52 = vld [vmem:[%s7352_s10 + $0x4] sm:$0xf]  ;;  %v4644_v45 = vor.u32 %v5118_v21, %v4641_v23  ;;  %v5150_v21 = vld [vmem:[%s7355_s13 + $0x10] sm:$0xff] }
 0x3b6   :  { %v4636_v5 = vor.u32 %v5116_v52, %v4633_v53 }
 0x3b7   :  { %v2395_v9 = vadd.f32 %v2394_v19, %v2367_v3  ;;  %v4649_v19 = vld [vmem:[%s7352_s10 + $0x28] sm:$0xf0]  ;;  %v5134_v3 = vld [vmem:[%s7353_s11 + $0x30] sm:$0xff] }
 0x3b8   :  { %v4652_v0 = vor.u32 %v5120_v8, %v4649_v19  ;;  %3094 = vmatpush.bf16.msra.mxu2 %v5134_v3 }
 0x3b9   :  { %v2407_v4 = vpack.c.bf16 %v2395_v9, %v2393_v2  ;;  %v2397_v14 = vpop.f32.mrf.mxu2  ;;  %v5132_v2 = vld [vmem:[%s7353_s11 + $0x20] sm:$0xff]  ;;  %v5131_v9 = vld [vmem:[%s7353_s11 + $0x18] sm:$0xff] }
 0x3bb   :  { %4624 = vmatmul.msk.bf16.gmra.mxu0 %vm2505_vm6, %v2407_v4  ;;  %4627 = vmatmul.msk.bf16.gmra.mxu1 %vm2505_vm6, %v2407_v4  ;;  %v2439_v18 = vrot.slane %v2407_v4, 1  ;;  %v2694_v38 = vrot.slane %v2407_v4, 2  ;;  %v5145_v4 = vld [vmem:[%s7354_s12 + $0x38] sm:$0xff] }
 0x3bc   :  { %v2341_v13 = vpop.f32.mrf.mxu0  ;;  %v2369_v46 = vpop.f32.mrf.mxu1  ;;  %3095 = vmatpush.bf16.msra.mxu2 %v5133_v10  ;;  %2976 = vmatpush.bf16.msra.mxu0 %v5145_v4 }
 0x3bd   :  { %v2440_v22 = vsel %vm304_vm3, %v2438_v60, %v2439_v18  ;;  %v6961_v35 = vsel %vm145_vm0, %v2693_v28, %v2694_v38  ;;  %v2370_v51 = vadd.f32 %v2369_v46, %v2341_v13  ;;  %v5144_v60 = vld [vmem:[%s7354_s12 + $0x30] sm:$0xff]  ;;  %v5143_v28 = vld [vmem:[%s7354_s12 + $0x28] sm:$0xff]  ;;  %v5142_v46 = vld [vmem:[%s7354_s12 + $0x20] sm:$0xff] }
 0x3be   :  { %4569 = vmatmul.msk.bf16.vlgmr.msra.gmra.mxu3 %vm2505_vm6, %v2440_v22  ;;  %4677 = vmatmul.msk.bf16.vlgmr.msrb.gmra.mxu2 %vm2505_vm6, %v6961_v35 }
 0x3bf   :  { %v2398_v26 = vadd.f32 %v2397_v14, %v2370_v51  ;;  %2795 = vmatpush.bf16.msra.mxu3 %v4676_v62  ;;  %v5130_v14 = vld [vmem:[%s7353_s11 + $0x10] sm:$0xff] }
 0x3c0   :  { %3096 = vmatpush.bf16.msra.mxu2 %v5132_v2  ;;  %2977 = vmatpush.bf16.msra.mxu0 %v5144_v60  ;;  %v5148_v2 = vld [vmem:[%s7355_s13] sm:$0xff] }
 0x3c1   :  { %v2399_v39 = vpop.f32.mrf.mxu2 }
 0x3c3   :  { %2796 = vmatpush.bf16.msra.mxu3 %v4668_v27 }
 0x3c4   :  { %v2343_v34 = vpop.f32.mrf.mxu0  ;;  %v2371_v36 = vpop.f32.mrf.mxu1  ;;  %3097 = vmatpush.bf16.msra.mxu2 %v5131_v9  ;;  %2978 = vmatpush.bf16.msra.mxu0 %v5143_v28  ;;  %v5147_v9 = vld [vmem:[%s7354_s12 + $0x48] sm:$0xff] }
 0x3c5   :  { %v2372_v1 = vadd.f32 %v2371_v36, %v2343_v34  ;;  %3006 = vmatpush.bf16.msra.mxu1 %v5147_v9  ;;  %v5137_v28 = vld [vmem:[%s7353_s11 + $0x48] sm:$0xff]  ;;  %v5165_v9 = vld [vmem:[%s7356_s14 + $0x38] sm:$0xff] }
 0x3c7   :  { %v2400_v30 = vadd.f32 %v2399_v39, %v2372_v1  ;;  %2797 = vmatpush.bf16.msra.mxu3 %v4660_v7  ;;  %v5138_v39 = vld [vmem:[%s7354_s12] sm:$0xff] }
 0x3c8   :  { %3098 = vmatpush.bf16.msra.mxu2 %v5130_v14  ;;  %2979 = vmatpush.bf16.msra.mxu0 %v5142_v46  ;;  %v5136_v46 = vld [vmem:[%s7353_s11 + $0x40] sm:$0xff] }
 0x3c9   :  { %v2408_v58 = vpack.c.bf16 %v2400_v30, %v2398_v26  ;;  %v2402_v47 = vpop.f32.mrf.mxu2 }
 0x3cb   :  { %4625 = vmatmul.msk.bf16.gmra.mxu0 %vm2505_vm6, %v2408_v58  ;;  %4628 = vmatmul.msk.bf16.gmra.mxu1 %vm2505_vm6, %v2408_v58  ;;  %v2441_v25 = vrot.slane %v2408_v58, 1  ;;  %v2696_v44 = vrot.slane %v2408_v58, 2 }
 0x3cc   :  { %v2346_v48 = vpop.f32.mrf.mxu0  ;;  %v2374_v11 = vpop.f32.mrf.mxu1  ;;  %2798 = vmatpush.bf16.msra.mxu3 %v4652_v0 }
 0x3cd   :  { %v2375_v56 = vadd.f32 %v2374_v11, %v2346_v48  ;;  %v2442_v50 = vsel %vm304_vm3, %v2439_v18, %v2441_v25  ;;  %v2697_v24 = vsel %vm145_vm0, %v2694_v38, %v2696_v44  ;;  %v5129_v18 = vld [vmem:[%s7353_s11 + $0x8] sm:$0xff]  ;;  %v5128_v38 = vld [vmem:[%s7353_s11] sm:$0xff]  ;;  %v5155_v11 = vld [vmem:[%s7355_s13 + $0x38] sm:$0xff] }
 0x3ce   :  { %4570 = vmatmul.msk.bf16.gmra.mxu3 %vm2505_vm6, %v2442_v50  ;;  %4678 = vmatmul.msk.bf16.gmra.mxu2 %vm2505_vm6, %v2697_v24 }
 0x3cf   :  { %v2403_v17 = vadd.f32 %v2402_v47, %v2375_v56  ;;  %3099 = vmatpush.bf16.msra.mxu2 %v5129_v18 }
 0x3d0   :  { %2799 = vmatpush.bf16.msra.mxu3 %v4644_v45  ;;  %v5149_v45 = vld [vmem:[%s7355_s13 + $0x8] sm:$0xff] }
 0x3d1   :  { %v2404_v20 = vpop.f32.mrf.mxu2  ;;  %v2421_v61 = vpack.c.bf16 %v2403_v17, %v2403_v17 }
 0x3d3   :  { %v2443_v63 = vrot.slane %v2421_v61, 1  ;;  %v2698_v31 = vrot.slane %v2421_v61, 2  ;;  %3100 = vmatpush.bf16.msra.mxu2 %v5128_v38 }
 0x3d4   :  { %v2348_v16 = vpop.f32.mrf.mxu0  ;;  %v2376_v54 = vpop.f32.mrf.mxu1  ;;  %2800 = vmatpush.bf16.msra.mxu3 %v4636_v5 }
 0x3d5   :  { %v2444_v59 = vsel %vm304_vm3, %v2441_v25, %v2443_v63  ;;  %v2699_v33 = vsel %vm145_vm0, %v2696_v44, %v2698_v31 }
 0x3de   :  { %4571 = vmatmul.msk.bf16.gmra.mxu3 %vm2505_vm6, %v2444_v59  ;;  %4679 = vmatmul.msk.bf16.gmra.mxu2 %vm2505_vm6, %v2699_v33 }
 0x3ee   :  { %4572 = vmatmul.msk.bf16.vlgmr.msrb.gmra.mxu3 %vm2505_vm6, %v2440_v22  ;;  %v5141_v22 = vld [vmem:[%s7354_s12 + $0x18] sm:$0xff] }
 0x3ef   :  { %2980 = vmatpush.bf16.msra.mxu0 %v5141_v22  ;;  %3123 = vmatpush.bf16.msrb.mxu3 %v5137_v28  ;;  %v5172_v28 = vld [vmem:[%s7357_s15 + $0x30] sm:$0xff] }
 0x3f3   :  { %3124 = vmatpush.bf16.msrb.mxu3 %v5136_v46  ;;  %v5162_v46 = vld [vmem:[%s7356_s14 + $0x20] sm:$0xff] }
 0x3fe   :  { %4573 = vmatmul.msk.bf16.gmra.mxu3 %vm2505_vm6, %v2442_v50 }
 0x40e   :  { %4574 = vmatmul.msk.bf16.gmra.mxu3 %vm2505_vm6, %v2444_v59  ;;  %v5152_v59 = vld [vmem:[%s7355_s13 + $0x20] sm:$0xff] }
 0x41e   :  { %4680 = vmatmul.msk.bf16.vlgmr.msra.gmra.mxu3 %vm2505_vm6, %v6961_v35  ;;  %v5140_v35 = vld [vmem:[%s7354_s12 + $0x10] sm:$0xff] }
 0x41f   :  { %2981 = vmatpush.bf16.msra.mxu0 %v5140_v35  ;;  %3469 = vmatpush.bf16.msra.mxu3 %v5165_v9 }
 0x423   :  { %2982 = vmatpush.bf16.msra.mxu0 %v5139_v55 }
 0x427   :  { %2983 = vmatpush.bf16.msra.mxu0 %v5138_v39 }
 0x428   :  { %v2641_v13 = vpop.f32.mrf.mxu0 }
 0x42b   :  { %3243 = vmatpush.bf16.msrb.mxu0 %v5155_v11 }
 0x42e   :  { %4681 = vmatmul.msk.bf16.gmra.mxu3 %vm2505_vm6, %v2697_v24 }
 0x42f   :  { %3244 = vmatpush.bf16.msrb.mxu0 %v5154_v6 }
 0x430   :  { %v2643_v15 = vpop.f32.mrf.mxu0 }
 0x433   :  { %3245 = vmatpush.bf16.msrb.mxu0 %v5153_v40 }
 0x437   :  { %3246 = vmatpush.bf16.msrb.mxu0 %v5152_v59 }
 0x438   :  { %v2646_v1 = vpop.f32.mrf.mxu0 }
 0x43b   :  { %3247 = vmatpush.bf16.msrb.mxu0 %v5151_v41 }
 0x43e   :  { %4682 = vmatmul.msk.bf16.gmra.mxu3 %vm2505_vm6, %v2699_v33 }
 0x43f   :  { %3248 = vmatpush.bf16.msrb.mxu0 %v5150_v21 }
 0x440   :  { %v2648_v48 = vpop.f32.mrf.mxu0 }
 0x441   :  { %v2524_v43 = vpop.f32.mrf.mxu3  ;;  %v2778_v12 = vpop.f32.mrf.mxu2 }
 0x442   :  { %v2642_v42 = vadd.f32 %v2641_v13, %v2524_v43  ;;  %v5146_v13 = vld [vmem:[%s7354_s12 + $0x40] sm:$0xff]  ;;  %v2665_v43 = vpop.f32.mrf.mxu1 }
 0x443   :  { %3249 = vmatpush.bf16.msrb.mxu0 %v5149_v45  ;;  %3007 = vmatpush.bf16.msra.mxu1 %v5146_v13  ;;  %v5181_v13 = vld [vmem:[%s7358_s16 + $0x38] sm:$0xff] }
 0x444   :  { %v2817_v34 = vadd.f32 %v2778_v12, %v2642_v42 }
 0x446   :  { %v2829_v30 = vmax.f32 %v2817_v34, 0.0 }
 0x447   :  { %3250 = vmatpush.bf16.msrb.mxu0 %v5148_v2 }
 0x448   :  { %v2651_v27 = vpop.f32.mrf.mxu0 }
 0x449   :  { %v2526_v49 = vpop.f32.mrf.mxu3  ;;  %v2780_v51 = vpop.f32.mrf.mxu2 }
 0x44a   :  { %v2644_v36 = vadd.f32 %v2643_v15, %v2526_v49  ;;  %v2667_v55 = vpop.f32.mrf.mxu1 }
 0x44c   :  { %v2819_v26 = vadd.f32 %v2780_v51, %v2644_v36  ;;  %v5157_v51 = vld [vmem:[%s7355_s13 + $0x48] sm:$0xff] }
 0x44d   :  { %3273 = vmatpush.bf16.msrb.mxu1 %v5157_v51  ;;  %v5159_v51 = vld [vmem:[%s7356_s14 + $0x8] sm:$0xff] }
 0x44e   :  { %v2831_v58 = vmax.f32 %v2819_v26, 0.0 }
 0x450   :  { %v7079_v47 = vpack.c.bf16 %v2831_v58, %v2829_v30  ;;  %v2653_v8 = vpop.f32.mrf.mxu0 }
 0x451   :  { %v2529_v25 = vpop.f32.mrf.mxu3  ;;  %v2783_v44 = vpop.f32.mrf.mxu2 }
 0x452   :  { %3101 = vmatmul.bf16.vlgmr.msra.gmra.mxu2 %v7079_v47  ;;  %v2647_v56 = vadd.f32 %v2646_v1, %v2529_v25  ;;  %v2893_v63 = vrot.slane %v7079_v47, 1  ;;  %v3161_v35 = vrot.slane %v7079_v47, 2  ;;  %v2670_v26 = vpop.f32.mrf.mxu1 }
 0x454   :  { %v2821_v29 = vadd.f32 %v2783_v44, %v2647_v56  ;;  %v5156_v56 = vld [vmem:[%s7355_s13 + $0x40] sm:$0xff] }
 0x455   :  { %3274 = vmatpush.bf16.msrb.mxu1 %v5156_v56 }
 0x456   :  { %v2833_v17 = vmax.f32 %v2821_v29, 0.0 }
 0x459   :  { %v2531_v50 = vpop.f32.mrf.mxu3  ;;  %v2785_v24 = vpop.f32.mrf.mxu2 }
 0x45a   :  { %v2649_v37 = vadd.f32 %v2648_v48, %v2531_v50  ;;  %v2672_v11 = vpop.f32.mrf.mxu1 }
 0x45c   :  { %v2823_v62 = vadd.f32 %v2785_v24, %v2649_v37 }
 0x45e   :  { %v2835_v20 = vmax.f32 %v2823_v62, 0.0 }
 0x460   :  { %v2843_v16 = vpack.c.bf16 %v2835_v20, %v2833_v17 }
 0x461   :  { %v2534_v54 = vpop.f32.mrf.mxu3  ;;  %v2788_v61 = vpop.f32.mrf.mxu2 }
 0x462   :  { %v2894_v31 = vrot.slane %v2843_v16, 1  ;;  %3106 = vmatmul.bf16.gmra.mxu2 %v2843_v16  ;;  %v2652_v32 = vadd.f32 %v2651_v27, %v2534_v54  ;;  %v3162_v38 = vrot.slane %v2843_v16, 2  ;;  %v2675_v17 = vpop.f32.mrf.mxu1 }
 0x464   :  { %v2895_v33 = vsel %vm304_vm3, %v2893_v63, %v2894_v31  ;;  %v2825_v19 = vadd.f32 %v2788_v61, %v2652_v32  ;;  %v3163_v15 = vsel %vm145_vm0, %v3161_v35, %v3162_v38 }
 0x465   :  { %2984 = vmatmul.bf16.vlgmr.msra.gmra.mxu0 %v2895_v33 }
 0x466   :  { %v2837_v53 = vmax.f32 %v2825_v19, 0.0  ;;  %3564 = vmatpush.bf16.msra.mxu0 %v5181_v13 }
 0x469   :  { %v2536_v7 = vpop.f32.mrf.mxu3  ;;  %v2790_v23 = vpop.f32.mrf.mxu2 }
 0x46a   :  { %v2654_v0 = vadd.f32 %v2653_v8, %v2536_v7 }
 0x46c   :  { %v2827_v52 = vadd.f32 %v2790_v23, %v2654_v0 }
 0x46e   :  { %v2839_v5 = vmax.f32 %v2827_v52, 0.0 }
 0x470   :  { %v2845_v57 = vpack.c.bf16 %v2839_v5, %v2837_v53 }
 0x471   :  { %v2548_v3 = vpop.f32.mrf.mxu3 }
 0x472   :  { %3111 = vmatmul.bf16.gmra.mxu2 %v2845_v57  ;;  %v2899_v10 = vrot.slane %v2845_v57, 1  ;;  %v3167_v42 = vrot.slane %v2845_v57, 2  ;;  %v2666_v34 = vadd.f32 %v2665_v43, %v2548_v3  ;;  %v5161_v43 = vld [vmem:[%s7356_s14 + $0x18] sm:$0xff] }
 0x474   :  { %v2900_v4 = vsel %vm304_vm3, %v2894_v31, %v2899_v10  ;;  %v3168_v49 = vsel %vm145_vm0, %v3162_v38, %v3167_v42  ;;  %v2677_v31 = vpop.f32.mrf.mxu1  ;;  %v5163_v38 = vld [vmem:[%s7356_s14 + $0x28] sm:$0xff] }
 0x475   :  { %2989 = vmatmul.bf16.gmra.mxu0 %v2900_v4  ;;  %v5173_v4 = vld [vmem:[%s7357_s15 + $0x38] sm:$0xff] }
 0x476   :  { %3398 = vmatpush.bf16.msrb.mxu2 %v5173_v4 }
 0x479   :  { %v2550_v14 = vpop.f32.mrf.mxu3 }
 0x47a   :  { %v2668_v36 = vadd.f32 %v2667_v55, %v2550_v14  ;;  %v5164_v14 = vld [vmem:[%s7356_s14 + $0x30] sm:$0xff]  ;;  %3399 = vmatpush.bf16.msrb.mxu2 %v5172_v28  ;;  %v5170_v55 = vld [vmem:[%s7357_s15 + $0x20] sm:$0xff] }
 0x47b   :  { %3470 = vmatpush.bf16.msra.mxu3 %v5164_v14 }
 0x47f   :  { %3471 = vmatpush.bf16.msra.mxu3 %v5163_v38 }
 0x481   :  { %v2553_v60 = vpop.f32.mrf.mxu3 }
 0x482   :  { %v2671_v50 = vadd.f32 %v2670_v26, %v2553_v60  ;;  %v5158_v26 = vld [vmem:[%s7356_s14] sm:$0xff] }
 0x483   :  { %3472 = vmatpush.bf16.msra.mxu3 %v5162_v46 }
 0x485   :  { %2994 = vmatmul.bf16.gmra.mxu0 %v2899_v10 }
 0x487   :  { %3473 = vmatpush.bf16.msra.mxu3 %v5161_v43 }
 0x489   :  { %v2555_v18 = vpop.f32.mrf.mxu3 }
 0x48a   :  { %v2673_v24 = vadd.f32 %v2672_v11, %v2555_v18 }
 0x491   :  { %v2558_v22 = vpop.f32.mrf.mxu3 }
 0x492   :  { %v2676_v63 = vadd.f32 %v2675_v17, %v2558_v22 }
 0x495   :  { %3251 = vmatmul.bf16.vlgmr.msrb.gmra.mxu0 %v3163_v15  ;;  %v5171_v15 = vld [vmem:[%s7357_s15 + $0x28] sm:$0xff] }
 0x496   :  { %3400 = vmatpush.bf16.msrb.mxu2 %v5171_v15 }
 0x499   :  { %v2560_v12 = vpop.f32.mrf.mxu3 }
 0x49a   :  { %v2678_v59 = vadd.f32 %v2677_v31, %v2560_v12  ;;  %v5180_v12 = vld [vmem:[%s7358_s16 + $0x30] sm:$0xff]  ;;  %3401 = vmatpush.bf16.msrb.mxu2 %v5170_v55 }
 0x49b   :  { %3565 = vmatpush.bf16.msra.mxu0 %v5180_v12 }
 0x4a1   :  { %v2802_v39 = vpop.f32.mrf.mxu3 }
 0x4a2   :  { %v2818_v1 = vadd.f32 %v2802_v39, %v2666_v34 }
 0x4a4   :  { %v2830_v47 = vmax.f32 %v2818_v1, 0.0  ;;  %v5169_v1 = vld [vmem:[%s7357_s15 + $0x18] sm:$0xff] }
 0x4a5   :  { %3256 = vmatmul.bf16.gmra.mxu0 %v3168_v49  ;;  %3402 = vmatpush.bf16.msrb.mxu2 %v5169_v1 }
 0x4a9   :  { %v2804_v30 = vpop.f32.mrf.mxu3 }
 0x4aa   :  { %v2820_v58 = vadd.f32 %v2804_v30, %v2668_v36  ;;  %v5179_v36 = vld [vmem:[%s7358_s16 + $0x28] sm:$0xff] }
 0x4ab   :  { %3566 = vmatpush.bf16.msra.mxu0 %v5179_v36 }
 0x4ac   :  { %v2832_v25 = vmax.f32 %v2820_v58, 0.0  ;;  %v5178_v58 = vld [vmem:[%s7358_s16 + $0x20] sm:$0xff] }
 0x4ae   :  { %v2842_v44 = vpack.c.bf16 %v2832_v25, %v2830_v47  ;;  %v5168_v25 = vld [vmem:[%s7357_s15 + $0x10] sm:$0xff] }
 0x4af   :  { %3567 = vmatpush.bf16.msra.mxu0 %v5178_v58  ;;  %3403 = vmatpush.bf16.msrb.mxu2 %v5168_v25 }
 0x4b0   :  { %4766 = vmatmul.msk.bf16.vlgmr.msrb.gmra.mxu3 %vm2966_vm7, %v2842_v44  ;;  %v2896_v27 = vrot.slane %v2842_v44, 1  ;;  %v3164_v52 = vrot.slane %v2842_v44, 2 }
 0x4b1   :  { %v2807_v48 = vpop.f32.mrf.mxu3 }
 0x4b2   :  { %v2822_v29 = vadd.f32 %v2807_v48, %v2671_v50  ;;  %v5177_v48 = vld [vmem:[%s7358_s16 + $0x18] sm:$0xff]  ;;  %v5167_v50 = vld [vmem:[%s7357_s15 + $0x8] sm:$0xff] }
 0x4b3   :  { %3568 = vmatpush.bf16.msra.mxu0 %v5177_v48  ;;  %3404 = vmatpush.bf16.msrb.mxu2 %v5167_v50 }
 0x4b4   :  { %v2834_v62 = vmax.f32 %v2822_v29, 0.0 }
 0x4b5   :  { %3261 = vmatmul.bf16.gmra.mxu0 %v3167_v42  ;;  %v5160_v42 = vld [vmem:[%s7356_s14 + $0x10] sm:$0xff] }
 0x4b6   :  { %3474 = vmatpush.bf16.msra.mxu3 %v5160_v42 }
 0x4b9   :  { %v2809_v37 = vpop.f32.mrf.mxu3 }
 0x4ba   :  { %v2824_v6 = vadd.f32 %v2809_v37, %v2673_v24  ;;  %3475 = vmatpush.bf16.msra.mxu3 %v5159_v51  ;;  %v5176_v24 = vld [vmem:[%s7358_s16 + $0x10] sm:$0xff] }
 0x4bb   :  { %3569 = vmatpush.bf16.msra.mxu0 %v5176_v24 }
 0x4bc   :  { %v2836_v40 = vmax.f32 %v2824_v6, 0.0  ;;  %v5175_v6 = vld [vmem:[%s7358_s16 + $0x8] sm:$0xff] }
 0x4be   :  { %v2844_v20 = vpack.c.bf16 %v2836_v40, %v2834_v62  ;;  %3476 = vmatpush.bf16.msra.mxu3 %v5158_v26  ;;  %v5166_v62 = vld [vmem:[%s7357_s15] sm:$0xff] }
 0x4bf   :  { %3570 = vmatpush.bf16.msra.mxu0 %v5175_v6  ;;  %3405 = vmatpush.bf16.msrb.mxu2 %v5166_v62 }
 0x4c0   :  { %v2897_v16 = vrot.slane %v2844_v20, 1  ;;  %4767 = vmatmul.msk.bf16.gmra.mxu3 %vm2966_vm7, %v2844_v20  ;;  %v3165_v23 = vrot.slane %v2844_v20, 2 }
 0x4c1   :  { %v2812_v54 = vpop.f32.mrf.mxu3 }
 0x4c2   :  { %v2898_v61 = vsel %vm304_vm3, %v2896_v27, %v2897_v16  ;;  %v2826_v33 = vadd.f32 %v2812_v54, %v2676_v63  ;;  %v3166_v45 = vsel %vm145_vm0, %v3164_v52, %v3165_v23 }
 0x4c3   :  { %4723 = vmatmul.msk.bf16.vlgmr.msra.gmra.mxu1 %vm2966_vm7, %v2898_v61  ;;  %v5174_v61 = vld [vmem:[%s7358_s16] sm:$0xff] }
 0x4c4   :  { %v2838_v8 = vmax.f32 %v2826_v33, 0.0  ;;  %3571 = vmatpush.bf16.msra.mxu0 %v5174_v61  ;;  %v5186_v61 = vld [vmem:[%s7359_s17 + $0x20] sm:$0xff] }
 0x4c9   :  { %v2814_v41 = vpop.f32.mrf.mxu3 }
 0x4ca   :  { %v2828_v32 = vadd.f32 %v2814_v41, %v2678_v59 }
 0x4cc   :  { %v2840_v7 = vmax.f32 %v2828_v32, 0.0 }
 0x4ce   :  { %v2846_v19 = vpack.c.bf16 %v2840_v7, %v2838_v8 }
 0x4d0   :  { %v2901_v0 = vrot.slane %v2846_v19, 1  ;;  %4768 = vmatmul.msk.bf16.gmra.mxu3 %vm2966_vm7, %v2846_v19  ;;  %v3169_v53 = vrot.slane %v2846_v19, 2 }
 0x4d2   :  { %v2902_v21 = vsel %vm304_vm3, %v2897_v16, %v2901_v0  ;;  %v3170_v5 = vsel %vm145_vm0, %v3165_v23, %v3169_v53 }
 0x4d3   :  { %4724 = vmatmul.msk.bf16.gmra.mxu1 %vm2966_vm7, %v2902_v21 }
 0x4d5   :  { %v3102_v30 = vpop.f32.mrf.mxu2 }
 0x4dd   :  { %v3104_v56 = vpop.f32.mrf.mxu2 }
 0x4e2   :  { %v2985_v57 = vpop.f32.mrf.mxu0 }
 0x4e3   :  { %4725 = vmatmul.msk.bf16.gmra.mxu1 %vm2966_vm7, %v2901_v0 }
 0x4e5   :  { %v3107_v63 = vpop.f32.mrf.mxu2 }
 0x4ea   :  { %v7143_v3 = vpop.f32.mrf.mxu0 }
 0x4f2   :  { %v7145_v10 = vpop.f32.mrf.mxu0 }
 0x4f3   :  { %4809 = vmatmul.msk.bf16.vlgmr.msrb.gmra.mxu1 %vm2966_vm7, %v3166_v45  ;;  %v3109_v45 = vpop.f32.mrf.mxu2 }
 0x4fa   :  { %v7156_v60 = vpop.f32.mrf.mxu0 }
 0x4fb   :  { %v3112_v46 = vpop.f32.mrf.mxu2 }
 0x502   :  { %v7172_v35 = vpop.f32.mrf.mxu0 }
 0x503   :  { %4810 = vmatmul.msk.bf16.gmra.mxu1 %vm2966_vm7, %v3170_v5 }
 0x50a   :  { %v7189_v49 = vpop.f32.mrf.mxu0 }
 0x512   :  { %v3252_v47 = vpop.f32.mrf.mxu0 }
 0x513   :  { %4811 = vmatmul.msk.bf16.gmra.mxu1 %vm2966_vm7, %v3169_v53 }
 0x51a   :  { %v3254_v29 = vpop.f32.mrf.mxu0 }
 0x522   :  { %v3257_v33 = vpop.f32.mrf.mxu0 }
 0x533   :  { %v3126_v44 = vpop.f32.mrf.mxu3 }
 0x53b   :  { %v3128_v40 = vpop.f32.mrf.mxu3 }
 0x540   :  { %v3009_v2 = vpop.f32.mrf.mxu1 }
 0x541   :  { %v3010_v37 = vadd.f32 %v3009_v2, %v2985_v57  ;;  %v3259_v57 = vpop.f32.mrf.mxu0 }
 0x543   :  { %v3103_v27 = vadd.f32 %v3102_v30, %v3010_v37  ;;  %v3131_v7 = vpop.f32.mrf.mxu3 }
 0x545   :  { %v3127_v31 = vadd.f32 %v3126_v44, %v3103_v27 }
 0x548   :  { %v3011_v18 = vpop.f32.mrf.mxu1 }
 0x549   :  { %v3012_v20 = vadd.f32 %v3011_v18, %v7143_v3 }
 0x54b   :  { %v3105_v16 = vadd.f32 %v3104_v56, %v3012_v20  ;;  %v3133_v2 = vpop.f32.mrf.mxu3 }
 0x54d   :  { %v3129_v32 = vadd.f32 %v3128_v40, %v3105_v16 }
 0x550   :  { %v7170_v22 = vpop.f32.mrf.mxu1 }
 0x551   :  { %v3015_v23 = vadd.f32 %v7170_v22, %v7145_v10  ;;  %v3262_v22 = vpop.f32.mrf.mxu0 }
 0x553   :  { %v3108_v3 = vadd.f32 %v3107_v63, %v3015_v23  ;;  %v5185_v63 = vld [vmem:[%s7359_s17 + $0x18] sm:$0xff] }
 0x555   :  { %v3132_v14 = vadd.f32 %v3131_v7, %v3108_v3  ;;  %v5183_v7 = vld [vmem:[%s7359_s17 + $0x8] sm:$0xff] }
 0x558   :  { %v3016_v39 = vpop.f32.mrf.mxu1 }
 0x559   :  { %v3017_v5 = vadd.f32 %v3016_v39, %v7156_v60  ;;  %v3136_v60 = vpop.f32.mrf.mxu3  ;;  %v3264_v48 = vpop.f32.mrf.mxu0 }
 0x55b   :  { %v3110_v9 = vadd.f32 %v3109_v45, %v3017_v5 }
 0x55d   :  { %v3134_v38 = vadd.f32 %v3133_v2, %v3110_v9 }
 0x560   :  { %v7194_v34 = vpop.f32.mrf.mxu1 }
 0x561   :  { %v3020_v10 = vadd.f32 %v7194_v34, %v7172_v35  ;;  %v3114_v35 = vpop.f32.mrf.mxu2  ;;  %v3138_v50 = vpop.f32.mrf.mxu3 }
 0x563   :  { %v3113_v42 = vadd.f32 %v3112_v46, %v3020_v10 }
 0x565   :  { %v3137_v44 = vadd.f32 %v3136_v60, %v3113_v42 }
 0x568   :  { %v3021_v11 = vpop.f32.mrf.mxu1 }
 0x569   :  { %v3022_v39 = vadd.f32 %v3021_v11, %v7189_v49 }
 0x56b   :  { %v3115_v34 = vadd.f32 %v3114_v35, %v3022_v39  ;;  %v5188_v39 = vld [vmem:[%s7360_s18] sm:$0xff] }
 0x56c   :  { %3768 = vmatpush.bf16.msra.mxu2 %v5188_v39 }
 0x56d   :  { %v3139_v11 = vadd.f32 %v3138_v50, %v3115_v34 }
 0x570   :  { %v3276_v17 = vpop.f32.mrf.mxu1 }
 0x571   :  { %v3277_v54 = vadd.f32 %v3276_v17, %v3252_v47 }
 0x573   :  { %v3291_v41 = vadd.f32 %v3277_v54, %v3127_v31  ;;  %v5187_v54 = vld [vmem:[%s7359_s17 + $0x28] sm:$0xff] }
 0x574   :  { %3723 = vmatpush.bf16.msra.mxu1 %v5187_v54 }
 0x575   :  { %v3297_v0 = vmax.f32 %v3291_v41, 0.0 }
 0x578   :  { %v3278_v59 = vpop.f32.mrf.mxu1  ;;  %3724 = vmatpush.bf16.msra.mxu1 %v5186_v61 }
 0x579   :  { %v3279_v8 = vadd.f32 %v3278_v59, %v3254_v29 }
 0x57b   :  { %v3292_v19 = vadd.f32 %v3279_v8, %v3129_v32 }
 0x57c   :  { %3725 = vmatpush.bf16.msra.mxu1 %v5185_v63 }
 0x57d   :  { %v3298_v21 = vmax.f32 %v3292_v19, 0.0 }
 0x57f   :  { %v3303_v52 = vpack.c.bf16 %v3298_v21, %v3297_v0  ;;  %v5182_v0 = vld [vmem:[%s7359_s17] sm:$0xff] }
 0x580   :  { %v3281_v53 = vpop.f32.mrf.mxu1 }
 0x581   :  { %3477 = vmatmul.bf16.vlgmr.msra.gmra.mxu3 %v3303_v52  ;;  %v3282_v4 = vadd.f32 %v3281_v53, %v3257_v33  ;;  %v3342_v36 = vrot.slane %v3303_v52, 1  ;;  %v3508_v1 = vrot.slane %v3303_v52, 2  ;;  %v5184_v33 = vld [vmem:[%s7359_s17 + $0x10] sm:$0xff] }
 0x582   :  { %3726 = vmatpush.bf16.msra.mxu1 %v5184_v33 }
 0x583   :  { %v3293_v28 = vadd.f32 %v3282_v4, %v3132_v14 }
 0x585   :  { %v3299_v43 = vmax.f32 %v3293_v28, 0.0 }
 0x586   :  { %3727 = vmatpush.bf16.msra.mxu1 %v5183_v7 }
 0x588   :  { %v3283_v18 = vpop.f32.mrf.mxu1 }
 0x589   :  { %v3284_v13 = vadd.f32 %v3283_v18, %v3259_v57 }
 0x58a   :  { %3728 = vmatpush.bf16.msra.mxu1 %v5182_v0 }
 0x58b   :  { %v3294_v15 = vadd.f32 %v3284_v13, %v3134_v38 }
 0x58d   :  { %v3300_v12 = vmax.f32 %v3294_v15, 0.0 }
 0x58f   :  { %v3304_v55 = vpack.c.bf16 %v3300_v12, %v3299_v43 }
 0x590   :  { %v3286_v51 = vpop.f32.mrf.mxu1 }
 0x591   :  { %v3343_v26 = vrot.slane %v3304_v55, 1  ;;  %3482 = vmatmul.bf16.gmra.mxu3 %v3304_v55  ;;  %v3509_v30 = vrot.slane %v3304_v55, 2  ;;  %v3287_v58 = vadd.f32 %v3286_v51, %v3262_v22 }
 0x593   :  { %v3344_v47 = vsel %vm304_vm3, %v3342_v36, %v3343_v26  ;;  %v3510_v25 = vsel %vm145_vm0, %v3508_v1, %v3509_v30  ;;  %v3295_v56 = vadd.f32 %v3287_v58, %v3137_v44 }
 0x594   :  { %3406 = vmatmul.bf16.vlgmr.msrb.gmra.mxu2 %v3344_v47  ;;  %3572 = vmatmul.bf16.vlgmr.msra.gmra.mxu0 %v3510_v25 }
 0x595   :  { %v3301_v29 = vmax.f32 %v3295_v56, 0.0 }
 0x597   :  { %v3305_v40 = vpack.c.bf16 %v3301_v29, %v3301_v29 }
 0x598   :  { %v3288_v49 = vpop.f32.mrf.mxu1 }
 0x599   :  { %v3289_v24 = vadd.f32 %v3288_v49, %v3264_v48 }
 0x59b   :  { %v3296_v37 = vadd.f32 %v3289_v24, %v3139_v11 }
 0x59d   :  { %v3302_v6 = vmax.f32 %v3296_v37, 0.0 }
 0x59f   :  { %v3322_v62 = vpack.c.bf16 %v3302_v6, %v3301_v29 }
 0x5a1   :  { %3487 = vmatmul.bf16.gmra.mxu3 %v3305_v40  ;;  %v3345_v17 = vrot.slane %v3322_v62, 1  ;;  %v3511_v20 = vrot.slane %v3322_v62, 2 }
 0x5a3   :  { %v3346_v27 = vsel %vm304_vm3, %v3343_v26, %v3345_v17  ;;  %v3512_v16 = vsel %vm145_vm0, %v3509_v30, %v3511_v20 }
 0x5a4   :  { %3411 = vmatmul.bf16.gmra.mxu2 %v3346_v27  ;;  %3577 = vmatmul.bf16.gmra.mxu0 %v3512_v16 }
 0x5b4   :  { %3416 = vmatmul.bf16.gmra.mxu2 %v3345_v17  ;;  %3582 = vmatmul.bf16.gmra.mxu0 %v3511_v20 }
 0x604   :  { %v3478_v31 = vpop.f32.mrf.mxu3 }
 0x60c   :  { %v3480_v59 = vpop.f32.mrf.mxu3 }
 0x611   :  { %v3573_v41 = vpop.f32.mrf.mxu0 }
 0x614   :  { %v3483_v32 = vpop.f32.mrf.mxu3 }
 0x617   :  { %v3407_v8 = vpop.f32.mrf.mxu2 }
 0x618   :  { %v3479_v21 = vadd.f32 %v3478_v31, %v3407_v8 }
 0x619   :  { %v3575_v19 = vpop.f32.mrf.mxu0 }
 0x61a   :  { %v3587_v52 = vadd.f32 %v3573_v41, %v3479_v21 }
 0x61c   :  { %v3485_v23 = vpop.f32.mrf.mxu3  ;;  %v3592_v57 = vmax.f32 %v3587_v52, 0.0 }
 0x61e   :  { %v3601_v4 = vrot.slane %v3592_v57, 2  ;;  %v3618_v10 = vrot.slane %v3592_v57, 4  ;;  %v3636_v51 = vrot.slane %v3592_v57, 6 }
 0x61f   :  { %v3409_v45 = vpop.f32.mrf.mxu2 }
 0x620   :  { %v3481_v53 = vadd.f32 %v3480_v59, %v3409_v45 }
 0x621   :  { %v3578_v5 = vpop.f32.mrf.mxu0 }
 0x622   :  { %v3588_v3 = vadd.f32 %v3575_v19, %v3481_v53 }
 0x624   :  { %v3593_v2 = vmax.f32 %v3588_v3, 0.0  ;;  %v3488_v9 = vpop.f32.mrf.mxu3 }
 0x626   :  { %v3602_v14 = vrot.slane %v3593_v2, 2  ;;  %v3619_v38 = vrot.slane %v3593_v2, 4  ;;  %v3637_v12 = vrot.slane %v3593_v2, 6 }
 0x627   :  { %v3412_v18 = vpop.f32.mrf.mxu2 }
 0x628   :  { %v3603_v28 = vsel %vm145_vm0, %v3601_v4, %v3602_v14  ;;  %v3484_v13 = vadd.f32 %v3483_v32, %v3412_v18  ;;  %v3620_v43 = vsel %vm3617_vm8, %v3618_v10, %v3619_v38  ;;  %v3638_v30 = vsel %vm3635_vm9, %v3636_v51, %v3637_v12 }
 0x629   :  { %v3612_v46 = vadd.f32 %v3603_v28, %v3592_v57  ;;  %v3580_v15 = vpop.f32.mrf.mxu0 }
 0x62a   :  { %v3589_v22 = vadd.f32 %v3578_v5, %v3484_v13 }
 0x62b   :  { %v3631_v42 = vadd.f32 %v3620_v43, %v3612_v46 }
 0x62c   :  { %v3594_v60 = vmax.f32 %v3589_v22, 0.0  ;;  %v3490_v55 = vpop.f32.mrf.mxu3 }
 0x62d   :  { %v3649_v35 = vadd.f32 %v3638_v30, %v3631_v42 }
 0x62e   :  { %v3604_v36 = vrot.slane %v3594_v60, 2  ;;  %v3621_v1 = vrot.slane %v3594_v60, 4  ;;  %v3639_v47 = vrot.slane %v3594_v60, 6 }
 0x62f   :  { %v3414_v26 = vpop.f32.mrf.mxu2  ;;  %v3653_v24 = vadd.f32 %v3649_v35, %v3593_v2  ;;  %v5258_v35 = vmov 0.0  }
 0x630   :  { %v3605_v58 = vsel %vm145_vm0, %v3602_v14, %v3604_v36  ;;  %v3486_v25 = vadd.f32 %v3485_v23, %v3414_v26  ;;  %v3622_v48 = vsel %vm3617_vm8, %v3619_v38, %v3621_v1  ;;  %v3640_v49 = vsel %vm3635_vm9, %v3637_v12, %v3639_v47  ;;  %3834 = vst.msk [vmem:[%s7361_s19] sm:$0xff] %vm3780_vm11, %v5258_v35 }
 0x631   :  { %v3613_v34 = vadd.f32 %v3605_v58, %v3593_v2  ;;  %v3583_v44 = vpop.f32.mrf.mxu0  ;;  %v3661_v16 = vadd.f32 %v3653_v24, %v3605_v58  ;;  %3838 = vst.msk [vmem:[%s7361_s19 + $0x20] sm:$0xff] %vm3780_vm11, %v5258_v35 }
 0x632   :  { %v3590_v56 = vadd.f32 %v3580_v15, %v3486_v25  ;;  %3839 = vst.msk [vmem:[%s7361_s19 + $0x28] sm:$0xff] %vm3780_vm11, %v5258_v35 }
 0x633   :  { %v3632_v50 = vadd.f32 %v3622_v48, %v3613_v34  ;;  %3840 = vst.msk [vmem:[%s7361_s19 + $0x30] sm:$0xff] %vm3780_vm11, %v5258_v35 }
 0x634   :  { %v3595_v11 = vmax.f32 %v3590_v56, 0.0  ;;  %3835 = vst.msk [vmem:[%s7361_s19 + $0x8] sm:$0xff] %vm3780_vm11, %v5258_v35 }
 0x635   :  { %v3650_v29 = vadd.f32 %v3640_v49, %v3632_v50  ;;  %3836 = vst.msk [vmem:[%s7361_s19 + $0x10] sm:$0xff] %vm3780_vm11, %v5258_v35 }
 0x636   :  { %v3606_v37 = vrot.slane %v3595_v11, 2  ;;  %v3623_v17 = vrot.slane %v3595_v11, 4  ;;  %v3641_v59 = vrot.slane %v3595_v11, 6  ;;  %3837 = vst.msk [vmem:[%s7361_s19 + $0x18] sm:$0xff] %vm3780_vm11, %v5258_v35 }
 0x637   :  { %v3654_v6 = vadd.f32 %v3650_v29, %v3594_v60  ;;  %v3417_v62 = vpop.f32.mrf.mxu2 }
 0x638   :  { %v3607_v40 = vsel %vm145_vm0, %v3604_v36, %v3606_v37  ;;  %v3489_v20 = vadd.f32 %v3488_v9, %v3417_v62  ;;  %v3624_v41 = vsel %vm3617_vm8, %v3621_v1, %v3623_v17  ;;  %v3615_v19 = vadd.f32 %v3606_v37, %v3595_v11 }
 0x639   :  { %v3585_v27 = vpop.f32.mrf.mxu0  ;;  %v3662_v54 = vadd.f32 %v3654_v6, %v3607_v40  ;;  %v3614_v61 = vadd.f32 %v3607_v40, %v3594_v60  ;;  %v3642_v23 = vsel %vm3635_vm9, %v3639_v47, %v3641_v59 }
 0x63a   :  { %v3591_v63 = vadd.f32 %v3583_v44, %v3489_v20 }
 0x63b   :  { %v3665_v31 = vpack.c.bf16 %v3662_v54, %v3661_v16  ;;  %v3633_v32 = vadd.f32 %v3624_v41, %v3614_v61 }
 0x63c   :  { %v3596_v33 = vmax.f32 %v3591_v63, 0.0 }
 0x63d   :  { %4932 = vmatmul.msk.bf16.vlgmr.msra.gmra.mxu1 %vm2505_vm6, %v3665_v31  ;;  %v3651_v45 = vadd.f32 %v3642_v23, %v3633_v32 }
 0x63e   :  { %v3625_v8 = vrot.slane %v3596_v33, 4  ;;  %v3643_v7 = vrot.slane %v3596_v33, 6  ;;  %v3657_v5 = vrot.slane %v3596_v33, 2 }
 0x63f   :  { %v3419_v0 = vpop.f32.mrf.mxu2  ;;  %v3655_v2 = vadd.f32 %v3651_v45, %v3595_v11 }
 0x640   :  { %v3626_v21 = vsel %vm3617_vm8, %v3623_v17, %v3625_v8  ;;  %v3644_v53 = vsel %vm3635_vm9, %v3641_v59, %v3643_v7  ;;  %v3658_v9 = vsel %vm145_vm0, %v3606_v37, %v3657_v5 }
 0x641   :  { %v3634_v52 = vadd.f32 %v3626_v21, %v3615_v19  ;;  %v3663_v14 = vadd.f32 %v3658_v9, %v3655_v2 }
 0x643   :  { %v3652_v57 = vadd.f32 %v3644_v53, %v3634_v52 }
 0x645   :  { %v3656_v3 = vadd.f32 %v3652_v57, %v3596_v33 }
 0x647   :  { %v3664_v4 = vadd.f32 %v3657_v5, %v3656_v3 }
 0x649   :  { %v3666_v18 = vpack.c.bf16 %v3664_v4, %v3663_v14 }
 0x64d   :  { %4933 = vmatmul.msk.bf16.gmra.mxu1 %vm2505_vm6, %v3666_v18 }
 0x6ba   :  { %v3730_v28 = vpop.f32.mrf.mxu1 }
 0x6bb   :  { %v3740_v13 = vmax.f32 %v3730_v28, 0.0 }
 0x6c2   :  { %v3732_v38 = vpop.f32.mrf.mxu1 }
 0x6c3   :  { %v3741_v46 = vmax.f32 %v3732_v38, 0.0 }
 0x6c5   :  { %v3744_v15 = vpack.c.bf16 %v3741_v46, %v3740_v13 }
 0x6c7   :  { %4938 = vmatmul.msk.bf16.vlgmr.msra.gmra.mxu2 %vm3754_vm10, %v3744_v15 }
 0x6ca   :  { %v3735_v10 = vpop.f32.mrf.mxu1 }
 0x6cb   :  { %v3742_v43 = vmax.f32 %v3735_v10, 0.0 }
 0x6d2   :  { %v3737_v22 = vpop.f32.mrf.mxu1 }
 0x6d3   :  { %v3743_v12 = vmax.f32 %v3737_v22, 0.0 }
 0x6d5   :  { %v3745_v60 = vpack.c.bf16 %v3743_v12, %v3742_v43 }
 0x6d7   :  { %4939 = vmatmul.msk.bf16.gmra.mxu2 %vm3754_vm10, %v3745_v60 }
 0x74a   :  { %v3770_v55 = vpop.f32.mrf.mxu2 }
 0x74b   :  { %v3781_v42 = vsel %vm3780_vm11, %v3770_v55, -inf }
 0x74c   :  { %3782 = vmax.xlane.f32.xlu2 %v3781_v42 }
 0x752   :  { %v7276_v39 = vpop.f32.mrf.mxu2 }
 0x753   :  { %v3784_v51 = vsel %vm3780_vm11, %v7276_v39, -inf }
 0x754   :  { %3785 = vmax.xlane.f32.xlu0 %v3784_v51 }
 0x75a   :  { %v7280_v36 = vpop.f32.mrf.mxu2 }
 0x75b   :  { %v3787_v1 = vsel %vm3780_vm11, %v7280_v36, -inf }
 0x75c   :  { %3788 = vmax.xlane.f32.xlu1 %v3787_v1 }
 0x762   :  { %v7284_v26 = vpop.f32.mrf.mxu2 }
 0x763   :  { %v3791_v30 = vsel %vm3790_vm12, %v7284_v26, -inf }
 0x764   :  { %3792 = vmax.xlane.f32.xlu2 %v3791_v30 }
 0x7bf   :  { %v3783_v58 = vpop.xlane.xlu2 %3782 }
 0x7c0   :  { %v3794_v47 = vsub.f32 %v3770_v55, %v3783_v58 }
 0x7c2   :  { %v3798_v25 = vmul.f32 1.442695, %v3794_v47 }
 0x7c4   :  { %5241 = vpow2.f32 %v3798_v25 }
 0x7c7   :  { %v3786_v34 = vpop.xlane.xlu0 %3785 }
 0x7c8   :  { %v3795_v44 = vsub.f32 %v7276_v39, %v3786_v34 }
 0x7ca   :  { %v5242_v48 = vpop.eup %5241  ;;  %v3800_v56 = vmul.f32 1.442695, %v3795_v44 }
 0x7cb   :  { %v3806_v50 = vsel %vm3780_vm11, %v5242_v48, 0.0 }
 0x7cc   :  { %5243 = vpow2.f32 %v3800_v56  ;;  %3807 = vadd.xlane.f32.xlu2 %v3806_v50 }
 0x7cf   :  { %v3789_v49 = vpop.xlane.xlu1 %3788 }
 0x7d0   :  { %v3796_v11 = vsub.f32 %v7280_v36, %v3789_v49 }
 0x7d2   :  { %v5244_v24 = vpop.eup %5243  ;;  %v3802_v29 = vmul.f32 1.442695, %v3796_v11 }
 0x7d3   :  { %v3809_v37 = vsel %vm3780_vm11, %v5244_v24, 0.0 }
 0x7d4   :  { %5245 = vpow2.f32 %v3802_v29  ;;  %3810 = vadd.xlane.f32.xlu0 %v3809_v37 }
 0x7d7   :  { %v3793_v6 = vpop.xlane.xlu2 %3792 }
 0x7d8   :  { %v3797_v62 = vsub.f32 %v7284_v26, %v3793_v6 }
 0x7da   :  { %v5246_v40 = vpop.eup %5245  ;;  %v3804_v17 = vmul.f32 1.442695, %v3797_v62 }
 0x7db   :  { %v3812_v20 = vsel %vm3780_vm11, %v5246_v40, 0.0 }
 0x7dc   :  { %5247 = vpow2.f32 %v3804_v17  ;;  %3813 = vadd.xlane.f32.xlu1 %v3812_v20 }
 0x7e2   :  { %v5248_v27 = vpop.eup %5247 }
 0x7e3   :  { %v3815_v16 = vsel %vm3790_vm12, %v5248_v27, 0.0 }
 0x7e4   :  { %3816 = vadd.xlane.f32.xlu2 %v3815_v16 }
 0x83f   :  { %v3808_v54 = vpop.xlane.xlu2 %3807 }
 0x840   :  { %5249 = vlog2.f32 %v3808_v54 }
 0x846   :  { %v5250_v61 = vpop.eup %5249 }
 0x847   :  { %v3819_v63 = vmul.f32 0.6931472, %v5250_v61  ;;  %v3811_v31 = vpop.xlane.xlu0 %3810 }
 0x848   :  { %5251 = vlog2.f32 %v3811_v31 }
 0x849   :  { %v3826_v59 = vadd.f32 %v3819_v63, %v3783_v58 }
 0x84b   :  { %v3830_v33 = vsub.f32 %v3770_v55, %v3826_v59 }
 0x84d   :  { %3841 = vst.msk [vmem:[%s7361_s19] sm:$0xff] %vm3780_vm11, %v3830_v33 }
 0x84e   :  { %v5252_v41 = vpop.eup %5251 }
 0x84f   :  { %v3821_v32 = vmul.f32 0.6931472, %v5252_v41  ;;  %v3814_v8 = vpop.xlane.xlu1 %3813 }
 0x850   :  { %5253 = vlog2.f32 %v3814_v8 }
 0x851   :  { %v3827_v7 = vadd.f32 %v3821_v32, %v3786_v34 }
 0x853   :  { %v3831_v19 = vsub.f32 %v7276_v39, %v3827_v7 }
 0x855   :  { %3842 = vst.msk [vmem:[%s7361_s19 + $0x8] sm:$0xff] %vm3780_vm11, %v3831_v19 }
 0x856   :  { %v5254_v0 = vpop.eup %5253 }
 0x857   :  { %v3823_v21 = vmul.f32 0.6931472, %v5254_v0  ;;  %v3817_v23 = vpop.xlane.xlu2 %3816 }
 0x858   :  { %5255 = vlog2.f32 %v3817_v23 }
 0x859   :  { %v3828_v52 = vadd.f32 %v3823_v21, %v3789_v49 }
 0x85b   :  { %v3832_v45 = vsub.f32 %v7280_v36, %v3828_v52 }
 0x85d   :  { %3843 = vst.msk [vmem:[%s7361_s19 + $0x10] sm:$0xff] %vm3780_vm11, %v3832_v45 }
 0x85e   :  { %v5256_v53 = vpop.eup %5255 }
 0x85f   :  { %v3825_v5 = vmul.f32 0.6931472, %v5256_v53 }
 0x861   :  { %v3829_v57 = vadd.f32 %v3825_v5, %v3793_v6 }
 0x863   :  { %v3833_v3 = vsub.f32 %v7284_v26, %v3829_v57 }
 0x865   :  { %3844 = vst.msk [vmem:[%s7361_s19 + $0x18] sm:$0x1f] %vm3790_vm12, %v3833_v3 }

</bundles_post_ra>
